<compile_context>
chip_gen: v7x
topology: tpu7x:2x2x1
jax: 0.10.0
libtpu: 0.0.40
codegen_flags: <defaults>
</compile_context>

<pallas_src>
import functools

import numpy as np
import jax
import jax.numpy as jnp
from jax.experimental import pallas as pl
from jax.experimental.pallas import tpu as pltpu

_STRIDES = (1, 2, 2, 2)
_CHANS = [(1, 16), (16, 32), (32, 64), (64, 128)]
_P0 = 8            # total trunk downsampling factor (1*2*2*2)
_FEAT = 128        # trunk output channels == lane width of every slab


def _round_up(x, m):
    return ((x + m - 1) // m) * m


# ------------------------------ trunk kernel ------------------------------- #
def _shift_prev(x, nbr):
    """out[row] = x[row - nbr]  (previous time step), zeros at t == 0."""
    return jnp.concatenate([jnp.zeros_like(x[:nbr]), x[:-nbr]], axis=0)


def _shift_next(x, nbr):
    """out[row] = x[row + nbr]  (next time step), zeros at t == Lf - 1."""
    return jnp.concatenate([x[nbr:], jnp.zeros_like(x[:nbr])], axis=0)


def _res_block(a, nbr, w1m_ref, w1d_ref, w1u_ref, s1_ref,
               w2m_ref, w2d_ref, w2u_ref, s2_ref):
    """One residual CnnBlock on the lane-dense (M, P*Cin) bf16 slab `a`.

    w1m/w1d/w1u : (P*Cin, 2*Q*Cout) bf16   [conv1 | 1x1 shortcut], BN folded;
                  center / previous-row / next-row tap matrices (w1u optional)
    s1          : (1, 2*Q*Cout) f32        [bias1+bn1 | bias_sc+bn_sc]
    w2m/w2d/w2u : (Q*Cout, Q*Cout) bf16    conv2 tap matrices, BN folded
    s2          : (1, Q*Cout) f32
    returns     : (M, Q*Cout) bf16
    """
    f32 = jnp.float32
    nco = w2m_ref.shape[0]                               # Q*Cout == 128

    # conv1 (+ fused 1x1 shortcut): per-tap matmuls summed in f32.
    h = jnp.dot(a, w1m_ref[...], preferred_element_type=f32)
    h = h + jnp.dot(_shift_prev(a, nbr), w1d_ref[...],
                    preferred_element_type=f32)
    if w1u_ref is not None:        # only stride-1 blocks read the next row
        h = h + jnp.dot(_shift_next(a, nbr), w1u_ref[...],
                        preferred_element_type=f32)
    h = h + s1_ref[...]
    act = jnp.maximum(h[:, :nco], 0.0).astype(jnp.bfloat16)   # conv1+bn1+relu
    sc = h[:, nco:]                                            # shortcut+bn_sc

    # conv2 (stride 1) + bn2.
    y = jnp.dot(act, w2m_ref[...], preferred_element_type=f32)
    y = y + jnp.dot(_shift_prev(act, nbr), w2d_ref[...],
                    preferred_element_type=f32)
    y = y + jnp.dot(_shift_next(act, nbr), w2u_ref[...],
                    preferred_element_type=f32)
    y = y + s2_ref[...]

    return jnp.maximum(y + sc, 0.0).astype(jnp.bfloat16)      # + residual, relu


def trunk_kernel(nbr, x_ref, *rest):
    """All 4 CnnBlocks for both branches.  x_ref: (M, 8) raw phase slab."""
    out_ref = rest[-1]
    w = rest[:-1]
    # Deliberate precision choice: bf16 MXU operands / f32 accumulation.
    a = x_ref[...].astype(jnp.bfloat16)
    idx = 0
    for stride in _STRIDES:
        if stride == 1:
            w1m, w1d, w1u, s1, w2m, w2d, w2u, s2 = w[idx:idx + 8]
            idx += 8
        else:                       # stride 2: the "next row" tap never fires
            w1m, w1d, s1, w2m, w2d, w2u, s2 = w[idx:idx + 7]
            w1u = None
            idx += 7
        a = _res_block(a, nbr, w1m, w1d, w1u, s1, w2m, w2d, w2u, s2)
    out_ref[...] = a                                           # (M, 128) bf16


# ------------------------------- FC kernel --------------------------------- #
def fc_kernel(f_ref, w1_ref, b1_ref, w2_ref, b2_ref, w3_ref, b3_ref,
              w4_ref, b4_ref, out_ref, acc_ref):
    """fc_layers; the first (huge) Linear is K-tiled over the grid.

    f_ref holds ALL feature K-chunks, VMEM-resident across grid steps
    (shape (nk, B, ck)); w1_ref streams one (ck, 256) block per step.
    """
    k = pl.program_id(0)

    @pl.when(k == 0)
    def _():
        acc_ref[...] = jnp.zeros_like(acc_ref)

    acc_ref[...] += jnp.dot(f_ref[k], w1_ref[...],
                            preferred_element_type=jnp.float32)

    @pl.when(k == pl.num_programs(0) - 1)
    def _():
        def lin(h, w_ref, b_ref):
            return jnp.dot(h.astype(w_ref.dtype), w_ref[...],
                           preferred_element_type=jnp.float32) + b_ref[...]

        h = jnp.maximum(acc_ref[...] + b1_ref[...], 0.0)
        # TODO(synk): Dropout(0.5) layers are identity (inference semantics).
        h = jnp.maximum(lin(h, w2_ref, b2_ref), 0.0)
        h = jnp.maximum(lin(h, w3_ref, b3_ref), 0.0)
        z = lin(h, w4_ref, b4_ref)
        out_ref[...] = 1.0 / (1.0 + jnp.exp(-z))


# ------------------------------ forward glue -------------------------------- #
def voice_match_forward(x1, x2, trunk_w, fc_w):
    """x1, x2: (B, 1, L) f32 (PyTorch NCL).  Returns (B, 1) sigmoid scores."""
    B, _, L = x1.shape
    assert L % _P0 == 0
    Lf = L // _P0
    nbr = 2 * B                       # rows per time step (2 branches x batch)
    M = Lf * nbr

    # Phase-decompose + lay rows out time-major: row = m*(2B) + b*2 + branch.
    x = jnp.stack([x1, x2], axis=1).reshape(B, 2, Lf, _P0)      # (B,2,Lf,8)
    x2d = jnp.transpose(x, (2, 0, 1, 3)).reshape(M, _P0)        # (M, 8)

    # Whole trunk in one grid-less call: inter-block activations never touch
    # HBM and every slab is 128-lane dense, so even L=8000 with small B fits
    # VMEM comfortably (a few MB of live slabs).
    feats2d = pl.pallas_call(
        functools.partial(trunk_kernel, nbr),
        out_shape=jax.ShapeDtypeStruct((M, _FEAT), jnp.bfloat16),
    )(x2d, *trunk_w)

    # (M,128) time-major -> (B, 2*Lf*128) in (branch, pos, channel) order;
    # fc w1 rows were pre-permuted to exactly this order (no NCL transpose).
    feats = feats2d.reshape(Lf, B, 2, _FEAT).transpose(1, 2, 0, 3)
    feats = feats.reshape(B, 2 * Lf * _FEAT)

    # ---- fc head: first Linear K-tiled, feature chunks VMEM-resident ----
    w1 = fc_w[0]
    F2 = feats.shape[1]
    ck = min(4096, _round_up(F2, 128))        # 2 MB bf16 weight tiles
    F2p = _round_up(F2, ck)
    if F2p != F2:                             # remainder handling: zero-pad
        feats = jnp.pad(feats, ((0, 0), (0, F2p - F2)))
        w1 = jnp.pad(w1, ((0, F2p - F2), (0, 0)))
    nk = F2p // ck
    feats3 = feats.reshape(B, nk, ck).transpose(1, 0, 2)        # (nk, B, ck)

    w1_kwargs = {}
    if nk >= 3:
        # At production scale (~131 MB bf16) w1 is the dominant HBM stream;
        # triple-buffer it so its DMA latency is never exposed.
        w1_kwargs = dict(pipeline_mode=pl.Buffered(3))
    in_specs = [pl.BlockSpec((nk, B, ck), lambda k: (0, 0, 0)),  # resident feats
                pl.BlockSpec((ck, 256), lambda k: (k, 0), **w1_kwargs)]
    in_specs += [pl.BlockSpec(w.shape, lambda k: (0, 0)) for w in fc_w[1:]]

    out = pl.pallas_call(
        fc_kernel,
        out_shape=jax.ShapeDtypeStruct((B, 1), jnp.float32),
        grid=(nk,),
        in_specs=in_specs,
        out_specs=pl.BlockSpec((B, 1), lambda k: (0, 0)),
        scratch_shapes=[pltpu.VMEM((B, 256), jnp.float32)],
        compiler_params=pltpu.CompilerParams(
            dimension_semantics=("arbitrary",)),
    )(feats3, w1, *fc_w[1:])
    return out


# ---------------------------- parameter init/prep --------------------------- #
def _fold_bn(key, cout):
    kg, kb, km, kv = jax.random.split(key, 4)
    gamma = 1.0 + 0.1 * jax.random.normal(kg, (cout,), jnp.float32)
    beta = 0.1 * jax.random.normal(kb, (cout,), jnp.float32)
    mean = 0.1 * jax.random.normal(km, (cout,), jnp.float32)
    var = jax.random.uniform(kv, (cout,), jnp.float32, 0.5, 1.5)
    scale = gamma * jax.lax.rsqrt(var + 1e-5)
    shift = beta - mean * scale
    return scale, shift


def init_block_raw(key, cin, cout):
    ks = jax.random.split(key, 9)

    def conv_w(k, ksz, ci, co):
        return jax.random.normal(k, (ksz, ci, co), jnp.float32) / np.sqrt(ci * ksz)

    p = dict(w1=conv_w(ks[0], 3, cin, cout),
             w2=conv_w(ks[1], 3, cout, cout),
             wsc=conv_w(ks[2], 1, cin, cout)[0],
             b1=0.05 * jax.random.normal(ks[3], (cout,), jnp.float32),
             b2=0.05 * jax.random.normal(ks[4], (cout,), jnp.float32),
             bsc=0.05 * jax.random.normal(ks[5], (cout,), jnp.float32))
    p["s1"], p["sh1"] = _fold_bn(ks[6], cout)
    p["s2"], p["sh2"] = _fold_bn(ks[7], cout)
    p["ssc"], p["shsc"] = _fold_bn(ks[8], cout)
    return p


def prep_block(p, cin, cout, P, stride):
    """Build the per-tap polyphase weight matrices for one CnnBlock.

    Activation lanes are (phase, channel), phase-major; a kernel-3 / stride-s
    conv over P input phases producing Q = P//s output phases becomes
        y = x @ Wm + prev_row(x) @ Wd [+ next_row(x) @ Wu]      (+ shift)
    BN scale folds into the weights, bias+BN-shift into the shift vector, and
    the 1x1 shortcut is column-concatenated with conv1.
    """
    Q = P // stride
    s1 = np.asarray(p["s1"]); sh1 = np.asarray(p["sh1"])
    s2 = np.asarray(p["s2"]); sh2 = np.asarray(p["sh2"])
    ssc = np.asarray(p["ssc"]); shsc = np.asarray(p["shsc"])
    b1 = np.asarray(p["b1"]); b2 = np.asarray(p["b2"]); bsc = np.asarray(p["bsc"])
    w1 = np.asarray(p["w1"]) * s1                 # (3, cin, cout), BN folded
    w2 = np.asarray(p["w2"]) * s2                 # (3, cout, cout)
    wsc = np.asarray(p["wsc"]) * ssc              # (cin, cout)
    Wl1, Wc1, Wr1 = w1[0], w1[1], w1[2]
    Wl2, Wc2, Wr2 = w2[0], w2[1], w2[2]

    nco = Q * cout

    def put(mat, blk, prow, qcol, rsz, csz, coff=0):
        mat[prow * rsz:(prow + 1) * rsz,
            coff + qcol * csz: coff + (qcol + 1) * csz] += blk

    w1m = np.zeros((P * cin, 2 * nco), np.float32)
    w1d = np.zeros((P * cin, 2 * nco), np.float32)
    w1u = np.zeros((P * cin, 2 * nco), np.float32)
    for q in range(Q):
        c = stride * q
        put(w1m, Wc1, c, q, cin, cout)
        if c + 1 < P:
            put(w1m, Wr1, c + 1, q, cin, cout)
        else:
            put(w1u, Wr1, 0, q, cin, cout)
        if c - 1 >= 0:
            put(w1m, Wl1, c - 1, q, cin, cout)
        else:
            put(w1d, Wl1, P - 1, q, cin, cout)
        put(w1m, wsc, c, q, cin, cout, coff=nco)    # fused 1x1 shortcut
    s1vec = np.concatenate([np.tile(b1 * s1 + sh1, Q),
                            np.tile(bsc * ssc + shsc, Q)])[None, :]

    w2m = np.zeros((nco, nco), np.float32)
    w2d = np.zeros((nco, nco), np.float32)
    w2u = np.zeros((nco, nco), np.float32)
    for q in range(Q):
        put(w2m, Wc2, q, q, cout, cout)
        if q + 1 < Q:
            put(w2m, Wr2, q + 1, q, cout, cout)
        else:
            put(w2u, Wr2, 0, q, cout, cout)
        if q - 1 >= 0:
            put(w2m, Wl2, q - 1, q, cout, cout)
        else:
            put(w2d, Wl2, Q - 1, q, cout, cout)
    s2vec = np.tile(b2 * s2 + sh2, Q)[None, :]

    out = [jnp.asarray(w1m, jnp.bfloat16), jnp.asarray(w1d, jnp.bfloat16)]
    if stride == 1:
        out.append(jnp.asarray(w1u, jnp.bfloat16))
    out += [jnp.asarray(s1vec, jnp.float32),
            jnp.asarray(w2m, jnp.bfloat16), jnp.asarray(w2d, jnp.bfloat16),
            jnp.asarray(w2u, jnp.bfloat16), jnp.asarray(s2vec, jnp.float32)]
    return out


def init_fc_raw(key, din):
    dims = [din, 256, 128, 64, 1]
    params = []
    for i in range(4):
        kw, kb = jax.random.split(jax.random.fold_in(key, i))
        w = jax.random.normal(kw, (dims[i], dims[i + 1]), jnp.float32) / np.sqrt(dims[i])
        b = 0.05 * jax.random.normal(kb, (1, dims[i + 1]), jnp.float32)
        params += [w, b]
    return params


def prep_fc(fc_raw, lf, c=_FEAT):
    """Permute w1 rows from torch (branch, channel, pos) feature order to the
    kernel's (branch, pos, channel) order; cast weights to bf16."""
    w1, b1, w2, b2, w3, b3, w4, b4 = fc_raw
    idx = np.arange(2 * lf * c)
    br, r = idx // (lf * c), idx % (lf * c)
    m, ch = r // c, r % c
    perm = br * (c * lf) + ch * lf + m
    w1p = jnp.asarray(np.asarray(w1)[perm, :])
    return [w1p.astype(jnp.bfloat16), b1, w2.astype(jnp.bfloat16), b2,
            w3.astype(jnp.bfloat16), b3, w4.astype(jnp.bfloat16), b4]


# ---------------------------- pure-JAX reference ---------------------------- #
def _ref_conv(x_ncl, w_kic, bias, stride, pad):
    w_oik = jnp.transpose(w_kic, (2, 1, 0))
    y = jax.lax.conv_general_dilated(
        x_ncl, w_oik, window_strides=(stride,), padding=[(pad, pad)],
        dimension_numbers=("NCH", "OIH", "NCH"),
        precision=jax.lax.Precision.HIGHEST)
    return y + bias[None, :, None]


def _ref_block(x_ncl, p, stride):
    aff = lambda h, s, sh: h * s[None, :, None] + sh[None, :, None]
    h1 = jnp.maximum(aff(_ref_conv(x_ncl, p["w1"], p["b1"], stride, 1),
                         p["s1"], p["sh1"]), 0.0)
    h2 = aff(_ref_conv(h1, p["w2"], p["b2"], 1, 1), p["s2"], p["sh2"])
    sc = aff(_ref_conv(x_ncl, p["wsc"][None], p["bsc"], stride, 0),
             p["ssc"], p["shsc"])
    return jnp.maximum(h2 + sc, 0.0)


def ref_forward(x1, x2, blocks_raw, fc_raw):
    def cnn(x):
        for p, s in zip(blocks_raw, _STRIDES):
            x = _ref_block(x, p, s)
        return x.reshape(x.shape[0], -1)             # torch .view(B, -1) order

    h = jnp.concatenate([cnn(x1), cnn(x2)], axis=1)
    w1, b1, w2, b2, w3, b3, w4, b4 = fc_raw
    lin = lambda a, w, b: jnp.dot(a, w, precision=jax.lax.Precision.HIGHEST) + b
    h = jnp.maximum(lin(h, w1, b1), 0.0)
    h = jnp.maximum(lin(h, w2, b2), 0.0)
    h = jnp.maximum(lin(h, w3, b3), 0.0)
    z = lin(h, w4, b4)
    return 1.0 / (1.0 + jnp.exp(-z))


# --------------------------------- main ------------------------------------ #
if __name__ == "__main__":
    # Original model implies L = 8000 (-> 128*1000 flattened features); we use
    # a scaled-down L = 64 (-> 128*8) and size the FC head accordingly.
    B, L = 2, 64
    Lf = L // _P0
    key = jax.random.PRNGKey(0)
    k1, k2, kp = jax.random.split(key, 3)
    x1 = jax.random.normal(k1, (B, 1, L), jnp.float32)   # NCL, like PyTorch
    x2 = jax.random.normal(k2, (B, 1, L), jnp.float32)

    blocks_raw = [init_block_raw(jax.random.fold_in(kp, i), ci, co)
                  for i, (ci, co) in enumerate(_CHANS)]
    fc_raw = init_fc_raw(jax.random.fold_in(kp, 100), 128 * Lf * 2)

    trunk_w = []
    P = _P0
    for p, (ci, co), s in zip(blocks_raw, _CHANS, _STRIDES):
        trunk_w += prep_block(p, ci, co, P, s)
        P //= s
    fc_w = prep_fc(fc_raw, Lf, _FEAT)

    fwd = jax.jit(voice_match_forward)
    out = jax.block_until_ready(fwd(x1, x2, trunk_w, fc_w))
    assert out.shape == (B, 1), out.shape
    assert np.all(np.isfinite(np.asarray(out)))

    ref = jax.block_until_ready(
        jax.jit(ref_forward)(x1, x2, blocks_raw, fc_raw))
    # Kernel uses bf16 MXU operands / bf16 activations (f32 accumulation);
    # reference is f32 / HIGHEST -- deliberate accuracy/perf trade-off.
    np.testing.assert_allclose(np.asarray(out), np.asarray(ref),
                               rtol=5e-2, atol=2.5e-2)
    print("KERNEL_OK")
</pallas_src>

<mosaic_0001>
module attributes {stable_mosaic.version = 11 : i64} {
  func.func @trunk_kernel(%arg0: memref<32x8xf32, #tpu.memory_space<vmem>>, %arg1: memref<8x256xbf16, #tpu.memory_space<vmem>>, %arg2: memref<8x256xbf16, #tpu.memory_space<vmem>>, %arg3: memref<8x256xbf16, #tpu.memory_space<vmem>>, %arg4: memref<1x256xf32, #tpu.memory_space<vmem>>, %arg5: memref<128x128xbf16, #tpu.memory_space<vmem>>, %arg6: memref<128x128xbf16, #tpu.memory_space<vmem>>, %arg7: memref<128x128xbf16, #tpu.memory_space<vmem>>, %arg8: memref<1x128xf32, #tpu.memory_space<vmem>>, %arg9: memref<128x256xbf16, #tpu.memory_space<vmem>>, %arg10: memref<128x256xbf16, #tpu.memory_space<vmem>>, %arg11: memref<1x256xf32, #tpu.memory_space<vmem>>, %arg12: memref<128x128xbf16, #tpu.memory_space<vmem>>, %arg13: memref<128x128xbf16, #tpu.memory_space<vmem>>, %arg14: memref<128x128xbf16, #tpu.memory_space<vmem>>, %arg15: memref<1x128xf32, #tpu.memory_space<vmem>>, %arg16: memref<128x256xbf16, #tpu.memory_space<vmem>>, %arg17: memref<128x256xbf16, #tpu.memory_space<vmem>>, %arg18: memref<1x256xf32, #tpu.memory_space<vmem>>, %arg19: memref<128x128xbf16, #tpu.memory_space<vmem>>, %arg20: memref<128x128xbf16, #tpu.memory_space<vmem>>, %arg21: memref<128x128xbf16, #tpu.memory_space<vmem>>, %arg22: memref<1x128xf32, #tpu.memory_space<vmem>>, %arg23: memref<128x256xbf16, #tpu.memory_space<vmem>>, %arg24: memref<128x256xbf16, #tpu.memory_space<vmem>>, %arg25: memref<1x256xf32, #tpu.memory_space<vmem>>, %arg26: memref<128x128xbf16, #tpu.memory_space<vmem>>, %arg27: memref<128x128xbf16, #tpu.memory_space<vmem>>, %arg28: memref<128x128xbf16, #tpu.memory_space<vmem>>, %arg29: memref<1x128xf32, #tpu.memory_space<vmem>>, %arg30: memref<32x128xbf16, #tpu.memory_space<vmem>>) attributes {dimension_semantics = [], scalar_prefetch = 0 : i64, scratch_operands = 0 : i64, tpu.core_type = #tpu.core_type<tc>} {
    %c0 = arith.constant 0 : index
    %c0_0 = arith.constant 0 : index
    %0 = vector.load %arg0[%c0, %c0_0] : memref<32x8xf32, #tpu.memory_space<vmem>>, vector<32x8xf32>
    %1 = arith.truncf %0 : vector<32x8xf32> to vector<32x8xbf16>
    %c0_1 = arith.constant 0 : index
    %c0_2 = arith.constant 0 : index
    %2 = vector.load %arg1[%c0_1, %c0_2] : memref<8x256xbf16, #tpu.memory_space<vmem>>, vector<8x256xbf16>
    %cst = arith.constant dense<0.000000e+00> : vector<32x256xf32>
    %3 = tpu.matmul %1, %2, %cst {dimension_numbers = #tpu.dot_dimension_numbers<[1], [0], [0], [1], [0, 0, 1, 1], [], []>} : vector<32x8xbf16>, vector<8x256xbf16>, vector<32x256xf32> -> vector<32x256xf32>
    %cst_3 = arith.constant 0.000000e+00 : bf16
    %4 = vector.broadcast %cst_3 : bf16 to vector<4x8xbf16>
    %5 = vector.extract_strided_slice %1 {offsets = [0, 0], sizes = [28, 8], strides = [1, 1]} : vector<32x8xbf16> to vector<28x8xbf16>
    %6 = tpu.concatenate %4, %5 in 0 : vector<4x8xbf16>, vector<28x8xbf16> -> vector<32x8xbf16>
    %c0_4 = arith.constant 0 : index
    %c0_5 = arith.constant 0 : index
    %7 = vector.load %arg2[%c0_4, %c0_5] : memref<8x256xbf16, #tpu.memory_space<vmem>>, vector<8x256xbf16>
    %cst_6 = arith.constant dense<0.000000e+00> : vector<32x256xf32>
    %8 = tpu.matmul %6, %7, %cst_6 {dimension_numbers = #tpu.dot_dimension_numbers<[1], [0], [0], [1], [0, 0, 1, 1], [], []>} : vector<32x8xbf16>, vector<8x256xbf16>, vector<32x256xf32> -> vector<32x256xf32>
    %9 = arith.addf %3, %8 : vector<32x256xf32>
    %10 = vector.extract_strided_slice %1 {offsets = [4, 0], sizes = [28, 8], strides = [1, 1]} : vector<32x8xbf16> to vector<28x8xbf16>
    %cst_7 = arith.constant 0.000000e+00 : bf16
    %11 = vector.broadcast %cst_7 : bf16 to vector<4x8xbf16>
    %12 = tpu.concatenate %10, %11 in 0 : vector<28x8xbf16>, vector<4x8xbf16> -> vector<32x8xbf16>
    %c0_8 = arith.constant 0 : index
    %c0_9 = arith.constant 0 : index
    %13 = vector.load %arg3[%c0_8, %c0_9] : memref<8x256xbf16, #tpu.memory_space<vmem>>, vector<8x256xbf16>
    %cst_10 = arith.constant dense<0.000000e+00> : vector<32x256xf32>
    %14 = tpu.matmul %12, %13, %cst_10 {dimension_numbers = #tpu.dot_dimension_numbers<[1], [0], [0], [1], [0, 0, 1, 1], [], []>} : vector<32x8xbf16>, vector<8x256xbf16>, vector<32x256xf32> -> vector<32x256xf32>
    %15 = arith.addf %9, %14 : vector<32x256xf32>
    %c0_11 = arith.constant 0 : index
    %c0_12 = arith.constant 0 : index
    %16 = vector.load %arg4[%c0_11, %c0_12] : memref<1x256xf32, #tpu.memory_space<vmem>>, vector<1x256xf32>
    %17 = vector.broadcast %16 : vector<1x256xf32> to vector<32x256xf32>
    %18 = arith.addf %15, %17 : vector<32x256xf32>
    %19 = vector.extract_strided_slice %18 {offsets = [0, 0], sizes = [32, 128], strides = [1, 1]} : vector<32x256xf32> to vector<32x128xf32>
    %cst_13 = arith.constant 0.000000e+00 : f32
    %20 = vector.broadcast %cst_13 : f32 to vector<32x128xf32>
    %21 = arith.maximumf %19, %20 : vector<32x128xf32>
    %22 = arith.truncf %21 : vector<32x128xf32> to vector<32x128xbf16>
    %23 = vector.extract_strided_slice %18 {offsets = [0, 128], sizes = [32, 128], strides = [1, 1]} : vector<32x256xf32> to vector<32x128xf32>
    %c0_14 = arith.constant 0 : index
    %c0_15 = arith.constant 0 : index
    %24 = vector.load %arg5[%c0_14, %c0_15] : memref<128x128xbf16, #tpu.memory_space<vmem>>, vector<128x128xbf16>
    %cst_16 = arith.constant dense<0.000000e+00> : vector<32x128xf32>
    %25 = tpu.matmul %22, %24, %cst_16 {dimension_numbers = #tpu.dot_dimension_numbers<[1], [0], [0], [1], [0, 0, 1, 1], [], []>} : vector<32x128xbf16>, vector<128x128xbf16>, vector<32x128xf32> -> vector<32x128xf32>
    %cst_17 = arith.constant 0.000000e+00 : bf16
    %26 = vector.broadcast %cst_17 : bf16 to vector<4x128xbf16>
    %27 = vector.extract_strided_slice %22 {offsets = [0, 0], sizes = [28, 128], strides = [1, 1]} : vector<32x128xbf16> to vector<28x128xbf16>
    %28 = tpu.concatenate %26, %27 in 0 : vector<4x128xbf16>, vector<28x128xbf16> -> vector<32x128xbf16>
    %c0_18 = arith.constant 0 : index
    %c0_19 = arith.constant 0 : index
    %29 = vector.load %arg6[%c0_18, %c0_19] : memref<128x128xbf16, #tpu.memory_space<vmem>>, vector<128x128xbf16>
    %cst_20 = arith.constant dense<0.000000e+00> : vector<32x128xf32>
    %30 = tpu.matmul %28, %29, %cst_20 {dimension_numbers = #tpu.dot_dimension_numbers<[1], [0], [0], [1], [0, 0, 1, 1], [], []>} : vector<32x128xbf16>, vector<128x128xbf16>, vector<32x128xf32> -> vector<32x128xf32>
    %31 = arith.addf %25, %30 : vector<32x128xf32>
    %32 = vector.extract_strided_slice %22 {offsets = [4, 0], sizes = [28, 128], strides = [1, 1]} : vector<32x128xbf16> to vector<28x128xbf16>
    %cst_21 = arith.constant 0.000000e+00 : bf16
    %33 = vector.broadcast %cst_21 : bf16 to vector<4x128xbf16>
    %34 = tpu.concatenate %32, %33 in 0 : vector<28x128xbf16>, vector<4x128xbf16> -> vector<32x128xbf16>
    %c0_22 = arith.constant 0 : index
    %c0_23 = arith.constant 0 : index
    %35 = vector.load %arg7[%c0_22, %c0_23] : memref<128x128xbf16, #tpu.memory_space<vmem>>, vector<128x128xbf16>
    %cst_24 = arith.constant dense<0.000000e+00> : vector<32x128xf32>
    %36 = tpu.matmul %34, %35, %cst_24 {dimension_numbers = #tpu.dot_dimension_numbers<[1], [0], [0], [1], [0, 0, 1, 1], [], []>} : vector<32x128xbf16>, vector<128x128xbf16>, vector<32x128xf32> -> vector<32x128xf32>
    %37 = arith.addf %31, %36 : vector<32x128xf32>
    %c0_25 = arith.constant 0 : index
    %c0_26 = arith.constant 0 : index
    %38 = vector.load %arg8[%c0_25, %c0_26] : memref<1x128xf32, #tpu.memory_space<vmem>>, vector<1x128xf32>
    %39 = vector.broadcast %38 : vector<1x128xf32> to vector<32x128xf32>
    %40 = arith.addf %37, %39 : vector<32x128xf32>
    %41 = arith.addf %40, %23 : vector<32x128xf32>
    %cst_27 = arith.constant 0.000000e+00 : f32
    %42 = vector.broadcast %cst_27 : f32 to vector<32x128xf32>
    %43 = arith.maximumf %41, %42 : vector<32x128xf32>
    %44 = arith.truncf %43 : vector<32x128xf32> to vector<32x128xbf16>
    %c0_28 = arith.constant 0 : index
    %c0_29 = arith.constant 0 : index
    %45 = vector.load %arg9[%c0_28, %c0_29] : memref<128x256xbf16, #tpu.memory_space<vmem>>, vector<128x256xbf16>
    %cst_30 = arith.constant dense<0.000000e+00> : vector<32x256xf32>
    %46 = tpu.matmul %44, %45, %cst_30 {dimension_numbers = #tpu.dot_dimension_numbers<[1], [0], [0], [1], [0, 0, 1, 1], [], []>} : vector<32x128xbf16>, vector<128x256xbf16>, vector<32x256xf32> -> vector<32x256xf32>
    %cst_31 = arith.constant 0.000000e+00 : bf16
    %47 = vector.broadcast %cst_31 : bf16 to vector<4x128xbf16>
    %48 = vector.extract_strided_slice %44 {offsets = [0, 0], sizes = [28, 128], strides = [1, 1]} : vector<32x128xbf16> to vector<28x128xbf16>
    %49 = tpu.concatenate %47, %48 in 0 : vector<4x128xbf16>, vector<28x128xbf16> -> vector<32x128xbf16>
    %c0_32 = arith.constant 0 : index
    %c0_33 = arith.constant 0 : index
    %50 = vector.load %arg10[%c0_32, %c0_33] : memref<128x256xbf16, #tpu.memory_space<vmem>>, vector<128x256xbf16>
    %cst_34 = arith.constant dense<0.000000e+00> : vector<32x256xf32>
    %51 = tpu.matmul %49, %50, %cst_34 {dimension_numbers = #tpu.dot_dimension_numbers<[1], [0], [0], [1], [0, 0, 1, 1], [], []>} : vector<32x128xbf16>, vector<128x256xbf16>, vector<32x256xf32> -> vector<32x256xf32>
    %52 = arith.addf %46, %51 : vector<32x256xf32>
    %c0_35 = arith.constant 0 : index
    %c0_36 = arith.constant 0 : index
    %53 = vector.load %arg11[%c0_35, %c0_36] : memref<1x256xf32, #tpu.memory_space<vmem>>, vector<1x256xf32>
    %54 = vector.broadcast %53 : vector<1x256xf32> to vector<32x256xf32>
    %55 = arith.addf %52, %54 : vector<32x256xf32>
    %56 = vector.extract_strided_slice %55 {offsets = [0, 0], sizes = [32, 128], strides = [1, 1]} : vector<32x256xf32> to vector<32x128xf32>
    %cst_37 = arith.constant 0.000000e+00 : f32
    %57 = vector.broadcast %cst_37 : f32 to vector<32x128xf32>
    %58 = arith.maximumf %56, %57 : vector<32x128xf32>
    %59 = arith.truncf %58 : vector<32x128xf32> to vector<32x128xbf16>
    %60 = vector.extract_strided_slice %55 {offsets = [0, 128], sizes = [32, 128], strides = [1, 1]} : vector<32x256xf32> to vector<32x128xf32>
    %c0_38 = arith.constant 0 : index
    %c0_39 = arith.constant 0 : index
    %61 = vector.load %arg12[%c0_38, %c0_39] : memref<128x128xbf16, #tpu.memory_space<vmem>>, vector<128x128xbf16>
    %cst_40 = arith.constant dense<0.000000e+00> : vector<32x128xf32>
    %62 = tpu.matmul %59, %61, %cst_40 {dimension_numbers = #tpu.dot_dimension_numbers<[1], [0], [0], [1], [0, 0, 1, 1], [], []>} : vector<32x128xbf16>, vector<128x128xbf16>, vector<32x128xf32> -> vector<32x128xf32>
    %cst_41 = arith.constant 0.000000e+00 : bf16
    %63 = vector.broadcast %cst_41 : bf16 to vector<4x128xbf16>
    %64 = vector.extract_strided_slice %59 {offsets = [0, 0], sizes = [28, 128], strides = [1, 1]} : vector<32x128xbf16> to vector<28x128xbf16>
    %65 = tpu.concatenate %63, %64 in 0 : vector<4x128xbf16>, vector<28x128xbf16> -> vector<32x128xbf16>
    %c0_42 = arith.constant 0 : index
    %c0_43 = arith.constant 0 : index
    %66 = vector.load %arg13[%c0_42, %c0_43] : memref<128x128xbf16, #tpu.memory_space<vmem>>, vector<128x128xbf16>
    %cst_44 = arith.constant dense<0.000000e+00> : vector<32x128xf32>
    %67 = tpu.matmul %65, %66, %cst_44 {dimension_numbers = #tpu.dot_dimension_numbers<[1], [0], [0], [1], [0, 0, 1, 1], [], []>} : vector<32x128xbf16>, vector<128x128xbf16>, vector<32x128xf32> -> vector<32x128xf32>
    %68 = arith.addf %62, %67 : vector<32x128xf32>
    %69 = vector.extract_strided_slice %59 {offsets = [4, 0], sizes = [28, 128], strides = [1, 1]} : vector<32x128xbf16> to vector<28x128xbf16>
    %cst_45 = arith.constant 0.000000e+00 : bf16
    %70 = vector.broadcast %cst_45 : bf16 to vector<4x128xbf16>
    %71 = tpu.concatenate %69, %70 in 0 : vector<28x128xbf16>, vector<4x128xbf16> -> vector<32x128xbf16>
    %c0_46 = arith.constant 0 : index
    %c0_47 = arith.constant 0 : index
    %72 = vector.load %arg14[%c0_46, %c0_47] : memref<128x128xbf16, #tpu.memory_space<vmem>>, vector<128x128xbf16>
    %cst_48 = arith.constant dense<0.000000e+00> : vector<32x128xf32>
    %73 = tpu.matmul %71, %72, %cst_48 {dimension_numbers = #tpu.dot_dimension_numbers<[1], [0], [0], [1], [0, 0, 1, 1], [], []>} : vector<32x128xbf16>, vector<128x128xbf16>, vector<32x128xf32> -> vector<32x128xf32>
    %74 = arith.addf %68, %73 : vector<32x128xf32>
    %c0_49 = arith.constant 0 : index
    %c0_50 = arith.constant 0 : index
    %75 = vector.load %arg15[%c0_49, %c0_50] : memref<1x128xf32, #tpu.memory_space<vmem>>, vector<1x128xf32>
    %76 = vector.broadcast %75 : vector<1x128xf32> to vector<32x128xf32>
    %77 = arith.addf %74, %76 : vector<32x128xf32>
    %78 = arith.addf %77, %60 : vector<32x128xf32>
    %cst_51 = arith.constant 0.000000e+00 : f32
    %79 = vector.broadcast %cst_51 : f32 to vector<32x128xf32>
    %80 = arith.maximumf %78, %79 : vector<32x128xf32>
    %81 = arith.truncf %80 : vector<32x128xf32> to vector<32x128xbf16>
    %c0_52 = arith.constant 0 : index
    %c0_53 = arith.constant 0 : index
    %82 = vector.load %arg16[%c0_52, %c0_53] : memref<128x256xbf16, #tpu.memory_space<vmem>>, vector<128x256xbf16>
    %cst_54 = arith.constant dense<0.000000e+00> : vector<32x256xf32>
    %83 = tpu.matmul %81, %82, %cst_54 {dimension_numbers = #tpu.dot_dimension_numbers<[1], [0], [0], [1], [0, 0, 1, 1], [], []>} : vector<32x128xbf16>, vector<128x256xbf16>, vector<32x256xf32> -> vector<32x256xf32>
    %cst_55 = arith.constant 0.000000e+00 : bf16
    %84 = vector.broadcast %cst_55 : bf16 to vector<4x128xbf16>
    %85 = vector.extract_strided_slice %81 {offsets = [0, 0], sizes = [28, 128], strides = [1, 1]} : vector<32x128xbf16> to vector<28x128xbf16>
    %86 = tpu.concatenate %84, %85 in 0 : vector<4x128xbf16>, vector<28x128xbf16> -> vector<32x128xbf16>
    %c0_56 = arith.constant 0 : index
    %c0_57 = arith.constant 0 : index
    %87 = vector.load %arg17[%c0_56, %c0_57] : memref<128x256xbf16, #tpu.memory_space<vmem>>, vector<128x256xbf16>
    %cst_58 = arith.constant dense<0.000000e+00> : vector<32x256xf32>
    %88 = tpu.matmul %86, %87, %cst_58 {dimension_numbers = #tpu.dot_dimension_numbers<[1], [0], [0], [1], [0, 0, 1, 1], [], []>} : vector<32x128xbf16>, vector<128x256xbf16>, vector<32x256xf32> -> vector<32x256xf32>
    %89 = arith.addf %83, %88 : vector<32x256xf32>
    %c0_59 = arith.constant 0 : index
    %c0_60 = arith.constant 0 : index
    %90 = vector.load %arg18[%c0_59, %c0_60] : memref<1x256xf32, #tpu.memory_space<vmem>>, vector<1x256xf32>
    %91 = vector.broadcast %90 : vector<1x256xf32> to vector<32x256xf32>
    %92 = arith.addf %89, %91 : vector<32x256xf32>
    %93 = vector.extract_strided_slice %92 {offsets = [0, 0], sizes = [32, 128], strides = [1, 1]} : vector<32x256xf32> to vector<32x128xf32>
    %cst_61 = arith.constant 0.000000e+00 : f32
    %94 = vector.broadcast %cst_61 : f32 to vector<32x128xf32>
    %95 = arith.maximumf %93, %94 : vector<32x128xf32>
    %96 = arith.truncf %95 : vector<32x128xf32> to vector<32x128xbf16>
    %97 = vector.extract_strided_slice %92 {offsets = [0, 128], sizes = [32, 128], strides = [1, 1]} : vector<32x256xf32> to vector<32x128xf32>
    %c0_62 = arith.constant 0 : index
    %c0_63 = arith.constant 0 : index
    %98 = vector.load %arg19[%c0_62, %c0_63] : memref<128x128xbf16, #tpu.memory_space<vmem>>, vector<128x128xbf16>
    %cst_64 = arith.constant dense<0.000000e+00> : vector<32x128xf32>
    %99 = tpu.matmul %96, %98, %cst_64 {dimension_numbers = #tpu.dot_dimension_numbers<[1], [0], [0], [1], [0, 0, 1, 1], [], []>} : vector<32x128xbf16>, vector<128x128xbf16>, vector<32x128xf32> -> vector<32x128xf32>
    %cst_65 = arith.constant 0.000000e+00 : bf16
    %100 = vector.broadcast %cst_65 : bf16 to vector<4x128xbf16>
    %101 = vector.extract_strided_slice %96 {offsets = [0, 0], sizes = [28, 128], strides = [1, 1]} : vector<32x128xbf16> to vector<28x128xbf16>
    %102 = tpu.concatenate %100, %101 in 0 : vector<4x128xbf16>, vector<28x128xbf16> -> vector<32x128xbf16>
    %c0_66 = arith.constant 0 : index
    %c0_67 = arith.constant 0 : index
    %103 = vector.load %arg20[%c0_66, %c0_67] : memref<128x128xbf16, #tpu.memory_space<vmem>>, vector<128x128xbf16>
    %cst_68 = arith.constant dense<0.000000e+00> : vector<32x128xf32>
    %104 = tpu.matmul %102, %103, %cst_68 {dimension_numbers = #tpu.dot_dimension_numbers<[1], [0], [0], [1], [0, 0, 1, 1], [], []>} : vector<32x128xbf16>, vector<128x128xbf16>, vector<32x128xf32> -> vector<32x128xf32>
    %105 = arith.addf %99, %104 : vector<32x128xf32>
    %106 = vector.extract_strided_slice %96 {offsets = [4, 0], sizes = [28, 128], strides = [1, 1]} : vector<32x128xbf16> to vector<28x128xbf16>
    %cst_69 = arith.constant 0.000000e+00 : bf16
    %107 = vector.broadcast %cst_69 : bf16 to vector<4x128xbf16>
    %108 = tpu.concatenate %106, %107 in 0 : vector<28x128xbf16>, vector<4x128xbf16> -> vector<32x128xbf16>
    %c0_70 = arith.constant 0 : index
    %c0_71 = arith.constant 0 : index
    %109 = vector.load %arg21[%c0_70, %c0_71] : memref<128x128xbf16, #tpu.memory_space<vmem>>, vector<128x128xbf16>
    %cst_72 = arith.constant dense<0.000000e+00> : vector<32x128xf32>
    %110 = tpu.matmul %108, %109, %cst_72 {dimension_numbers = #tpu.dot_dimension_numbers<[1], [0], [0], [1], [0, 0, 1, 1], [], []>} : vector<32x128xbf16>, vector<128x128xbf16>, vector<32x128xf32> -> vector<32x128xf32>
    %111 = arith.addf %105, %110 : vector<32x128xf32>
    %c0_73 = arith.constant 0 : index
    %c0_74 = arith.constant 0 : index
    %112 = vector.load %arg22[%c0_73, %c0_74] : memref<1x128xf32, #tpu.memory_space<vmem>>, vector<1x128xf32>
    %113 = vector.broadcast %112 : vector<1x128xf32> to vector<32x128xf32>
    %114 = arith.addf %111, %113 : vector<32x128xf32>
    %115 = arith.addf %114, %97 : vector<32x128xf32>
    %cst_75 = arith.constant 0.000000e+00 : f32
    %116 = vector.broadcast %cst_75 : f32 to vector<32x128xf32>
    %117 = arith.maximumf %115, %116 : vector<32x128xf32>
    %118 = arith.truncf %117 : vector<32x128xf32> to vector<32x128xbf16>
    %c0_76 = arith.constant 0 : index
    %c0_77 = arith.constant 0 : index
    %119 = vector.load %arg23[%c0_76, %c0_77] : memref<128x256xbf16, #tpu.memory_space<vmem>>, vector<128x256xbf16>
    %cst_78 = arith.constant dense<0.000000e+00> : vector<32x256xf32>
    %120 = tpu.matmul %118, %119, %cst_78 {dimension_numbers = #tpu.dot_dimension_numbers<[1], [0], [0], [1], [0, 0, 1, 1], [], []>} : vector<32x128xbf16>, vector<128x256xbf16>, vector<32x256xf32> -> vector<32x256xf32>
    %cst_79 = arith.constant 0.000000e+00 : bf16
    %121 = vector.broadcast %cst_79 : bf16 to vector<4x128xbf16>
    %122 = vector.extract_strided_slice %118 {offsets = [0, 0], sizes = [28, 128], strides = [1, 1]} : vector<32x128xbf16> to vector<28x128xbf16>
    %123 = tpu.concatenate %121, %122 in 0 : vector<4x128xbf16>, vector<28x128xbf16> -> vector<32x128xbf16>
    %c0_80 = arith.constant 0 : index
    %c0_81 = arith.constant 0 : index
    %124 = vector.load %arg24[%c0_80, %c0_81] : memref<128x256xbf16, #tpu.memory_space<vmem>>, vector<128x256xbf16>
    %cst_82 = arith.constant dense<0.000000e+00> : vector<32x256xf32>
    %125 = tpu.matmul %123, %124, %cst_82 {dimension_numbers = #tpu.dot_dimension_numbers<[1], [0], [0], [1], [0, 0, 1, 1], [], []>} : vector<32x128xbf16>, vector<128x256xbf16>, vector<32x256xf32> -> vector<32x256xf32>
    %126 = arith.addf %120, %125 : vector<32x256xf32>
    %c0_83 = arith.constant 0 : index
    %c0_84 = arith.constant 0 : index
    %127 = vector.load %arg25[%c0_83, %c0_84] : memref<1x256xf32, #tpu.memory_space<vmem>>, vector<1x256xf32>
    %128 = vector.broadcast %127 : vector<1x256xf32> to vector<32x256xf32>
    %129 = arith.addf %126, %128 : vector<32x256xf32>
    %130 = vector.extract_strided_slice %129 {offsets = [0, 0], sizes = [32, 128], strides = [1, 1]} : vector<32x256xf32> to vector<32x128xf32>
    %cst_85 = arith.constant 0.000000e+00 : f32
    %131 = vector.broadcast %cst_85 : f32 to vector<32x128xf32>
    %132 = arith.maximumf %130, %131 : vector<32x128xf32>
    %133 = arith.truncf %132 : vector<32x128xf32> to vector<32x128xbf16>
    %134 = vector.extract_strided_slice %129 {offsets = [0, 128], sizes = [32, 128], strides = [1, 1]} : vector<32x256xf32> to vector<32x128xf32>
    %c0_86 = arith.constant 0 : index
    %c0_87 = arith.constant 0 : index
    %135 = vector.load %arg26[%c0_86, %c0_87] : memref<128x128xbf16, #tpu.memory_space<vmem>>, vector<128x128xbf16>
    %cst_88 = arith.constant dense<0.000000e+00> : vector<32x128xf32>
    %136 = tpu.matmul %133, %135, %cst_88 {dimension_numbers = #tpu.dot_dimension_numbers<[1], [0], [0], [1], [0, 0, 1, 1], [], []>} : vector<32x128xbf16>, vector<128x128xbf16>, vector<32x128xf32> -> vector<32x128xf32>
    %cst_89 = arith.constant 0.000000e+00 : bf16
    %137 = vector.broadcast %cst_89 : bf16 to vector<4x128xbf16>
    %138 = vector.extract_strided_slice %133 {offsets = [0, 0], sizes = [28, 128], strides = [1, 1]} : vector<32x128xbf16> to vector<28x128xbf16>
    %139 = tpu.concatenate %137, %138 in 0 : vector<4x128xbf16>, vector<28x128xbf16> -> vector<32x128xbf16>
    %c0_90 = arith.constant 0 : index
    %c0_91 = arith.constant 0 : index
    %140 = vector.load %arg27[%c0_90, %c0_91] : memref<128x128xbf16, #tpu.memory_space<vmem>>, vector<128x128xbf16>
    %cst_92 = arith.constant dense<0.000000e+00> : vector<32x128xf32>
    %141 = tpu.matmul %139, %140, %cst_92 {dimension_numbers = #tpu.dot_dimension_numbers<[1], [0], [0], [1], [0, 0, 1, 1], [], []>} : vector<32x128xbf16>, vector<128x128xbf16>, vector<32x128xf32> -> vector<32x128xf32>
    %142 = arith.addf %136, %141 : vector<32x128xf32>
    %143 = vector.extract_strided_slice %133 {offsets = [4, 0], sizes = [28, 128], strides = [1, 1]} : vector<32x128xbf16> to vector<28x128xbf16>
    %cst_93 = arith.constant 0.000000e+00 : bf16
    %144 = vector.broadcast %cst_93 : bf16 to vector<4x128xbf16>
    %145 = tpu.concatenate %143, %144 in 0 : vector<28x128xbf16>, vector<4x128xbf16> -> vector<32x128xbf16>
    %c0_94 = arith.constant 0 : index
    %c0_95 = arith.constant 0 : index
    %146 = vector.load %arg28[%c0_94, %c0_95] : memref<128x128xbf16, #tpu.memory_space<vmem>>, vector<128x128xbf16>
    %cst_96 = arith.constant dense<0.000000e+00> : vector<32x128xf32>
    %147 = tpu.matmul %145, %146, %cst_96 {dimension_numbers = #tpu.dot_dimension_numbers<[1], [0], [0], [1], [0, 0, 1, 1], [], []>} : vector<32x128xbf16>, vector<128x128xbf16>, vector<32x128xf32> -> vector<32x128xf32>
    %148 = arith.addf %142, %147 : vector<32x128xf32>
    %c0_97 = arith.constant 0 : index
    %c0_98 = arith.constant 0 : index
    %149 = vector.load %arg29[%c0_97, %c0_98] : memref<1x128xf32, #tpu.memory_space<vmem>>, vector<1x128xf32>
    %150 = vector.broadcast %149 : vector<1x128xf32> to vector<32x128xf32>
    %151 = arith.addf %148, %150 : vector<32x128xf32>
    %152 = arith.addf %151, %134 : vector<32x128xf32>
    %cst_99 = arith.constant 0.000000e+00 : f32
    %153 = vector.broadcast %cst_99 : f32 to vector<32x128xf32>
    %154 = arith.maximumf %152, %153 : vector<32x128xf32>
    %155 = arith.truncf %154 : vector<32x128xf32> to vector<32x128xbf16>
    %c0_100 = arith.constant 0 : index
    %c0_101 = arith.constant 0 : index
    %156 = vector.load %arg30[%c0_100, %c0_101] : memref<32x128xbf16, #tpu.memory_space<vmem>>, vector<32x128xbf16>
    tpu.vector_store %arg30[%c0_100, %c0_101], %155 {strides = array<i32>} : memref<32x128xbf16, #tpu.memory_space<vmem>>, vector<32x128xbf16>,
    return
  }
}

module attributes {stable_mosaic.version = 11 : i64} {
  func.func @fc_kernel(%arg0: i32, %arg1: memref<1x2x2048xbf16, #tpu.memory_space<vmem>>, %arg2: memref<2048x256xbf16, #tpu.memory_space<vmem>>, %arg3: memref<1x256xf32, #tpu.memory_space<vmem>>, %arg4: memref<256x128xbf16, #tpu.memory_space<vmem>>, %arg5: memref<1x128xf32, #tpu.memory_space<vmem>>, %arg6: memref<128x64xbf16, #tpu.memory_space<vmem>>, %arg7: memref<1x64xf32, #tpu.memory_space<vmem>>, %arg8: memref<64x1xbf16, #tpu.memory_space<vmem>>, %arg9: memref<1x1xf32, #tpu.memory_space<vmem>>, %arg10: memref<2x1xf32, #tpu.memory_space<vmem>>, %arg11: memref<2x256xf32, #tpu.memory_space<vmem>>) attributes {dimension_semantics = [#tpu.dimension_semantics<arbitrary>], iteration_bounds = array<i64: 1>, scalar_prefetch = 0 : i64, scratch_operands = 1 : i64, tpu.core_type = #tpu.core_type<tc>, window_params = [{pipeline_mode = #tpu.pipeline_mode<synchronous>, transform_indices = @transform_0, window_bounds = array<i64: 1, 2, 2048>}, {transform_indices = @transform_1, window_bounds = array<i64: 2048, 256>}, {pipeline_mode = #tpu.pipeline_mode<synchronous>, transform_indices = @transform_2, window_bounds = array<i64: 1, 256>}, {pipeline_mode = #tpu.pipeline_mode<synchronous>, transform_indices = @transform_3, window_bounds = array<i64: 256, 128>}, {pipeline_mode = #tpu.pipeline_mode<synchronous>, transform_indices = @transform_4, window_bounds = array<i64: 1, 128>}, {pipeline_mode = #tpu.pipeline_mode<synchronous>, transform_indices = @transform_5, window_bounds = array<i64: 128, 64>}, {pipeline_mode = #tpu.pipeline_mode<synchronous>, transform_indices = @transform_6, window_bounds = array<i64: 1, 64>}, {pipeline_mode = #tpu.pipeline_mode<synchronous>, transform_indices = @transform_7, window_bounds = array<i64: 64, 1>}, {pipeline_mode = #tpu.pipeline_mode<synchronous>, transform_indices = @transform_8, window_bounds = array<i64: 1, 1>}, {pipeline_mode = #tpu.pipeline_mode<synchronous>, transform_indices = @transform_9, window_bounds = array<i64: 2, 1>}]} {
    %c0_i32 = arith.constant 0 : i32
    %0 = arith.cmpi eq, %arg0, %c0_i32 : i32
    %1 = arith.extui %0 : i1 to i32
    %c0_i32_0 = arith.constant 0 : i32
    %2 = arith.cmpi ne, %1, %c0_i32_0 : i32
    scf.if %2 {
      %cst_10 = arith.constant 0.000000e+00 : f32
      %14 = vector.broadcast %cst_10 : f32 to vector<2x256xf32>
      %c0_11 = arith.constant 0 : index
      %c0_12 = arith.constant 0 : index
      %15 = vector.load %arg11[%c0_11, %c0_12] : memref<2x256xf32, #tpu.memory_space<vmem>>, vector<2x256xf32>
      tpu.vector_store %arg11[%c0_11, %c0_12], %14 {strides = array<i32>} : memref<2x256xf32, #tpu.memory_space<vmem>>, vector<2x256xf32>,
    } else {
    }
    %c0 = arith.constant 0 : index
    %c0_1 = arith.constant 0 : index
    %3 = vector.load %arg11[%c0, %c0_1] : memref<2x256xf32, #tpu.memory_space<vmem>>, vector<2x256xf32>
    %4 = arith.index_cast %arg0 : i32 to index
    %c0_2 = arith.constant 0 : index
    %c0_3 = arith.constant 0 : index
    %5 = vector.load %arg1[%4, %c0_2, %c0_3] : memref<1x2x2048xbf16, #tpu.memory_space<vmem>>, vector<1x2x2048xbf16>
    %6 = vector.shape_cast %5 : vector<1x2x2048xbf16> to vector<2x2048xbf16>
    %c0_4 = arith.constant 0 : index
    %c0_5 = arith.constant 0 : index
    %7 = vector.load %arg2[%c0_4, %c0_5] : memref<2048x256xbf16, #tpu.memory_space<vmem>>, vector<2048x256xbf16>
    %cst = arith.constant dense<0.000000e+00> : vector<2x256xf32>
    %8 = tpu.matmul %6, %7, %cst {dimension_numbers = #tpu.dot_dimension_numbers<[1], [0], [0], [1], [0, 0, 1, 1], [], []>} : vector<2x2048xbf16>, vector<2048x256xbf16>, vector<2x256xf32> -> vector<2x256xf32>
    %9 = arith.addf %3, %8 : vector<2x256xf32>
    %c0_6 = arith.constant 0 : index
    %c0_7 = arith.constant 0 : index
    %10 = vector.load %arg11[%c0_6, %c0_7] : memref<2x256xf32, #tpu.memory_space<vmem>>, vector<2x256xf32>
    tpu.vector_store %arg11[%c0_6, %c0_7], %9 {strides = array<i32>} : memref<2x256xf32, #tpu.memory_space<vmem>>, vector<2x256xf32>,
    %c0_i32_8 = arith.constant 0 : i32
    %11 = arith.cmpi eq, %arg0, %c0_i32_8 : i32
    %12 = arith.extui %11 : i1 to i32
    %c0_i32_9 = arith.constant 0 : i32
    %13 = arith.cmpi ne, %12, %c0_i32_9 : i32
    scf.if %13 {
      %c0_10 = arith.constant 0 : index
      %c0_11 = arith.constant 0 : index
      %14 = vector.load %arg11[%c0_10, %c0_11] : memref<2x256xf32, #tpu.memory_space<vmem>>, vector<2x256xf32>
      %c0_12 = arith.constant 0 : index
      %c0_13 = arith.constant 0 : index
      %15 = vector.load %arg3[%c0_12, %c0_13] : memref<1x256xf32, #tpu.memory_space<vmem>>, vector<1x256xf32>
      %16 = vector.broadcast %15 : vector<1x256xf32> to vector<2x256xf32>
      %17 = arith.addf %14, %16 : vector<2x256xf32>
      %cst_14 = arith.constant 0.000000e+00 : f32
      %18 = vector.broadcast %cst_14 : f32 to vector<2x256xf32>
      %19 = arith.maximumf %17, %18 : vector<2x256xf32>
      %20 = arith.truncf %19 : vector<2x256xf32> to vector<2x256xbf16>
      %c0_15 = arith.constant 0 : index
      %c0_16 = arith.constant 0 : index
      %21 = vector.load %arg4[%c0_15, %c0_16] : memref<256x128xbf16, #tpu.memory_space<vmem>>, vector<256x128xbf16>
      %cst_17 = arith.constant dense<0.000000e+00> : vector<2x128xf32>
      %22 = tpu.matmul %20, %21, %cst_17 {dimension_numbers = #tpu.dot_dimension_numbers<[1], [0], [0], [1], [0, 0, 1, 1], [], []>} : vector<2x256xbf16>, vector<256x128xbf16>, vector<2x128xf32> -> vector<2x128xf32>
      %c0_18 = arith.constant 0 : index
      %c0_19 = arith.constant 0 : index
      %23 = vector.load %arg5[%c0_18, %c0_19] : memref<1x128xf32, #tpu.memory_space<vmem>>, vector<1x128xf32>
      %24 = vector.broadcast %23 : vector<1x128xf32> to vector<2x128xf32>
      %25 = arith.addf %22, %24 : vector<2x128xf32>
      %cst_20 = arith.constant 0.000000e+00 : f32
      %26 = vector.broadcast %cst_20 : f32 to vector<2x128xf32>
      %27 = arith.maximumf %25, %26 : vector<2x128xf32>
      %28 = arith.truncf %27 : vector<2x128xf32> to vector<2x128xbf16>
      %c0_21 = arith.constant 0 : index
      %c0_22 = arith.constant 0 : index
      %29 = vector.load %arg6[%c0_21, %c0_22] : memref<128x64xbf16, #tpu.memory_space<vmem>>, vector<128x64xbf16>
      %cst_23 = arith.constant dense<0.000000e+00> : vector<2x64xf32>
      %30 = tpu.matmul %28, %29, %cst_23 {dimension_numbers = #tpu.dot_dimension_numbers<[1], [0], [0], [1], [0, 0, 1, 1], [], []>} : vector<2x128xbf16>, vector<128x64xbf16>, vector<2x64xf32> -> vector<2x64xf32>
      %c0_24 = arith.constant 0 : index
      %c0_25 = arith.constant 0 : index
      %31 = vector.load %arg7[%c0_24, %c0_25] : memref<1x64xf32, #tpu.memory_space<vmem>>, vector<1x64xf32>
      %32 = vector.broadcast %31 : vector<1x64xf32> to vector<2x64xf32>
      %33 = arith.addf %30, %32 : vector<2x64xf32>
      %cst_26 = arith.constant 0.000000e+00 : f32
      %34 = vector.broadcast %cst_26 : f32 to vector<2x64xf32>
      %35 = arith.maximumf %33, %34 : vector<2x64xf32>
      %36 = arith.truncf %35 : vector<2x64xf32> to vector<2x64xbf16>
      %c0_27 = arith.constant 0 : index
      %c0_28 = arith.constant 0 : index
      %37 = vector.load %arg8[%c0_27, %c0_28] : memref<64x1xbf16, #tpu.memory_space<vmem>>, vector<64x1xbf16>
      %cst_29 = arith.constant dense<0.000000e+00> : vector<2x1xf32>
      %38 = tpu.matmul %36, %37, %cst_29 {dimension_numbers = #tpu.dot_dimension_numbers<[1], [0], [0], [1], [0, 0, 1, 1], [], []>} : vector<2x64xbf16>, vector<64x1xbf16>, vector<2x1xf32> -> vector<2x1xf32>
      %c0_30 = arith.constant 0 : index
      %c0_31 = arith.constant 0 : index
      %39 = vector.load %arg9[%c0_30, %c0_31] : memref<1x1xf32, #tpu.memory_space<vmem>>, vector<1x1xf32>
      %40 = vector.broadcast %39 : vector<1x1xf32> to vector<2x1xf32>
      %41 = arith.addf %38, %40 : vector<2x1xf32>
      %cst_32 = arith.constant 0.000000e+00 : f32
      %42 = vector.broadcast %cst_32 : f32 to vector<2x1xf32>
      %43 = arith.subf %42, %41 : vector<2x1xf32>
      %44 = math.exp %43 : vector<2x1xf32>
      %cst_33 = arith.constant 1.000000e+00 : f32
      %45 = vector.broadcast %cst_33 : f32 to vector<2x1xf32>
      %46 = arith.addf %45, %44 : vector<2x1xf32>
      %cst_34 = arith.constant 1.000000e+00 : f32
      %47 = vector.broadcast %cst_34 : f32 to vector<2x1xf32>
      %48 = arith.divf %47, %46 : vector<2x1xf32>
      %c0_35 = arith.constant 0 : index
      %c0_36 = arith.constant 0 : index
      %49 = vector.load %arg10[%c0_35, %c0_36] : memref<2x1xf32, #tpu.memory_space<vmem>>, vector<2x1xf32>
      tpu.vector_store %arg10[%c0_35, %c0_36], %48 {strides = array<i32>} : memref<2x1xf32, #tpu.memory_space<vmem>>, vector<2x1xf32>,
    } else {
    }
    return
  }
  func.func @transform_0(%arg0: i32) -> (i32, i32, i32) {
    %c0_i32 = arith.constant 0 : i32
    %c0_i32_0 = arith.constant 0 : i32
    %c0_i32_1 = arith.constant 0 : i32
    %c0_i32_2 = arith.constant 0 : i32
    return %c0_i32, %c0_i32_0, %c0_i32_1 : i32, i32, i32
  }
  func.func @transform_1(%arg0: i32) -> (i32, i32) {
    %c0_i32 = arith.constant 0 : i32
    %c0_i32_0 = arith.constant 0 : i32
    return %arg0, %c0_i32 : i32, i32
  }
  func.func @transform_2(%arg0: i32) -> (i32, i32) {
    %c0_i32 = arith.constant 0 : i32
    %c0_i32_0 = arith.constant 0 : i32
    %c0_i32_1 = arith.constant 0 : i32
    return %c0_i32, %c0_i32_0 : i32, i32
  }
  func.func @transform_3(%arg0: i32) -> (i32, i32) {
    %c0_i32 = arith.constant 0 : i32
    %c0_i32_0 = arith.constant 0 : i32
    %c0_i32_1 = arith.constant 0 : i32
    return %c0_i32, %c0_i32_0 : i32, i32
  }
  func.func @transform_4(%arg0: i32) -> (i32, i32) {
    %c0_i32 = arith.constant 0 : i32
    %c0_i32_0 = arith.constant 0 : i32
    %c0_i32_1 = arith.constant 0 : i32
    return %c0_i32, %c0_i32_0 : i32, i32
  }
  func.func @transform_5(%arg0: i32) -> (i32, i32) {
    %c0_i32 = arith.constant 0 : i32
    %c0_i32_0 = arith.constant 0 : i32
    %c0_i32_1 = arith.constant 0 : i32
    return %c0_i32, %c0_i32_0 : i32, i32
  }
  func.func @transform_6(%arg0: i32) -> (i32, i32) {
    %c0_i32 = arith.constant 0 : i32
    %c0_i32_0 = arith.constant 0 : i32
    %c0_i32_1 = arith.constant 0 : i32
    return %c0_i32, %c0_i32_0 : i32, i32
  }
  func.func @transform_7(%arg0: i32) -> (i32, i32) {
    %c0_i32 = arith.constant 0 : i32
    %c0_i32_0 = arith.constant 0 : i32
    %c0_i32_1 = arith.constant 0 : i32
    return %c0_i32, %c0_i32_0 : i32, i32
  }
  func.func @transform_8(%arg0: i32) -> (i32, i32) {
    %c0_i32 = arith.constant 0 : i32
    %c0_i32_0 = arith.constant 0 : i32
    %c0_i32_1 = arith.constant 0 : i32
    return %c0_i32, %c0_i32_0 : i32, i32
  }
  func.func @transform_9(%arg0: i32) -> (i32, i32) {
    %c0_i32 = arith.constant 0 : i32
    %c0_i32_0 = arith.constant 0 : i32
    %c0_i32_1 = arith.constant 0 : i32
    return %c0_i32, %c0_i32_0 : i32, i32
  }
}

</mosaic_0001>

<bundles_post_ra>
// kernel: voice_match_forward.3
= control target key start
LH: loop header
LB: loop body
LE: loop exit
PB: predicated region body
PF: predicated region fallthrough
CT: control target
= control target key end

     0   :  { %s4286_s0 = inlined_call_operand.vmem [shape: bf16[1,2,2048], index: 0, kind: input, shape index: {}]   ;;  %s4287_s1 = inlined_call_operand.vmem [shape: bf16[2048,256], index: 1, kind: input, shape index: {}]   ;;  %s4288_s2 = inlined_call_operand.vmem [shape: f32[1,256], index: 2, kind: input, shape index: {}]   ;;  %s4289_s3 = inlined_call_operand.hbm [shape: bf16[256,128], index: 3, kind: input, shape index: {}]   ;;  %s4290_s4 = inlined_call_operand.vmem [shape: f32[1,128], index: 4, kind: input, shape index: {}]   ;;  %s4291_s5 = inlined_call_operand.vmem [shape: bf16[128,64], index: 5, kind: input, shape index: {}]   ;;  %s4292_s6 = inlined_call_operand.vmem [shape: f32[1,64], index: 6, kind: input, shape index: {}]   ;;  %s4293_s7 = inlined_call_operand.vmem [shape: bf16[64,1], index: 7, kind: input, shape index: {}]   ;;  %s4294_s8 = inlined_call_operand.<no memory space> [shape: f32[1,1], index: 8, kind: input, shape index: {}]   ;;  %s4295_s9 = inlined_call_operand.vmem [shape: f32[2,1], index: 9, kind: output, shape index: {}]  }
   0x1   :  { %v14_v0 = vstv %s4294_s8 }
   0x2   :  { %15 = vst [vmem:[#allocation3] sm:$0x1] %v14_v0 }
   0x3   :  { %16 = vsyncpa [#allocation5], 0  ;;  %s3307_s11 = smov [#allocation4]   ;;  %s3283_s15 = scalar_lea.hbm %s4289_s3, 2048 }
   0x4   :  { %s28_s12 = sshll.u32 %s3307_s11, 4  ;;  %p3284_p0 = scmp.ne.s32.totalorder %s4289_s3, %s3283_s15  ;;  %s29_s12 = int_to_ptr.vmem [resolvable:$true] %s28_s12 }
   0x5   :  { %p3287_p1 = scmp.lt.u32.totalorder %s3283_s15, %s4289_s3 }
   0x7   :  { %p3289_p2 = pnand %p3287_p1, %p3284_p0 }
   0x9   :  { %3292 = shalt.err (!%p3289_p2)
}
   0xa   :  { %s3293_s8 = scalar_lea.vmem %s29_s12, 2048  ;;  %p3298_p4 = scmp.lt.s32.totalorder %s29_s12, %s29_s12 }
   0xb   :  { %p3294_p3 = scmp.ne.s32.totalorder %s29_s12, %s3293_s8  ;;  %p3299_p5 = scmp.lt.s32.totalorder %s3293_s8, %s3293_s8 }
   0xd   :  { %p3300_p6 = por %p3299_p5, %p3298_p4 }
   0xf   :  { %p3301_p7 = pnand %p3300_p6, %p3294_p3 }
  0x11   :  { %3304 = shalt.err (!%p3301_p7)
}
  0x12   :  { %s3308_s20 = smov 64   ;;  %s3309_s21 = smov 4  }
  0x13   :  { %34 = dma.hbm_to_vmem [thread:$0]  %s4289_s3, 2048, %s29_s12, [#allocation5], %s3308_s20, %s3308_s20, %s3309_s21  }
  0x14   :  { %3305 = dma.done.wait [#allocation5], 2048  }
  0x15   :  { %3306 = vsyncadd [#allocation5], 4294965248  ;;  %v2865_v1 = vld [vmem:[%s4287_s1 + $0x4] ss:$8 sps:$4 sm:$0xff]   ;;  %v2869_v3 = vld [vmem:[%s4287_s1] ss:$8 sps:$4 sm:$0xff]   ;;  %v321_v41 = vlaneseq }
  0x16   :  { %v2867_v2 = vld [vmem:[%s4287_s1 + $0x304] ss:$8 sps:$4 sm:$0xff]   ;;  %1711 = vmatprep.subr.bf16.mxu1 %v2865_v1  ;;  %v2870_v4 = vld [vmem:[%s4287_s1 + $0x300] ss:$8 sps:$4 sm:$0xff]   ;;  %v2871_v5 = vld [vmem:[%s4287_s1 + $0x14] ss:$8 sps:$4 sm:$0xff]  }
  0x17   :  { %1834 = vmatprep.subr.bf16.mxu0 %v2867_v2  ;;  %1712 = vmatpush1.bf16.msra.mxu1 %v2869_v3  ;;  %v2873_v6 = vld [vmem:[%s4287_s1 + $0x314] ss:$8 sps:$4 sm:$0xff]   ;;  %v2875_v7 = vld [vmem:[%s4287_s1 + $0x10] ss:$8 sps:$4 sm:$0xff]   ;;  %v2877_v9 = vld [vmem:[%s4287_s1 + $0x24] ss:$8 sps:$4 sm:$0xff]  }
  0x18   :  { %1835 = vmatpush1.bf16.msra.mxu0 %v2870_v4  ;;  %1713 = vmatprep.subr.bf16.mxu1 %v2871_v5  ;;  %v2876_v8 = vld [vmem:[%s4287_s1 + $0x310] ss:$8 sps:$4 sm:$0xff]   ;;  %v2879_v10 = vld [vmem:[%s4287_s1 + $0x324] ss:$8 sps:$4 sm:$0xff]   ;;  %v2881_v11 = vld [vmem:[%s4287_s1 + $0x20] ss:$8 sps:$4 sm:$0xff]  }
  0x19   :  { %1836 = vmatprep.subr.bf16.mxu0 %v2873_v6  ;;  %v2882_v12 = vld [vmem:[%s4287_s1 + $0x320] ss:$8 sps:$4 sm:$0xff]   ;;  %v2883_v13 = vld [vmem:[%s4287_s1 + $0x34] ss:$8 sps:$4 sm:$0xff]   ;;  %v2887_v15 = vld [vmem:[%s4287_s1 + $0x30] ss:$8 sps:$4 sm:$0xff]  }
  0x1a   :  { %v2885_v14 = vld [vmem:[%s4287_s1 + $0x334] ss:$8 sps:$4 sm:$0xff]   ;;  %v2888_v16 = vld [vmem:[%s4287_s1 + $0x330] ss:$8 sps:$4 sm:$0xff]   ;;  %v2889_v17 = vld [vmem:[%s4287_s1 + $0x44] ss:$8 sps:$4 sm:$0xff]  }
  0x1b   :  { %1714 = vmatpush1.bf16.msra.mxu1 %v2875_v7  ;;  %v2891_v18 = vld [vmem:[%s4287_s1 + $0x344] ss:$8 sps:$4 sm:$0xff]   ;;  %v2893_v19 = vld [vmem:[%s4287_s1 + $0x40] ss:$8 sps:$4 sm:$0xff]   ;;  %v2895_v21 = vld [vmem:[%s4287_s1 + $0x54] ss:$8 sps:$4 sm:$0xff]  }
  0x1c   :  { %1837 = vmatpush1.bf16.msra.mxu0 %v2876_v8  ;;  %1715 = vmatprep.subr.bf16.mxu1 %v2877_v9  ;;  %v2894_v20 = vld [vmem:[%s4287_s1 + $0x340] ss:$8 sps:$4 sm:$0xff]   ;;  %v2897_v22 = vld [vmem:[%s4287_s1 + $0x354] ss:$8 sps:$4 sm:$0xff]   ;;  %v2899_v23 = vld [vmem:[%s4287_s1 + $0x50] ss:$8 sps:$4 sm:$0xff]  }
  0x1d   :  { %1838 = vmatprep.subr.bf16.mxu0 %v2879_v10  ;;  %v2900_v24 = vld [vmem:[%s4287_s1 + $0x350] ss:$8 sps:$4 sm:$0xff]   ;;  %v2901_v25 = vld [vmem:[%s4287_s1 + $0x64] ss:$8 sps:$4 sm:$0xff]   ;;  %v2905_v27 = vld [vmem:[%s4287_s1 + $0x60] ss:$8 sps:$4 sm:$0xff]  }
  0x1e   :  { %v2903_v26 = vld [vmem:[%s4287_s1 + $0x364] ss:$8 sps:$4 sm:$0xff]   ;;  %v2906_v28 = vld [vmem:[%s4287_s1 + $0x360] ss:$8 sps:$4 sm:$0xff]   ;;  %v2907_v29 = vld [vmem:[%s4287_s1 + $0x74] ss:$8 sps:$4 sm:$0xff]  }
  0x1f   :  { %1716 = vmatpush1.bf16.msra.mxu1 %v2881_v11  ;;  %v2909_v30 = vld [vmem:[%s4287_s1 + $0x374] ss:$8 sps:$4 sm:$0xff]   ;;  %v2911_v31 = vld [vmem:[%s4287_s1 + $0x70] ss:$8 sps:$4 sm:$0xff]   ;;  %v2913_v33 = vld [vmem:[%s4287_s1 + $0x84] ss:$8 sps:$4 sm:$0xff]  }
  0x20   :  { %1839 = vmatpush1.bf16.msra.mxu0 %v2882_v12  ;;  %1717 = vmatprep.subr.bf16.mxu1 %v2883_v13  ;;  %v2912_v32 = vld [vmem:[%s4287_s1 + $0x370] ss:$8 sps:$4 sm:$0xff]   ;;  %v2915_v34 = vld [vmem:[%s4287_s1 + $0x384] ss:$8 sps:$4 sm:$0xff]   ;;  %v2917_v35 = vld [vmem:[%s4287_s1 + $0x80] ss:$8 sps:$4 sm:$0xff]  }
  0x21   :  { %1840 = vmatprep.subr.bf16.mxu0 %v2885_v14  ;;  %v2918_v36 = vld [vmem:[%s4287_s1 + $0x380] ss:$8 sps:$4 sm:$0xff]   ;;  %v2919_v37 = vld [vmem:[%s4287_s1 + $0x94] ss:$8 sps:$4 sm:$0xff]   ;;  %v3310_v39 = vmov 1966171168  }
  0x22   :  { %v2921_v38 = vld [vmem:[%s4287_s1 + $0x394] ss:$8 sps:$4 sm:$0xff]   ;;  %v319_v40 = vunpack.c.l.s4 %v3310_v39  ;;  %v2923_v42 = vld [vmem:[%s4287_s1 + $0x90] ss:$8 sps:$4 sm:$0xff]   ;;  %v2925_v44 = vld [vmem:[%s4287_s1 + $0xa4] ss:$8 sps:$4 sm:$0xff]  }
  0x23   :  { %1718 = vmatpush1.bf16.msra.mxu1 %v2887_v15  ;;  %v2924_v43 = vld [vmem:[%s4287_s1 + $0x390] ss:$8 sps:$4 sm:$0xff]   ;;  %v2927_v45 = vld [vmem:[%s4287_s1 + $0x3a4] ss:$8 sps:$4 sm:$0xff]   ;;  %v3505_v47 = vshrl.u32 %v321_v41, 7  ;;  %vm3313_vm0 = vmmov 0  }
  0x24   :  { %1841 = vmatpush1.bf16.msra.mxu0 %v2888_v16  ;;  %1719 = vmatprep.subr.bf16.mxu1 %v2889_v17  ;;  %v320_v46 = vunpack.c.0.s8 %v319_v40  ;;  %v2929_v48 = vld [vmem:[%s4287_s1 + $0xa0] ss:$8 sps:$4 sm:$0xff]   ;;  %v2931_v50 = vld [vmem:[%s4287_s1 + $0xb4] ss:$8 sps:$4 sm:$0xff]   ;;  %v2935_v54 = vld [vmem:[%s4287_s1 + $0xb0] ss:$8 sps:$4 sm:$0xff]  }
  0x25   :  { %1842 = vmatprep.subr.bf16.mxu0 %v2891_v18  ;;  %v2930_v49 = vld [vmem:[%s4287_s1 + $0x3a0] ss:$8 sps:$4 sm:$0xff]   ;;  %v2933_v51 = vld [vmem:[%s4287_s1 + $0x3b4] ss:$8 sps:$4 sm:$0xff]   ;;  %v2936_v57 = vld [vmem:[%s4287_s1 + $0x3b0] ss:$8 sps:$4 sm:$0xff]  }
  0x26   :  { %v3520_v52 = vsub.s32 %v320_v46, %v3505_v47  ;;  %v57_v53 = vld [vmem:[%s4286_s0] sm:$0xff]  ;;  %v2943_v2 = vld [vmem:[%s4287_s1 + $0xd4] ss:$8 sps:$4 sm:$0xff]   ;;  %v2947_v5 = vld [vmem:[%s4287_s1 + $0xd0] ss:$8 sps:$4 sm:$0xff]   ;;  %vm2419_vm1 = vcmask 523264  }
  0x27   :  { %1720 = vmatpush1.bf16.msra.mxu1 %v2893_v19  ;;  %v317_v55 = vcombine.high %v57_v53, %v57_v53  ;;  %v2937_v58 = vld [vmem:[%s4287_s1 + $0xc4] ss:$8 sps:$4 sm:$0xff]   ;;  %v2941_v62 = vld [vmem:[%s4287_s1 + $0xc0] ss:$8 sps:$4 sm:$0xff]   ;;  %v2945_v3 = vld [vmem:[%s4287_s1 + $0x3d4] ss:$8 sps:$4 sm:$0xff]  }
  0x28   :  { %1843 = vmatpush1.bf16.msra.mxu0 %v2894_v20  ;;  %1721 = vmatprep.subr.bf16.mxu1 %v2895_v21  ;;  %v324_v56 = vrot.slane %v57_v53, %v3520_v52  ;;  %v2939_v59 = vld [vmem:[%s4287_s1 + $0x3c4] ss:$8 sps:$4 sm:$0xff]   ;;  %v2942_v1 = vld [vmem:[%s4287_s1 + $0x3c0] ss:$8 sps:$4 sm:$0xff]   ;;  %v2948_v7 = vld [vmem:[%s4287_s1 + $0x3d0] ss:$8 sps:$4 sm:$0xff]  }
  0x29   :  { %1844 = vmatprep.subr.bf16.mxu0 %v2897_v22  ;;  %v331_v61 = vrot.slane %v317_v55, %v3520_v52  ;;  %v2949_v8 = vld [vmem:[%s4287_s1 + $0xe4] ss:$8 sps:$4 sm:$0xff]   ;;  %v2953_v10 = vld [vmem:[%s4287_s1 + $0xe0] ss:$8 sps:$4 sm:$0xff]   ;;  %v2955_v12 = vld [vmem:[%s4287_s1 + $0xf4] ss:$8 sps:$4 sm:$0xff]  }
  0x2a   :  { %v332_v60 = vcombine.high %v324_v56, %v324_v56  ;;  %v2951_v9 = vld [vmem:[%s4287_s1 + $0x3e4] ss:$8 sps:$4 sm:$0xff]   ;;  %v2954_v11 = vld [vmem:[%s4287_s1 + $0x3e0] ss:$8 sps:$4 sm:$0xff]   ;;  %v2957_v13 = vld [vmem:[%s4287_s1 + $0x3f4] ss:$8 sps:$4 sm:$0xff]   ;;  %v3600_v20 = vrot.slane %v324_v56, %v3520_v52 }
  0x2b   :  { %1722 = vmatpush1.bf16.msra.mxu1 %v2899_v23  ;;  %v333_v0 = vcombine.high %v331_v61, %v331_v61  ;;  %v2959_v14 = vld [vmem:[%s4287_s1 + $0xf0] ss:$8 sps:$4 sm:$0xff]   ;;  %v3585_v15 = vrot.slane %v331_v61, %v3520_v52  ;;  %v2964_v17 = vld [vmem:[%s4287_s1 + $0x104] ss:$8 sps:$4 sm:$0xff]   ;;  %v2962_v19 = vld [vmem:[%s4287_s1 + $0x100] ss:$8 sps:$4 sm:$0xff]  }
  0x2c   :  { %1845 = vmatpush1.bf16.msra.mxu0 %v2900_v24  ;;  %1723 = vmatprep.subr.bf16.mxu1 %v2901_v25  ;;  %v354_v63 = vrot.slane %v332_v60, %v3520_v52  ;;  %v2960_v16 = vld [vmem:[%s4287_s1 + $0x3f0] ss:$8 sps:$4 sm:$0xff]   ;;  %v2967_v18 = vld [vmem:[%s4287_s1 + $0x404] ss:$8 sps:$4 sm:$0xff]   ;;  %v2965_v22 = vld [vmem:[%s4287_s1 + $0x400] ss:$8 sps:$4 sm:$0xff]  }
  0x2d   :  { %1846 = vmatprep.subr.bf16.mxu0 %v2903_v26  ;;  %v3553_v4 = vrot.slane %v333_v0, %v3520_v52  ;;  %v363_v21 = vcombine.high %v3585_v15, %v3585_v15  ;;  %v2970_v23 = vld [vmem:[%s4287_s1 + $0x114] ss:$8 sps:$4 sm:$0xff]   ;;  %v2968_v26 = vld [vmem:[%s4287_s1 + $0x110] ss:$8 sps:$4 sm:$0xff]   ;;  %v2989_v39 = vld [vmem:[%s4287_s1 + $0x440] ss:$8 sps:$4 sm:$0xff]  }
  0x2e   :  { %1743 = vmatprep.mubr.bf16.mxu1 %v354_v63  ;;  %v2973_v24 = vld [vmem:[%s4287_s1 + $0x414] ss:$8 sps:$4 sm:$0xff]   ;;  %v364_v25 = vcombine.high %v354_v63, %v354_v63  ;;  %v3677_v46 = vld [vmem:[%s4286_s0 + $0x8] sm:$0xff]  ;;  %v3004_v55 = vld [vmem:[%s4287_s1 + $0x170] ss:$8 sps:$4 sm:$0xff]   ;;  %vm2469_vm2 = vcmask 1024  }
  0x2f   :  { %1724 = vmatpush1.bf16.msra.mxu1 %v2905_v27  ;;  %v365_v6 = vcombine.high %v3553_v4, %v3553_v4  ;;  %v2971_v27 = vld [vmem:[%s4287_s1 + $0x410] ss:$8 sps:$4 sm:$0xff]   ;;  %v2994_v40 = vld [vmem:[%s4287_s1 + $0x154] ss:$8 sps:$4 sm:$0xff]   ;;  %v3010_v60 = vld [vmem:[%s4287_s1 + $0x180] ss:$8 sps:$4 sm:$0xff]  }
  0x30   :  { %1847 = vmatpush1.bf16.msra.mxu0 %v2906_v28  ;;  %1725 = vmatprep.subr.bf16.mxu1 %v2907_v29  ;;  %v2976_v28 = vld [vmem:[%s4287_s1 + $0x124] ss:$8 sps:$4 sm:$0xff]   ;;  %v2997_v41 = vld [vmem:[%s4287_s1 + $0x454] ss:$8 sps:$4 sm:$0xff]   ;;  %v3007_v56 = vld [vmem:[%s4287_s1 + $0x470] ss:$8 sps:$4 sm:$0xff]  }
  0x31   :  { %1848 = vmatprep.subr.bf16.mxu0 %v2909_v30  ;;  %1866 = vmatprep.mubr.bf16.mxu0 %v365_v6  ;;  %v2979_v29 = vld [vmem:[%s4287_s1 + $0x424] ss:$8 sps:$4 sm:$0xff]   ;;  %v2974_v30 = vld [vmem:[%s4287_s1 + $0x120] ss:$8 sps:$4 sm:$0xff]   ;;  %v3009_v53 = vld [vmem:[%s4287_s1 + $0x474] ss:$8 sps:$4 sm:$0xff]  }
  0x32   :  { %v3013_v61 = vld [vmem:[%s4287_s1 + $0x480] ss:$8 sps:$4 sm:$0xff]   ;;  %v3021_v63 = vld [vmem:[%s4287_s1 + $0x494] ss:$8 sps:$4 sm:$0xff]   ;;  %v3016_v0 = vld [vmem:[%s4287_s1 + $0x190] ss:$8 sps:$4 sm:$0xff]  }
  0x33   :  { %1726 = vmatpush1.bf16.msra.mxu1 %v2911_v31  ;;  %v2977_v31 = vld [vmem:[%s4287_s1 + $0x420] ss:$8 sps:$4 sm:$0xff]  }
  0x34   :  { %1849 = vmatpush1.bf16.msra.mxu0 %v2912_v32  ;;  %1727 = vmatprep.subr.bf16.mxu1 %v2913_v33  ;;  %v2982_v32 = vld [vmem:[%s4287_s1 + $0x134] ss:$8 sps:$4 sm:$0xff]   ;;  %v3025_v6 = vld [vmem:[%s4287_s1 + $0x4a0] ss:$8 sps:$4 sm:$0xff]  }
  0x35   :  { %1850 = vmatprep.subr.bf16.mxu0 %v2915_v34  ;;  %v2985_v33 = vld [vmem:[%s4287_s1 + $0x434] ss:$8 sps:$4 sm:$0xff]   ;;  %v2980_v34 = vld [vmem:[%s4287_s1 + $0x130] ss:$8 sps:$4 sm:$0xff]  }
  0x37   :  { %1728 = vmatpush1.bf16.msra.mxu1 %v2917_v35  ;;  %v2983_v35 = vld [vmem:[%s4287_s1 + $0x430] ss:$8 sps:$4 sm:$0xff]  }
  0x38   :  { %1851 = vmatpush1.bf16.msra.mxu0 %v2918_v36  ;;  %1729 = vmatprep.subr.bf16.mxu1 %v2919_v37  ;;  %v2988_v36 = vld [vmem:[%s4287_s1 + $0x144] ss:$8 sps:$4 sm:$0xff]  }
  0x39   :  { %1852 = vmatprep.subr.bf16.mxu0 %v2921_v38  ;;  %v2991_v37 = vld [vmem:[%s4287_s1 + $0x444] ss:$8 sps:$4 sm:$0xff]   ;;  %v2986_v38 = vld [vmem:[%s4287_s1 + $0x140] ss:$8 sps:$4 sm:$0xff]  }
  0x3b   :  { %1730 = vmatpush1.bf16.msra.mxu1 %v2923_v42  ;;  %v2992_v42 = vld [vmem:[%s4287_s1 + $0x150] ss:$8 sps:$4 sm:$0xff]  }
  0x3c   :  { %1853 = vmatpush1.bf16.msra.mxu0 %v2924_v43  ;;  %1731 = vmatprep.subr.bf16.mxu1 %v2925_v44  ;;  %v2995_v43 = vld [vmem:[%s4287_s1 + $0x450] ss:$8 sps:$4 sm:$0xff]   ;;  %v3000_v44 = vld [vmem:[%s4287_s1 + $0x164] ss:$8 sps:$4 sm:$0xff]  }
  0x3d   :  { %1854 = vmatprep.subr.bf16.mxu0 %v2927_v45  ;;  %v3003_v45 = vld [vmem:[%s4287_s1 + $0x464] ss:$8 sps:$4 sm:$0xff]  }
  0x3f   :  { %1732 = vmatpush1.bf16.msra.mxu1 %v2929_v48  ;;  %v2998_v48 = vld [vmem:[%s4287_s1 + $0x160] ss:$8 sps:$4 sm:$0xff]  }
  0x40   :  { %1855 = vmatpush1.bf16.msra.mxu0 %v2930_v49  ;;  %1733 = vmatprep.subr.bf16.mxu1 %v2931_v50  ;;  %v3001_v49 = vld [vmem:[%s4287_s1 + $0x460] ss:$8 sps:$4 sm:$0xff]   ;;  %v3687_v50 = vrot.slane %v3677_v46, %v3520_v52 }
  0x41   :  { %1856 = vmatprep.subr.bf16.mxu0 %v2933_v51  ;;  %v3006_v51 = vld [vmem:[%s4287_s1 + $0x174] ss:$8 sps:$4 sm:$0xff]  }
  0x43   :  { %1734 = vmatpush1.bf16.msra.mxu1 %v2935_v54  ;;  %v381_v54 = vcombine.high %v3687_v50, %v3687_v50 }
  0x44   :  { %1857 = vmatpush1.bf16.msra.mxu0 %v2936_v57  ;;  %1735 = vmatprep.subr.bf16.mxu1 %v2937_v58  ;;  %v3012_v58 = vld [vmem:[%s4287_s1 + $0x184] ss:$8 sps:$4 sm:$0xff]  }
  0x45   :  { %1858 = vmatprep.subr.bf16.mxu0 %v2939_v59  ;;  %v3704_v57 = vrot.slane %v381_v54, %v3520_v52  ;;  %v3015_v59 = vld [vmem:[%s4287_s1 + $0x484] ss:$8 sps:$4 sm:$0xff]   ;;  %v3093_v54 = vld [vmem:[%s4287_s1 + $0x554] ss:$8 sps:$4 sm:$0xff]  }
  0x47   :  { %1736 = vmatpush1.bf16.msra.mxu1 %v2941_v62  ;;  %v3018_v62 = vld [vmem:[%s4287_s1 + $0x194] ss:$8 sps:$4 sm:$0xff]  }
  0x48   :  { %1859 = vmatpush1.bf16.msra.mxu0 %v2942_v1  ;;  %1737 = vmatprep.subr.bf16.mxu1 %v2943_v2  ;;  %v3019_v1 = vld [vmem:[%s4287_s1 + $0x490] ss:$8 sps:$4 sm:$0xff]   ;;  %v3024_v2 = vld [vmem:[%s4287_s1 + $0x1a4] ss:$8 sps:$4 sm:$0xff]  }
  0x49   :  { %1860 = vmatprep.subr.bf16.mxu0 %v2945_v3  ;;  %v3027_v3 = vld [vmem:[%s4287_s1 + $0x4a4] ss:$8 sps:$4 sm:$0xff]  }
  0x4b   :  { %1738 = vmatpush1.bf16.msra.mxu1 %v2947_v5  ;;  %v3022_v5 = vld [vmem:[%s4287_s1 + $0x1a0] ss:$8 sps:$4 sm:$0xff]  }
  0x4c   :  { %1861 = vmatpush1.bf16.msra.mxu0 %v2948_v7  ;;  %1739 = vmatprep.subr.bf16.mxu1 %v2949_v8  ;;  %v3030_v7 = vld [vmem:[%s4287_s1 + $0x1b4] ss:$8 sps:$4 sm:$0xff]  }
  0x4d   :  { %1862 = vmatprep.subr.bf16.mxu0 %v2951_v9  ;;  %v3033_v8 = vld [vmem:[%s4287_s1 + $0x4b4] ss:$8 sps:$4 sm:$0xff]   ;;  %v3028_v9 = vld [vmem:[%s4287_s1 + $0x1b0] ss:$8 sps:$4 sm:$0xff]  }
  0x4f   :  { %1740 = vmatpush1.bf16.msra.mxu1 %v2953_v10  ;;  %v3031_v10 = vld [vmem:[%s4287_s1 + $0x4b0] ss:$8 sps:$4 sm:$0xff]  }
  0x50   :  { %1863 = vmatpush1.bf16.msra.mxu0 %v2954_v11  ;;  %1741 = vmatprep.subr.bf16.mxu1 %v2955_v12  ;;  %v3036_v11 = vld [vmem:[%s4287_s1 + $0x1c4] ss:$8 sps:$4 sm:$0xff]  }
  0x51   :  { %1864 = vmatprep.subr.bf16.mxu0 %v2957_v13  ;;  %v3039_v12 = vld [vmem:[%s4287_s1 + $0x4c4] ss:$8 sps:$4 sm:$0xff]   ;;  %v3034_v13 = vld [vmem:[%s4287_s1 + $0x1c0] ss:$8 sps:$4 sm:$0xff]  }
  0x53   :  { %1742 = vmatpush1.bf16.msra.mxu1 %v2959_v14  ;;  %v3037_v14 = vld [vmem:[%s4287_s1 + $0x4c0] ss:$8 sps:$4 sm:$0xff]  }
  0x54   :  { %1865 = vmatpush1.bf16.msra.mxu0 %v2960_v16  ;;  %1752 = vmatprep.subr.bf16.mxu1 %v2964_v17  ;;  %v3042_v16 = vld [vmem:[%s4287_s1 + $0x1d4] ss:$8 sps:$4 sm:$0xff]  }
  0x55   :  { %1875 = vmatprep.subr.bf16.mxu0 %v2967_v18  ;;  %v3045_v17 = vld [vmem:[%s4287_s1 + $0x4d4] ss:$8 sps:$4 sm:$0xff]   ;;  %v3040_v18 = vld [vmem:[%s4287_s1 + $0x1d0] ss:$8 sps:$4 sm:$0xff]  }
  0x56   :  { %1744 = vmatmul.mubr.bf16.vlgmr.msra.gmra.mrb[0].mxu1 %v3600_v20 }
  0x57   :  { %1867 = vmatmul.mubr.bf16.vlgmr.msra.gmra.mrb[0].mxu0 %v363_v21  ;;  %1753 = vmatpush1.bf16.msra.mxu1 %v2962_v19  ;;  %v3043_v19 = vld [vmem:[%s4287_s1 + $0x4d0] ss:$8 sps:$4 sm:$0xff]   ;;  %v3048_v21 = vld [vmem:[%s4287_s1 + $0x1e4] ss:$8 sps:$4 sm:$0xff]  }
  0x58   :  { %1876 = vmatpush1.bf16.msra.mxu0 %v2965_v22  ;;  %1754 = vmatprep.subr.bf16.mxu1 %v2970_v23  ;;  %v3051_v22 = vld [vmem:[%s4287_s1 + $0x4e4] ss:$8 sps:$4 sm:$0xff]   ;;  %v3046_v23 = vld [vmem:[%s4287_s1 + $0x1e0] ss:$8 sps:$4 sm:$0xff]  }
  0x59   :  { %1877 = vmatprep.subr.bf16.mxu0 %v2973_v24  ;;  %1784 = vmatprep.mubr.bf16.mxu1 %v364_v25  ;;  %v3049_v24 = vld [vmem:[%s4287_s1 + $0x4e0] ss:$8 sps:$4 sm:$0xff]   ;;  %v3054_v25 = vld [vmem:[%s4287_s1 + $0x1f4] ss:$8 sps:$4 sm:$0xff]  }
  0x5a   :  { %1907 = vmatprep.mubr.bf16.mxu0 %v3704_v57 }
  0x5b   :  { %1755 = vmatpush1.bf16.msra.mxu1 %v2968_v26  ;;  %v3057_v26 = vld [vmem:[%s4287_s1 + $0x4f4] ss:$8 sps:$4 sm:$0xff]  }
  0x5c   :  { %1878 = vmatpush1.bf16.msra.mxu0 %v2971_v27  ;;  %1756 = vmatprep.subr.bf16.mxu1 %v2976_v28  ;;  %v3052_v27 = vld [vmem:[%s4287_s1 + $0x1f0] ss:$8 sps:$4 sm:$0xff]  }
  0x5d   :  { %1879 = vmatprep.subr.bf16.mxu0 %v2979_v29  ;;  %v3055_v28 = vld [vmem:[%s4287_s1 + $0x4f0] ss:$8 sps:$4 sm:$0xff]   ;;  %v3060_v29 = vld [vmem:[%s4287_s1 + $0x204] ss:$8 sps:$4 sm:$0xff]  }
  0x5f   :  { %1757 = vmatpush1.bf16.msra.mxu1 %v2974_v30  ;;  %v3063_v30 = vld [vmem:[%s4287_s1 + $0x504] ss:$8 sps:$4 sm:$0xff]  }
  0x60   :  { %1880 = vmatpush1.bf16.msra.mxu0 %v2977_v31  ;;  %1758 = vmatprep.subr.bf16.mxu1 %v2982_v32  ;;  %v362_v31 = vcombine.high %v3600_v20, %v3600_v20  ;;  %v3813_v32 = vrot.slane %v3687_v50, %v3520_v52  ;;  %v3066_v20 = vld [vmem:[%s4287_s1 + $0x214] ss:$8 sps:$4 sm:$0xff]   ;;  %v3082_v50 = vld [vmem:[%s4287_s1 + $0x240] ss:$8 sps:$4 sm:$0xff]  }
  0x61   :  { %1881 = vmatprep.subr.bf16.mxu0 %v2985_v33  ;;  %v3058_v33 = vld [vmem:[%s4287_s1 + $0x200] ss:$8 sps:$4 sm:$0xff]  }
  0x63   :  { %1759 = vmatpush1.bf16.msra.mxu1 %v2980_v34  ;;  %v3061_v34 = vld [vmem:[%s4287_s1 + $0x500] ss:$8 sps:$4 sm:$0xff]  }
  0x64   :  { %1882 = vmatpush1.bf16.msra.mxu0 %v2983_v35  ;;  %1760 = vmatprep.subr.bf16.mxu1 %v2988_v36  ;;  %v3069_v35 = vld [vmem:[%s4287_s1 + $0x514] ss:$8 sps:$4 sm:$0xff]   ;;  %v413_v36 = vcombine.high %v3704_v57, %v3704_v57  ;;  %v3096_v57 = vld [vmem:[%s4287_s1 + $0x264] ss:$8 sps:$4 sm:$0xff]  }
  0x65   :  { %1883 = vmatprep.subr.bf16.mxu0 %v2991_v37  ;;  %v3064_v37 = vld [vmem:[%s4287_s1 + $0x210] ss:$8 sps:$4 sm:$0xff]  }
  0x67   :  { %1761 = vmatpush1.bf16.msra.mxu1 %v2986_v38  ;;  %v3067_v38 = vld [vmem:[%s4287_s1 + $0x510] ss:$8 sps:$4 sm:$0xff]  }
  0x68   :  { %1884 = vmatpush1.bf16.msra.mxu0 %v2989_v39  ;;  %1762 = vmatprep.subr.bf16.mxu1 %v2994_v40  ;;  %v3072_v39 = vld [vmem:[%s4287_s1 + $0x224] ss:$8 sps:$4 sm:$0xff]  }
  0x69   :  { %1885 = vmatprep.subr.bf16.mxu0 %v2997_v41  ;;  %v3075_v40 = vld [vmem:[%s4287_s1 + $0x524] ss:$8 sps:$4 sm:$0xff]   ;;  %v3070_v41 = vld [vmem:[%s4287_s1 + $0x220] ss:$8 sps:$4 sm:$0xff]  }
  0x6b   :  { %1763 = vmatpush1.bf16.msra.mxu1 %v2992_v42  ;;  %v3073_v42 = vld [vmem:[%s4287_s1 + $0x520] ss:$8 sps:$4 sm:$0xff]  }
  0x6c   :  { %1886 = vmatpush1.bf16.msra.mxu0 %v2995_v43  ;;  %1764 = vmatprep.subr.bf16.mxu1 %v3000_v44  ;;  %v3078_v43 = vld [vmem:[%s4287_s1 + $0x234] ss:$8 sps:$4 sm:$0xff]   ;;  %v3076_v44 = vld [vmem:[%s4287_s1 + $0x230] ss:$8 sps:$4 sm:$0xff]  }
  0x6d   :  { %1887 = vmatprep.subr.bf16.mxu0 %v3003_v45  ;;  %v3079_v45 = vld [vmem:[%s4287_s1 + $0x530] ss:$8 sps:$4 sm:$0xff]  }
  0x6f   :  { %1765 = vmatpush1.bf16.msra.mxu1 %v2998_v48  ;;  %v3084_v48 = vld [vmem:[%s4287_s1 + $0x244] ss:$8 sps:$4 sm:$0xff]  }
  0x70   :  { %1888 = vmatpush1.bf16.msra.mxu0 %v3001_v49  ;;  %1766 = vmatprep.subr.bf16.mxu1 %v3006_v51  ;;  %v3087_v49 = vld [vmem:[%s4287_s1 + $0x544] ss:$8 sps:$4 sm:$0xff]   ;;  %v3085_v51 = vld [vmem:[%s4287_s1 + $0x540] ss:$8 sps:$4 sm:$0xff]  }
  0x71   :  { %1889 = vmatprep.subr.bf16.mxu0 %v3009_v53  ;;  %v3090_v53 = vld [vmem:[%s4287_s1 + $0x254] ss:$8 sps:$4 sm:$0xff]  }
  0x73   :  { %1767 = vmatpush1.bf16.msra.mxu1 %v3004_v55  ;;  %v3088_v55 = vld [vmem:[%s4287_s1 + $0x250] ss:$8 sps:$4 sm:$0xff]  }
  0x74   :  { %1890 = vmatpush1.bf16.msra.mxu0 %v3007_v56  ;;  %1768 = vmatprep.subr.bf16.mxu1 %v3012_v58  ;;  %v3091_v56 = vld [vmem:[%s4287_s1 + $0x550] ss:$8 sps:$4 sm:$0xff]   ;;  %v3099_v58 = vld [vmem:[%s4287_s1 + $0x564] ss:$8 sps:$4 sm:$0xff]  }
  0x75   :  { %1891 = vmatprep.subr.bf16.mxu0 %v3015_v59  ;;  %v3094_v59 = vld [vmem:[%s4287_s1 + $0x260] ss:$8 sps:$4 sm:$0xff]  }
  0x77   :  { %1769 = vmatpush1.bf16.msra.mxu1 %v3010_v60  ;;  %v3097_v60 = vld [vmem:[%s4287_s1 + $0x560] ss:$8 sps:$4 sm:$0xff]  }
  0x78   :  { %1892 = vmatpush1.bf16.msra.mxu0 %v3013_v61  ;;  %1770 = vmatprep.subr.bf16.mxu1 %v3018_v62  ;;  %v3102_v61 = vld [vmem:[%s4287_s1 + $0x274] ss:$8 sps:$4 sm:$0xff]  }
  0x79   :  { %1893 = vmatprep.subr.bf16.mxu0 %v3021_v63  ;;  %v3105_v62 = vld [vmem:[%s4287_s1 + $0x574] ss:$8 sps:$4 sm:$0xff]   ;;  %v3100_v63 = vld [vmem:[%s4287_s1 + $0x270] ss:$8 sps:$4 sm:$0xff]  }
  0x7b   :  { %1771 = vmatpush1.bf16.msra.mxu1 %v3016_v0  ;;  %v3103_v0 = vld [vmem:[%s4287_s1 + $0x570] ss:$8 sps:$4 sm:$0xff]  }
  0x7c   :  { %1894 = vmatpush1.bf16.msra.mxu0 %v3019_v1  ;;  %1772 = vmatprep.subr.bf16.mxu1 %v3024_v2  ;;  %v3108_v1 = vld [vmem:[%s4287_s1 + $0x284] ss:$8 sps:$4 sm:$0xff]  }
  0x7d   :  { %1895 = vmatprep.subr.bf16.mxu0 %v3027_v3  ;;  %v3111_v2 = vld [vmem:[%s4287_s1 + $0x584] ss:$8 sps:$4 sm:$0xff]   ;;  %v3106_v3 = vld [vmem:[%s4287_s1 + $0x280] ss:$8 sps:$4 sm:$0xff]  }
  0x7f   :  { %1773 = vmatpush1.bf16.msra.mxu1 %v3022_v5  ;;  %v3109_v5 = vld [vmem:[%s4287_s1 + $0x580] ss:$8 sps:$4 sm:$0xff]  }
  0x80   :  { %1896 = vmatpush1.bf16.msra.mxu0 %v3025_v6  ;;  %1774 = vmatprep.subr.bf16.mxu1 %v3030_v7  ;;  %v3114_v6 = vld [vmem:[%s4287_s1 + $0x294] ss:$8 sps:$4 sm:$0xff]  }
  0x81   :  { %1897 = vmatprep.subr.bf16.mxu0 %v3033_v8  ;;  %v3117_v7 = vld [vmem:[%s4287_s1 + $0x594] ss:$8 sps:$4 sm:$0xff]   ;;  %v3112_v8 = vld [vmem:[%s4287_s1 + $0x290] ss:$8 sps:$4 sm:$0xff]  }
  0x83   :  { %1775 = vmatpush1.bf16.msra.mxu1 %v3028_v9  ;;  %v3115_v9 = vld [vmem:[%s4287_s1 + $0x590] ss:$8 sps:$4 sm:$0xff]  }
  0x84   :  { %1898 = vmatpush1.bf16.msra.mxu0 %v3031_v10  ;;  %1776 = vmatprep.subr.bf16.mxu1 %v3036_v11  ;;  %v3120_v10 = vld [vmem:[%s4287_s1 + $0x2a4] ss:$8 sps:$4 sm:$0xff]  }
  0x85   :  { %1899 = vmatprep.subr.bf16.mxu0 %v3039_v12  ;;  %v3123_v11 = vld [vmem:[%s4287_s1 + $0x5a4] ss:$8 sps:$4 sm:$0xff]   ;;  %v3118_v12 = vld [vmem:[%s4287_s1 + $0x2a0] ss:$8 sps:$4 sm:$0xff]  }
  0x87   :  { %1777 = vmatpush1.bf16.msra.mxu1 %v3034_v13  ;;  %v3121_v13 = vld [vmem:[%s4287_s1 + $0x5a0] ss:$8 sps:$4 sm:$0xff]  }
  0x88   :  { %1900 = vmatpush1.bf16.msra.mxu0 %v3037_v14  ;;  %1778 = vmatprep.subr.bf16.mxu1 %v3042_v16  ;;  %v3126_v14 = vld [vmem:[%s4287_s1 + $0x2b4] ss:$8 sps:$4 sm:$0xff]  }
  0x89   :  { %1901 = vmatprep.subr.bf16.mxu0 %v3045_v17  ;;  %v3129_v16 = vld [vmem:[%s4287_s1 + $0x5b4] ss:$8 sps:$4 sm:$0xff]   ;;  %v3124_v17 = vld [vmem:[%s4287_s1 + $0x2b0] ss:$8 sps:$4 sm:$0xff]  }
  0x8b   :  { %1779 = vmatpush1.bf16.msra.mxu1 %v3040_v18  ;;  %v3127_v18 = vld [vmem:[%s4287_s1 + $0x5b0] ss:$8 sps:$4 sm:$0xff]  }
  0x8c   :  { %1902 = vmatpush1.bf16.msra.mxu0 %v3043_v19  ;;  %1780 = vmatprep.subr.bf16.mxu1 %v3048_v21  ;;  %v3132_v19 = vld [vmem:[%s4287_s1 + $0x2c4] ss:$8 sps:$4 sm:$0xff]  }
  0x8d   :  { %1903 = vmatprep.subr.bf16.mxu0 %v3051_v22  ;;  %v3135_v21 = vld [vmem:[%s4287_s1 + $0x5c4] ss:$8 sps:$4 sm:$0xff]   ;;  %v3130_v22 = vld [vmem:[%s4287_s1 + $0x2c0] ss:$8 sps:$4 sm:$0xff]  }
  0x8f   :  { %1781 = vmatpush1.bf16.msra.mxu1 %v3046_v23  ;;  %v3133_v23 = vld [vmem:[%s4287_s1 + $0x5c0] ss:$8 sps:$4 sm:$0xff]  }
  0x90   :  { %1904 = vmatpush1.bf16.msra.mxu0 %v3049_v24  ;;  %1782 = vmatprep.subr.bf16.mxu1 %v3054_v25  ;;  %v3138_v24 = vld [vmem:[%s4287_s1 + $0x2d4] ss:$8 sps:$4 sm:$0xff]  }
  0x91   :  { %1905 = vmatprep.subr.bf16.mxu0 %v3057_v26  ;;  %v3141_v25 = vld [vmem:[%s4287_s1 + $0x5d4] ss:$8 sps:$4 sm:$0xff]   ;;  %v3136_v26 = vld [vmem:[%s4287_s1 + $0x2d0] ss:$8 sps:$4 sm:$0xff]  }
  0x93   :  { %1783 = vmatpush1.bf16.msra.mxu1 %v3052_v27  ;;  %v3139_v27 = vld [vmem:[%s4287_s1 + $0x5d0] ss:$8 sps:$4 sm:$0xff]  }
  0x94   :  { %1906 = vmatpush1.bf16.msra.mxu0 %v3055_v28  ;;  %1793 = vmatprep.subr.bf16.mxu1 %v3060_v29  ;;  %v3144_v28 = vld [vmem:[%s4287_s1 + $0x2e4] ss:$8 sps:$4 sm:$0xff]  }
  0x95   :  { %1916 = vmatprep.subr.bf16.mxu0 %v3063_v30  ;;  %v3147_v29 = vld [vmem:[%s4287_s1 + $0x5e4] ss:$8 sps:$4 sm:$0xff]   ;;  %v366_v30 = vcombine.high %v3677_v46, %v3677_v46  ;;  %v3153_v46 = vld [vmem:[%s4287_s1 + $0x5f4] ss:$8 sps:$4 sm:$0xff]  }
  0x96   :  { %1785 = vmatmul.mubr.bf16.vlgmr.msra.gmra.mrb[0].mxu1 %v362_v31  ;;  %v3142_v31 = vld [vmem:[%s4287_s1 + $0x2e0] ss:$8 sps:$4 sm:$0xff]  }
  0x97   :  { %1908 = vmatmul.mubr.bf16.vlgmr.msra.gmra.mrb[0].mxu0 %v3813_v32  ;;  %1794 = vmatpush1.bf16.msra.mxu1 %v3058_v33  ;;  %v3145_v33 = vld [vmem:[%s4287_s1 + $0x5e0] ss:$8 sps:$4 sm:$0xff]  }
  0x98   :  { %1917 = vmatpush1.bf16.msra.mxu0 %v3061_v34  ;;  %1795 = vmatprep.subr.bf16.mxu1 %v3066_v20  ;;  %v3150_v34 = vld [vmem:[%s4287_s1 + $0x2f4] ss:$8 sps:$4 sm:$0xff]   ;;  %v4002_v20 = vrot.slane %v366_v30, %v3520_v52  ;;  %v3229_v30 = vld [vmem:[%s4287_s1 + $0x784] ss:$8 sps:$4 sm:$0xff]  }
  0x99   :  { %1918 = vmatprep.subr.bf16.mxu0 %v3069_v35  ;;  %1825 = vmatprep.mubr.bf16.mxu1 %v3553_v4  ;;  %v3081_v4 = vld [vmem:[%s4287_s1 + $0x534] ss:$8 sps:$4 sm:$0xff]   ;;  %v3148_v35 = vld [vmem:[%s4287_s1 + $0x2f0] ss:$8 sps:$4 sm:$0xff]  }
  0x9a   :  { %1948 = vmatprep.mubr.bf16.mxu0 %v413_v36  ;;  %v3151_v36 = vld [vmem:[%s4287_s1 + $0x5f0] ss:$8 sps:$4 sm:$0xff]  }
  0x9b   :  { %1796 = vmatpush1.bf16.msra.mxu1 %v3064_v37  ;;  %v3156_v37 = vld [vmem:[%s4287_s1 + $0x604] ss:$8 sps:$4 sm:$0xff]  }
  0x9c   :  { %1919 = vmatpush1.bf16.msra.mxu0 %v3067_v38  ;;  %1797 = vmatprep.subr.bf16.mxu1 %v3072_v39  ;;  %v382_v38 = vcombine.high %v4002_v20, %v4002_v20  ;;  %v411_v39 = vcombine.high %v3813_v32, %v3813_v32  ;;  %v3157_v32 = vld [vmem:[%s4287_s1 + $0x610] ss:$8 sps:$4 sm:$0xff]  }
  0x9d   :  { %1920 = vmatprep.subr.bf16.mxu0 %v3075_v40  ;;  %v3154_v40 = vld [vmem:[%s4287_s1 + $0x600] ss:$8 sps:$4 sm:$0xff]  }
  0x9f   :  { %1798 = vmatpush1.bf16.msra.mxu1 %v3070_v41  ;;  %v4021_v41 = vrot.slane %v382_v38, %v3520_v52  ;;  %v3239_v38 = vld [vmem:[%s4287_s1 + $0x7c0] ss:$8 sps:$4 sm:$0xff]  }
  0xa0   :  { %1921 = vmatpush1.bf16.msra.mxu0 %v3073_v42  ;;  %1799 = vmatprep.subr.bf16.mxu1 %v3078_v43  ;;  %v3159_v42 = vld [vmem:[%s4287_s1 + $0x614] ss:$8 sps:$4 sm:$0xff]   ;;  %v3162_v43 = vld [vmem:[%s4287_s1 + $0x624] ss:$8 sps:$4 sm:$0xff]  }
  0xa1   :  { %1922 = vmatprep.subr.bf16.mxu0 %v3081_v4  ;;  %v3160_v4 = vld [vmem:[%s4287_s1 + $0x620] ss:$8 sps:$4 sm:$0xff]  }
  0xa3   :  { %1800 = vmatpush1.bf16.msra.mxu1 %v3076_v44  ;;  %v3163_v44 = vld [vmem:[%s4287_s1 + $0x630] ss:$8 sps:$4 sm:$0xff]  }
  0xa4   :  { %1923 = vmatpush1.bf16.msra.mxu0 %v3079_v45  ;;  %1801 = vmatprep.subr.bf16.mxu1 %v3084_v48  ;;  %v3168_v45 = vld [vmem:[%s4287_s1 + $0x644] ss:$8 sps:$4 sm:$0xff]   ;;  %v3166_v48 = vld [vmem:[%s4287_s1 + $0x640] ss:$8 sps:$4 sm:$0xff]  }
  0xa5   :  { %1924 = vmatprep.subr.bf16.mxu0 %v3087_v49  ;;  %v3171_v49 = vld [vmem:[%s4287_s1 + $0x654] ss:$8 sps:$4 sm:$0xff]  }
  0xa7   :  { %1802 = vmatpush1.bf16.msra.mxu1 %v3082_v50  ;;  %v3169_v50 = vld [vmem:[%s4287_s1 + $0x650] ss:$8 sps:$4 sm:$0xff]  }
  0xa8   :  { %1925 = vmatpush1.bf16.msra.mxu0 %v3085_v51  ;;  %1803 = vmatprep.subr.bf16.mxu1 %v3090_v53  ;;  %v3174_v51 = vld [vmem:[%s4287_s1 + $0x664] ss:$8 sps:$4 sm:$0xff]   ;;  %v3172_v53 = vld [vmem:[%s4287_s1 + $0x660] ss:$8 sps:$4 sm:$0xff]  }
  0xa9   :  { %1926 = vmatprep.subr.bf16.mxu0 %v3093_v54  ;;  %v3177_v54 = vld [vmem:[%s4287_s1 + $0x674] ss:$8 sps:$4 sm:$0xff]  }
  0xab   :  { %1804 = vmatpush1.bf16.msra.mxu1 %v3088_v55  ;;  %v3175_v55 = vld [vmem:[%s4287_s1 + $0x670] ss:$8 sps:$4 sm:$0xff]  }
  0xac   :  { %1927 = vmatpush1.bf16.msra.mxu0 %v3091_v56  ;;  %1805 = vmatprep.subr.bf16.mxu1 %v3096_v57  ;;  %v3180_v56 = vld [vmem:[%s4287_s1 + $0x684] ss:$8 sps:$4 sm:$0xff]   ;;  %v3178_v57 = vld [vmem:[%s4287_s1 + $0x680] ss:$8 sps:$4 sm:$0xff]  }
  0xad   :  { %1928 = vmatprep.subr.bf16.mxu0 %v3099_v58  ;;  %v3183_v58 = vld [vmem:[%s4287_s1 + $0x694] ss:$8 sps:$4 sm:$0xff]  }
  0xaf   :  { %1806 = vmatpush1.bf16.msra.mxu1 %v3094_v59  ;;  %v3181_v59 = vld [vmem:[%s4287_s1 + $0x690] ss:$8 sps:$4 sm:$0xff]  }
  0xb0   :  { %1929 = vmatpush1.bf16.msra.mxu0 %v3097_v60  ;;  %1807 = vmatprep.subr.bf16.mxu1 %v3102_v61  ;;  %v3186_v60 = vld [vmem:[%s4287_s1 + $0x6a4] ss:$8 sps:$4 sm:$0xff]   ;;  %v3184_v61 = vld [vmem:[%s4287_s1 + $0x6a0] ss:$8 sps:$4 sm:$0xff]  }
  0xb1   :  { %1930 = vmatprep.subr.bf16.mxu0 %v3105_v62  ;;  %v3189_v62 = vld [vmem:[%s4287_s1 + $0x6b4] ss:$8 sps:$4 sm:$0xff]  }
  0xb3   :  { %1808 = vmatpush1.bf16.msra.mxu1 %v3100_v63  ;;  %v3187_v63 = vld [vmem:[%s4287_s1 + $0x6b0] ss:$8 sps:$4 sm:$0xff]  }
  0xb4   :  { %1931 = vmatpush1.bf16.msra.mxu0 %v3103_v0  ;;  %1809 = vmatprep.subr.bf16.mxu1 %v3108_v1  ;;  %v3192_v0 = vld [vmem:[%s4287_s1 + $0x6c4] ss:$8 sps:$4 sm:$0xff]   ;;  %v3190_v1 = vld [vmem:[%s4287_s1 + $0x6c0] ss:$8 sps:$4 sm:$0xff]  }
  0xb5   :  { %1932 = vmatprep.subr.bf16.mxu0 %v3111_v2  ;;  %v3195_v2 = vld [vmem:[%s4287_s1 + $0x6d4] ss:$8 sps:$4 sm:$0xff]  }
  0xb7   :  { %1810 = vmatpush1.bf16.msra.mxu1 %v3106_v3  ;;  %v3193_v3 = vld [vmem:[%s4287_s1 + $0x6d0] ss:$8 sps:$4 sm:$0xff]  }
  0xb8   :  { %1933 = vmatpush1.bf16.msra.mxu0 %v3109_v5  ;;  %1811 = vmatprep.subr.bf16.mxu1 %v3114_v6  ;;  %v3198_v5 = vld [vmem:[%s4287_s1 + $0x6e4] ss:$8 sps:$4 sm:$0xff]   ;;  %v3196_v6 = vld [vmem:[%s4287_s1 + $0x6e0] ss:$8 sps:$4 sm:$0xff]  }
  0xb9   :  { %1934 = vmatprep.subr.bf16.mxu0 %v3117_v7  ;;  %v3201_v7 = vld [vmem:[%s4287_s1 + $0x6f4] ss:$8 sps:$4 sm:$0xff]  }
  0xbb   :  { %1812 = vmatpush1.bf16.msra.mxu1 %v3112_v8  ;;  %v3199_v8 = vld [vmem:[%s4287_s1 + $0x6f0] ss:$8 sps:$4 sm:$0xff]  }
  0xbc   :  { %1935 = vmatpush1.bf16.msra.mxu0 %v3115_v9  ;;  %1813 = vmatprep.subr.bf16.mxu1 %v3120_v10  ;;  %v3205_v9 = vld [vmem:[%s4287_s1 + $0x704] ss:$8 sps:$4 sm:$0xff]   ;;  %v4120_v10 = vrot.slane %v4002_v20, %v3520_v52  ;;  %v3206_v52 = vld [vmem:[%s4287_s1 + $0x710] ss:$8 sps:$4 sm:$0xff]   ;;  %v3233_v20 = vld [vmem:[%s4287_s1 + $0x7a0] ss:$8 sps:$4 sm:$0xff]  }
  0xbd   :  { %1936 = vmatprep.subr.bf16.mxu0 %v3123_v11  ;;  %v3203_v11 = vld [vmem:[%s4287_s1 + $0x700] ss:$8 sps:$4 sm:$0xff]  }
  0xbf   :  { %1814 = vmatpush1.bf16.msra.mxu1 %v3118_v12  ;;  %v414_v12 = vcombine.high %v4021_v41, %v4021_v41 }
  0xc0   :  { %1937 = vmatpush1.bf16.msra.mxu0 %v3121_v13  ;;  %1815 = vmatprep.subr.bf16.mxu1 %v3126_v14  ;;  %v3208_v13 = vld [vmem:[%s4287_s1 + $0x714] ss:$8 sps:$4 sm:$0xff]   ;;  %v3211_v14 = vld [vmem:[%s4287_s1 + $0x724] ss:$8 sps:$4 sm:$0xff]  }
  0xc1   :  { %1938 = vmatprep.subr.bf16.mxu0 %v3129_v16  ;;  %v3209_v16 = vld [vmem:[%s4287_s1 + $0x720] ss:$8 sps:$4 sm:$0xff]  }
  0xc3   :  { %1816 = vmatpush1.bf16.msra.mxu1 %v3124_v17  ;;  %v3214_v17 = vld [vmem:[%s4287_s1 + $0x734] ss:$8 sps:$4 sm:$0xff]  }
  0xc4   :  { %1939 = vmatpush1.bf16.msra.mxu0 %v3127_v18  ;;  %1817 = vmatprep.subr.bf16.mxu1 %v3132_v19  ;;  %v3212_v18 = vld [vmem:[%s4287_s1 + $0x730] ss:$8 sps:$4 sm:$0xff]   ;;  %v3217_v19 = vld [vmem:[%s4287_s1 + $0x744] ss:$8 sps:$4 sm:$0xff]  }
  0xc5   :  { %1940 = vmatprep.subr.bf16.mxu0 %v3135_v21  ;;  %v3215_v21 = vld [vmem:[%s4287_s1 + $0x740] ss:$8 sps:$4 sm:$0xff]  }
  0xc7   :  { %1818 = vmatpush1.bf16.msra.mxu1 %v3130_v22  ;;  %v3220_v22 = vld [vmem:[%s4287_s1 + $0x754] ss:$8 sps:$4 sm:$0xff]  }
  0xc8   :  { %1941 = vmatpush1.bf16.msra.mxu0 %v3133_v23  ;;  %1819 = vmatprep.subr.bf16.mxu1 %v3138_v24  ;;  %v3218_v23 = vld [vmem:[%s4287_s1 + $0x750] ss:$8 sps:$4 sm:$0xff]   ;;  %v3223_v24 = vld [vmem:[%s4287_s1 + $0x764] ss:$8 sps:$4 sm:$0xff]  }
  0xc9   :  { %1942 = vmatprep.subr.bf16.mxu0 %v3141_v25  ;;  %v3221_v25 = vld [vmem:[%s4287_s1 + $0x760] ss:$8 sps:$4 sm:$0xff]  }
  0xcb   :  { %1820 = vmatpush1.bf16.msra.mxu1 %v3136_v26  ;;  %v3226_v26 = vld [vmem:[%s4287_s1 + $0x774] ss:$8 sps:$4 sm:$0xff]  }
  0xcc   :  { %1943 = vmatpush1.bf16.msra.mxu0 %v3139_v27  ;;  %1821 = vmatprep.subr.bf16.mxu1 %v3144_v28  ;;  %v3251_v27 = vld [vmem:[#allocation4 + $0x40] sm:$0xff]  }
  0xcd   :  { %1944 = vmatprep.subr.bf16.mxu0 %v3147_v29  ;;  %v3252_v28 = vld [vmem:[#allocation4] sm:$0xff]   ;;  %v3224_v29 = vld [vmem:[%s4287_s1 + $0x770] ss:$8 sps:$4 sm:$0xff]  }
  0xcf   :  { %1822 = vmatpush1.bf16.msra.mxu1 %v3142_v31  ;;  %v3227_v31 = vld [vmem:[%s4287_s1 + $0x780] ss:$8 sps:$4 sm:$0xff]  }
  0xd0   :  { %1945 = vmatpush1.bf16.msra.mxu0 %v3145_v33  ;;  %1823 = vmatprep.subr.bf16.mxu1 %v3150_v34  ;;  %v3232_v33 = vld [vmem:[%s4287_s1 + $0x794] ss:$8 sps:$4 sm:$0xff]   ;;  %v3230_v34 = vld [vmem:[%s4287_s1 + $0x790] ss:$8 sps:$4 sm:$0xff]  }
  0xd1   :  { %1946 = vmatprep.subr.bf16.mxu0 %v3153_v46  ;;  %v3235_v46 = vld [vmem:[%s4287_s1 + $0x7a4] ss:$8 sps:$4 sm:$0xff]  }
  0xd3   :  { %1824 = vmatpush1.bf16.msra.mxu1 %v3148_v35  ;;  %v3238_v35 = vld [vmem:[%s4287_s1 + $0x7b4] ss:$8 sps:$4 sm:$0xff]  }
  0xd4   :  { %1947 = vmatpush1.bf16.msra.mxu0 %v3151_v36  ;;  %2764 = vmatprep.subr.bf16.mxu1 %v3251_v27  ;;  %v3236_v36 = vld [vmem:[%s4287_s1 + $0x7b0] ss:$8 sps:$4 sm:$0xff]  }
  0xd5   :  { %1957 = vmatprep.subr.bf16.mxu0 %v3156_v37  ;;  %v3241_v37 = vld [vmem:[%s4287_s1 + $0x7c4] ss:$8 sps:$4 sm:$0xff]  }
  0xd6   :  { %1826 = vmatmul.mubr.bf16.vlgmr.msra.gmra.mrb[0].mxu1 %v3585_v15  ;;  %v3165_v15 = vld [vmem:[%s4287_s1 + $0x634] ss:$8 sps:$4 sm:$0xff]  }
  0xd7   :  { %1949 = vmatmul.mubr.bf16.vlgmr.msra.gmra.mrb[0].mxu0 %v411_v39  ;;  %2765 = vmatpush3.bf16.msra.mxu1 %v3252_v28  ;;  %v3244_v39 = vld [vmem:[%s4287_s1 + $0x7d4] ss:$8 sps:$4 sm:$0xff]  }
  0xd8   :  { %1958 = vmatpush1.bf16.msra.mxu0 %v3154_v40  ;;  %1989 = vmatprep.mubr.bf16.mxu0 %v4021_v41  ;;  %v3242_v40 = vld [vmem:[%s4287_s1 + $0x7d0] ss:$8 sps:$4 sm:$0xff]   ;;  %v3247_v41 = vld [vmem:[%s4287_s1 + $0x7e4] ss:$8 sps:$4 sm:$0xff]  }
  0xd9   :  { %1959 = vmatprep.subr.bf16.mxu0 %v3159_v42  ;;  %v3245_v42 = vld [vmem:[%s4287_s1 + $0x7e0] ss:$8 sps:$4 sm:$0xff]  }
  0xdc   :  { %1960 = vmatpush1.bf16.msra.mxu0 %v3157_v32  ;;  %v3250_v32 = vld [vmem:[%s4287_s1 + $0x7f4] ss:$8 sps:$4 sm:$0xff]  }
  0xdd   :  { %1961 = vmatprep.subr.bf16.mxu0 %v3162_v43  ;;  %v3248_v43 = vld [vmem:[%s4287_s1 + $0x7f0] ss:$8 sps:$4 sm:$0xff]  }
  0xe0   :  { %1962 = vmatpush1.bf16.msra.mxu0 %v3160_v4  ;;  %v412_v4 = vcombine.high %v4120_v10, %v4120_v10 }
  0xe1   :  { %1963 = vmatprep.subr.bf16.mxu0 %v3165_v15  ;;  %v3253_v15 = vld [vmem:[#allocation4 + $0x48] sm:$0xff]  }
  0xe2   :  { %2766 = vmatprep.subr.bf16.mxu1 %v3253_v15 }
  0xe4   :  { %1964 = vmatpush1.bf16.msra.mxu0 %v3163_v44 }
  0xe5   :  { %1965 = vmatprep.subr.bf16.mxu0 %v3168_v45  ;;  %v3311_v45 = vmov 0.0  }
  0xe6   :  { %53 = vst [vmem:[#allocation2] sm:$0xf] %v3311_v45 }
  0xe8   :  { %1966 = vmatpush1.bf16.msra.mxu0 %v3166_v48  ;;  %v3254_v48 = vld [vmem:[#allocation4 + $0x8] sm:$0xff]  }
  0xe9   :  { %1967 = vmatprep.subr.bf16.mxu0 %v3171_v49  ;;  %2767 = vmatpush3.bf16.msra.mxu1 %v3254_v48  ;;  %v3277_v48 = vld [vmem:[%s4293_s7 + $0x10] sm:$0xff]  }
  0xec   :  { %1968 = vmatpush1.bf16.msra.mxu0 %v3169_v50 }
  0xed   :  { %1969 = vmatprep.subr.bf16.mxu0 %v3174_v51 }
  0xf0   :  { %1970 = vmatpush1.bf16.msra.mxu0 %v3172_v53  ;;  %v3255_v53 = vld [vmem:[#allocation4 + $0x50] sm:$0xff]  }
  0xf1   :  { %1971 = vmatprep.subr.bf16.mxu0 %v3177_v54  ;;  %v3256_v54 = vld [vmem:[#allocation4 + $0x10] sm:$0xff]   ;;  %2768 = vmatprep.subr.bf16.mxu1 %v3255_v53 }
  0xf2   :  { %2769 = vmatpush3.bf16.msra.mxu1 %v3256_v54 }
  0xf4   :  { %1972 = vmatpush1.bf16.msra.mxu0 %v3175_v55  ;;  %v3257_v55 = vld [vmem:[#allocation4 + $0x58] sm:$0xff]  }
  0xf5   :  { %1973 = vmatprep.subr.bf16.mxu0 %v3180_v56  ;;  %v3258_v56 = vld [vmem:[#allocation4 + $0x18] sm:$0xff]   ;;  %2770 = vmatprep.subr.bf16.mxu1 %v3257_v55 }
  0xf6   :  { %2771 = vmatpush3.bf16.msra.mxu1 %v3258_v56 }
  0xf8   :  { %1974 = vmatpush1.bf16.msra.mxu0 %v3178_v57  ;;  %v3259_v57 = vld [vmem:[#allocation4 + $0x60] sm:$0xff]  }
  0xf9   :  { %1975 = vmatprep.subr.bf16.mxu0 %v3183_v58  ;;  %v3260_v58 = vld [vmem:[#allocation4 + $0x20] sm:$0xff]   ;;  %2772 = vmatprep.subr.bf16.mxu1 %v3259_v57 }
  0xfa   :  { %2773 = vmatpush3.bf16.msra.mxu1 %v3260_v58 }
  0xfc   :  { %1976 = vmatpush1.bf16.msra.mxu0 %v3181_v59  ;;  %v3261_v59 = vld [vmem:[#allocation4 + $0x68] sm:$0xff]  }
  0xfd   :  { %1977 = vmatprep.subr.bf16.mxu0 %v3186_v60  ;;  %v3262_v60 = vld [vmem:[#allocation4 + $0x28] sm:$0xff]   ;;  %2774 = vmatprep.subr.bf16.mxu1 %v3261_v59  ;;  %v2758_v59 = vld [vmem:[#allocation3] ss:$0 sm:$0xff] }
  0xfe   :  { %2775 = vmatpush3.bf16.msra.mxu1 %v3262_v60 }
 0x100   :  { %1978 = vmatpush1.bf16.msra.mxu0 %v3184_v61  ;;  %v3263_v61 = vld [vmem:[#allocation4 + $0x70] sm:$0xff]  }
 0x101   :  { %1979 = vmatprep.subr.bf16.mxu0 %v3189_v62  ;;  %v3264_v62 = vld [vmem:[#allocation4 + $0x30] sm:$0xff]   ;;  %2776 = vmatprep.subr.bf16.mxu1 %v3263_v61 }
 0x102   :  { %2777 = vmatpush3.bf16.msra.mxu1 %v3264_v62 }
 0x104   :  { %1980 = vmatpush1.bf16.msra.mxu0 %v3187_v63  ;;  %v3265_v63 = vld [vmem:[#allocation4 + $0x78] sm:$0xff]  }
 0x105   :  { %1981 = vmatprep.subr.bf16.mxu0 %v3192_v0  ;;  %v3266_v0 = vld [vmem:[#allocation4 + $0x38] sm:$0xff]   ;;  %2778 = vmatprep.subr.bf16.mxu1 %v3265_v63 }
 0x106   :  { %2779 = vmatpush3.bf16.msra.mxu1 %v3266_v0 }
 0x107   :  { %2800 = vmatprep.subr.bf16.mxu1 %v3311_v45 }
 0x108   :  { %1982 = vmatpush1.bf16.msra.mxu0 %v3190_v1  ;;  %v3312_v1 = vmov 1983009808  }
 0x109   :  { %1983 = vmatprep.subr.bf16.mxu0 %v3195_v2  ;;  %v2043_v2 = vunpack.c.l.s4 %v3312_v1 }
 0x10c   :  { %1984 = vmatpush1.bf16.msra.mxu0 %v3193_v3  ;;  %v2044_v3 = vunpack.c.0.s8 %v2043_v2 }
 0x10d   :  { %1985 = vmatprep.subr.bf16.mxu0 %v3198_v5 }
 0x110   :  { %1986 = vmatpush1.bf16.msra.mxu0 %v3196_v6 }
 0x111   :  { %1987 = vmatprep.subr.bf16.mxu0 %v3201_v7 }
 0x114   :  { %1988 = vmatpush1.bf16.msra.mxu0 %v3199_v8 }
 0x115   :  { %1998 = vmatprep.subr.bf16.mxu0 %v3205_v9  ;;  %v2047_v9 = vsub.s32 %v2044_v3, %v3505_v47 }
 0x117   :  { %1990 = vmatmul.mubr.bf16.vlgmr.msra.gmra.mrb[0].mxu0 %v4120_v10 }
 0x118   :  { %1999 = vmatpush1.bf16.msra.mxu0 %v3203_v11  ;;  %2030 = vmatprep.mubr.bf16.mxu0 %v414_v12  ;;  %v2060_v11 = vsub.s32 0, %v3505_v47  ;;  %v2064_v12 = vsub.s32 1, %v3505_v47 }
 0x119   :  { %2000 = vmatprep.subr.bf16.mxu0 %v3208_v13 }
 0x11c   :  { %2001 = vmatpush1.bf16.msra.mxu0 %v3206_v52  ;;  %v2056_v52 = vld [vmem:[%s4288_s2] sm:$0x3] }
 0x11d   :  { %2002 = vmatprep.subr.bf16.mxu0 %v3211_v14 }
 0x120   :  { %2003 = vmatpush1.bf16.msra.mxu0 %v3209_v16  ;;  %v54_v16 = vld [vmem:[#allocation2] sm:$0xf] }
 0x121   :  { %2004 = vmatprep.subr.bf16.mxu0 %v3214_v17 }
 0x124   :  { %2005 = vmatpush1.bf16.msra.mxu0 %v3212_v18  ;;  %v2061_v18 = vrot.slane %v2056_v52, %v2060_v11 }
 0x125   :  { %2006 = vmatprep.subr.bf16.mxu0 %v3217_v19  ;;  %v2065_v19 = vrot.slane %v2056_v52, %v2064_v12 }
 0x128   :  { %2007 = vmatpush1.bf16.msra.mxu0 %v3215_v21 }
 0x129   :  { %2008 = vmatprep.subr.bf16.mxu0 %v3220_v22  ;;  %v2066_v22 = vcombine.low %v2061_v18, %v2065_v19 }
 0x12c   :  { %2009 = vmatpush1.bf16.msra.mxu0 %v3218_v23  ;;  %v2073_v23 = vrot.slane %v2066_v22, %v2047_v9 }
 0x12d   :  { %2010 = vmatprep.subr.bf16.mxu0 %v3223_v24 }
 0x130   :  { %2011 = vmatpush1.bf16.msra.mxu0 %v3221_v25 }
 0x131   :  { %2012 = vmatprep.subr.bf16.mxu0 %v3226_v26 }
 0x134   :  { %2013 = vmatpush1.bf16.msra.mxu0 %v3224_v29  ;;  %v3267_v29 = vld [vmem:[%s4291_s5] sm:$0xff]  }
 0x135   :  { %2014 = vmatprep.subr.bf16.mxu0 %v3229_v30 }
 0x138   :  { %2015 = vmatpush1.bf16.msra.mxu0 %v3227_v31  ;;  %v3268_v31 = vld [vmem:[%s4291_s5 + $0x8] sm:$0xff]  }
 0x139   :  { %2016 = vmatprep.subr.bf16.mxu0 %v3232_v33  ;;  %v3269_v33 = vld [vmem:[%s4291_s5 + $0x10] sm:$0xff]  }
 0x13c   :  { %2017 = vmatpush1.bf16.msra.mxu0 %v3230_v34  ;;  %v3270_v34 = vld [vmem:[%s4291_s5 + $0x18] sm:$0xff]  }
 0x13d   :  { %2018 = vmatprep.subr.bf16.mxu0 %v3235_v46  ;;  %v3271_v46 = vld [vmem:[%s4291_s5 + $0x20] sm:$0xff]  }
 0x140   :  { %2019 = vmatpush1.bf16.msra.mxu0 %v3233_v20  ;;  %v3272_v20 = vld [vmem:[%s4291_s5 + $0x28] sm:$0xff]  }
 0x141   :  { %2020 = vmatprep.subr.bf16.mxu0 %v3238_v35  ;;  %v3273_v35 = vld [vmem:[%s4291_s5 + $0x30] sm:$0xff]  }
 0x144   :  { %2021 = vmatpush1.bf16.msra.mxu0 %v3236_v36  ;;  %v3274_v36 = vld [vmem:[%s4291_s5 + $0x38] sm:$0xff]  }
 0x145   :  { %2022 = vmatprep.subr.bf16.mxu0 %v3241_v37 }
 0x148   :  { %2023 = vmatpush1.bf16.msra.mxu0 %v3239_v38  ;;  %v2732_v38 = vld [vmem:[%s4290_s4] ss:$0 sm:$0xff] }
 0x149   :  { %2024 = vmatprep.subr.bf16.mxu0 %v3244_v39 }
 0x14c   :  { %2025 = vmatpush1.bf16.msra.mxu0 %v3242_v40 }
 0x14d   :  { %2026 = vmatprep.subr.bf16.mxu0 %v3247_v41 }
 0x150   :  { %2027 = vmatpush1.bf16.msra.mxu0 %v3245_v42 }
 0x151   :  { %2028 = vmatprep.subr.bf16.mxu0 %v3250_v32 }
 0x154   :  { %2029 = vmatpush1.bf16.msra.mxu0 %v3248_v43 }
 0x157   :  { %2031 = vmatmul.mubr.bf16.vlgmr.msra.gmra.mrb[0].mxu0 %v412_v4  ;;  %v3275_v4 = vld [vmem:[%s4293_s7] sm:$0xff]  }
 0x1a9   :  { %v1827_v44 = vpop.f32.mrb[0].mxu1 }
 0x1aa   :  { %v1829_v49 = vpop.f32.mrb[1].mxu1 }
 0x1ab   :  { %v1831_v50 = vpop.f32.mrb[2].mxu1 }
 0x1ac   :  { %v1832_v51 = vpop.f32.mrb[3].mxu1  ;;  %v2749_v50 = vld [vmem:[%s4292_s6] ss:$0 sm:$0xff] }
 0x22a   :  { %v2032_v5 = vpop.f32.mrb[0].mxu0 }
 0x22b   :  { %v2832_v6 = vadd.f32 %v2032_v5, %v1827_v44  ;;  %v2034_v7 = vpop.f32.mrb[1].mxu0  ;;  %v3276_v44 = vld [vmem:[%s4293_s7 + $0x8] sm:$0xff]  }
 0x22c   :  { %v2833_v8 = vadd.f32 %v2034_v7, %v1829_v49  ;;  %v2036_v10 = vpop.f32.mrb[2].mxu0  ;;  %v3278_v49 = vld [vmem:[%s4293_s7 + $0x18] sm:$0xff]  }
 0x22d   :  { %v2037_v13 = vpop.f32.mrb[3].mxu0 }
 0x22e   :  { %v2041_v14 = vcombine.low %v2832_v6, %v2833_v8 }
 0x230   :  { %v2048_v17 = vrot.slane %v2041_v14, %v2047_v9 }
 0x232   :  { %v2050_v21 = vadd.f32 %v2048_v17, %v54_v16 }
 0x234   :  { %2051 = vst [vmem:[#allocation2] sm:$0xf] %v2050_v21 }
 0x23b   :  { %v2055_v24 = vld [vmem:[#allocation2] sm:$0xf] }
 0x23c   :  { %v2075_v25 = vadd.f32 %v2073_v23, %v2055_v24 }
 0x23e   :  { %v2076_v26 = vmax.f32 %v2075_v25, 0.0 }
 0x240   :  { %v2084_v27 = vrot.slane %v2076_v26, %v2047_v9 }
 0x242   :  { %v2085_v28 = vcombine.high %v2084_v27, %v2084_v27  ;;  %v2088_v30 = vpack.c.bf16 %v2084_v27, %v2084_v27 }
 0x244   :  { %v2089_v47 = vpack.c.bf16 %v2085_v28, %v2085_v28 }
 0x246   :  { %2257 = vmatprep.mubr.bf16.mxu1 %v2089_v47 }
 0x247   :  { %2258 = vmatmul.mubr.bf16.vlgmr.msra.gmra.mrb[4].mxu1 %v2088_v30 }
 0x248   :  { %2801 = vmatpush3.bf16.msra.mxu1 %v3267_v29  ;;  %2816 = vmatprep.mubr.msk.bf16.mxu1 %vm3313_vm0, %v3311_v45 }
 0x249   :  { %2802 = vmatprep.subr.bf16.mxu1 %v3311_v45 }
 0x24c   :  { %2803 = vmatpush3.bf16.msra.mxu1 %v3268_v31 }
 0x24d   :  { %2804 = vmatprep.subr.bf16.mxu1 %v3311_v45 }
 0x250   :  { %2805 = vmatpush3.bf16.msra.mxu1 %v3269_v33 }
 0x251   :  { %2806 = vmatprep.subr.bf16.mxu1 %v3311_v45 }
 0x254   :  { %2807 = vmatpush3.bf16.msra.mxu1 %v3270_v34 }
 0x255   :  { %2808 = vmatprep.subr.bf16.mxu1 %v3311_v45 }
 0x258   :  { %2809 = vmatpush3.bf16.msra.mxu1 %v3271_v46 }
 0x259   :  { %2810 = vmatprep.subr.bf16.mxu1 %v3311_v45 }
 0x25c   :  { %2811 = vmatpush3.bf16.msra.mxu1 %v3272_v20 }
 0x25d   :  { %2812 = vmatprep.subr.bf16.mxu1 %v3311_v45 }
 0x260   :  { %2813 = vmatpush3.bf16.msra.mxu1 %v3273_v35 }
 0x261   :  { %2814 = vmatprep.subr.bf16.mxu1 %v3311_v45 }
 0x264   :  { %2815 = vmatpush3.bf16.msra.mxu1 %v3274_v36 }
 0x265   :  { %2820 = vmatprep.subr.bf16.mxu1 %v3311_v45 }
 0x31a   :  { %v2780_v37 = vpop.f32.mrb[4].mxu1 }
 0x31b   :  { %v2781_v39 = vpop.f32.mrb[5].mxu1 }
 0x31c   :  { %v2782_v40 = vadd.f32 %v2781_v39, %v2780_v37  ;;  %v2783_v41 = vpop.f32.mrb[6].mxu1 }
 0x31d   :  { %v2784_v42 = vpop.f32.mrb[7].mxu1 }
 0x31e   :  { %v2260_v32 = vadd.f32 %v2782_v40, %v2732_v38 }
 0x320   :  { %v2265_v43 = vmax.f32 %v2260_v32, 0.0 }
 0x322   :  { %v2266_v15 = vpack.c.bf16 %v2265_v43, %v2265_v43 }
 0x324   :  { %2817 = vmatmul.mubr.bf16.vlgmr.msra.gmra.mrb[8].mxu1 %v2266_v15 }
 0x325   :  { %2821 = vmatpush3.bf16.msra.mxu1 %v3275_v4  ;;  %2828 = vmatprep.mubr.msk.bf16.mxu1 %vm3313_vm0, %v3311_v45 }
 0x326   :  { %2822 = vmatprep.subr.bf16.mxu1 %v3311_v45 }
 0x329   :  { %2823 = vmatpush3.bf16.msra.mxu1 %v3276_v44 }
 0x32a   :  { %2824 = vmatprep.subr.bf16.mxu1 %v3311_v45 }
 0x32d   :  { %2825 = vmatpush3.bf16.msra.mxu1 %v3277_v48 }
 0x32e   :  { %2826 = vmatprep.subr.bf16.mxu1 %v3311_v45 }
 0x331   :  { %2827 = vmatpush3.bf16.msra.mxu1 %v3278_v49 }
 0x3f7   :  { %v2372_v51 = vpop.f32.mrb[8].mxu1 }
 0x3f8   :  { %v2373_v53 = vadd.f32 %v2749_v50, %v2372_v51  ;;  %v2818_v54 = vpop.f32.mrb[9].mxu1 }
 0x3f9   :  { %v2375_v55 = vpop.f32.mrb[10].mxu1 }
 0x3fa   :  { %v2378_v56 = vmax.f32 %v2373_v53, 0.0  ;;  %v2819_v57 = vpop.f32.mrb[11].mxu1 }
 0x3fc   :  { %v2379_v58 = vpack.c.bf16 %v2378_v56, %v2378_v56 }
 0x3fe   :  { %2829 = vmatmul.mubr.msk.bf16.vlgmr.msra.gmra.mrb[12].mxu1 %vm2419_vm1, %v2379_v58 }
 0x4d1   :  { %v2457_v45 = vpop.f32.mrb[12].mxu1 }
 0x4d2   :  { %v2458_v60 = vadd.f32 %v2758_v59, %v2457_v45  ;;  %v2830_v61 = vpop.f32.mrb[13].mxu1 }
 0x4d3   :  { %v2460_v62 = vpop.f32.mrb[14].mxu1 }
 0x4d4   :  { %v2463_v63 = vsub.f32 0.0, %v2458_v60  ;;  %v2831_v0 = vpop.f32.mrb[15].mxu1 }
 0x4d6   :  { %v2464_v1 = vmul.f32 1.442695, %v2463_v63 }
 0x4d8   :  { %3279 = vpow2.f32 %v2464_v1 }
 0x4e2   :  { %v3280_v2 = vpop.eup %3279 }
 0x4e3   :  { %v2466_v3 = vadd.f32 1.0, %v3280_v2 }
 0x4e5   :  { %3281 = vrcp.f32 %v2466_v3 }
 0x4ef   :  { %v3282_v5 = vpop.eup %3281 }
 0x4f0   :  { %2470 = vst.msk [vmem:[%s4295_s9] sm:$0x3] %vm2469_vm2, %v3282_v5 }
 0x4f1   :  { %2475 = vsyncpa [#allocation5], 1 }

// kernel: voice_match_forward.2
= control target key start
LH: loop header
LB: loop body
LE: loop exit
PB: predicated region body
PF: predicated region fallthrough
CT: control target
= control target key end

     0   :  { %s5011_s6 = smov 1   ;;  %s5012_s10 = smov 2   ;;  %s5610_s0 = inlined_call_operand.smem [shape: u32[31], index: -1, kind: input, shape index: {}] }
   0x1   :  { %s5083_s5 = sld [smem:[%s5610_s0]]   ;;  %s5013_s14 = smov 3  }
   0x2   :  { %s5088_s9 = sld [smem:[%s5610_s0 + %s5011_s6]]   ;;  %s5014_s18 = smov 4  }
   0x3   :  { %s5093_s13 = sld [smem:[%s5610_s0 + %s5012_s10]]   ;;  %s5015_s22 = smov 5  }
   0x4   :  { %s5098_s17 = sld [smem:[%s5610_s0 + %s5013_s14]]   ;;  %s5016_s26 = smov 6  }
   0x5   :  { %s5103_s21 = sld [smem:[%s5610_s0 + %s5014_s18]]   ;;  %s5017_s30 = smov 7  }
   0x6   :  { %s5108_s25 = sld [smem:[%s5610_s0 + %s5015_s22]]   ;;  %s5018_s4 = smov 8  }
   0x7   :  { %5624 = sst [smem:[#allocation61_spill]] %s5083_s5  ;;  %s5019_s10 = smov 9  }
   0x8   :  { %s5113_s29 = sld [smem:[%s5610_s0 + %s5016_s26]]   ;;  %s5020_s15 = smov 10  }
   0x9   :  { %s5118_s3 = sld [smem:[%s5610_s0 + %s5017_s30]]   ;;  %s5021_s20 = smov 11  }
   0xa   :  { %5625 = sst [smem:[#allocation62_spill]] %s5098_s17  ;;  %s5022_s26 = smov 12  }
   0xb   :  { %s5123_s8 = sld [smem:[%s5610_s0 + %s5018_s4]]   ;;  %s5023_s1 = smov 13  }
   0xc   :  { %5626 = sst [smem:[#allocation63_spill]] %s5108_s25  ;;  %s5024_s7 = smov 14  }
   0xd   :  { %s5128_s14 = sld [smem:[%s5610_s0 + %s5019_s10]]   ;;  %s5026_s22 = smov 16  }
   0xe   :  { %s5133_s19 = sld [smem:[%s5610_s0 + %s5020_s15]]   ;;  %s5025_s15 = smov 15  }
   0xf   :  { %5627 = sst [smem:[#allocation64_spill]] %s5118_s3  ;;  %s5027_s28 = smov 17  }
  0x10   :  { %s5138_s24 = sld [smem:[%s5610_s0 + %s5021_s20]]  }
  0x11   :  { %s5143_s30 = sld [smem:[%s5610_s0 + %s5022_s26]]  }
  0x12   :  { %s5148_s6 = sld [smem:[%s5610_s0 + %s5023_s1]]  }
  0x13   :  { %5628 = sst [smem:[#allocation65_spill]] %s5128_s14 }
  0x14   :  { %s5153_s12 = sld [smem:[%s5610_s0 + %s5024_s7]]   ;;  %s5028_s7 = smov 18  }
  0x15   :  { %s5158_s20 = sld [smem:[%s5610_s0 + %s5025_s15]]   ;;  %s5029_s15 = smov 19  }
  0x16   :  { %5629 = sst [smem:[#allocation66_spill]] %s5138_s24 }
  0x17   :  { %s5163_s27 = sld [smem:[%s5610_s0 + %s5026_s22]]   ;;  %s5030_s22 = smov 20  }
  0x18   :  { %5630 = sst [smem:[#allocation67_spill]] %s5148_s6 }
  0x19   :  { %s5168_s4 = sld [smem:[%s5610_s0 + %s5027_s28]]   ;;  %s5031_s28 = smov 21  }
  0x1a   :  { %s5173_s5 = sld [smem:[%s5610_s0 + %s5028_s7]]   ;;  %s5032_s7 = smov 22  }
  0x1b   :  { %5631 = sst [smem:[#allocation68_spill]] %s5158_s20 }
  0x1c   :  { %s5178_s20 = sld [smem:[%s5610_s0 + %s5029_s15]]   ;;  %s5033_s15 = smov 23  }
  0x1d   :  { %s5183_s6 = sld [smem:[%s5610_s0 + %s5030_s22]]   ;;  %s5034_s22 = smov 24  }
  0x1e   :  { %s5193_s24 = sld [smem:[%s5610_s0 + %s5032_s7]]   ;;  %s5036_s7 = smov 26  }
  0x1f   :  { %5632 = sst [smem:[#allocation69_spill]] %s5168_s4 }
  0x20   :  { %s5188_s4 = sld [smem:[%s5610_s0 + %s5031_s28]]   ;;  %s5035_s28 = smov 25  }
  0x21   :  { %s5203_s14 = sld [smem:[%s5610_s0 + %s5034_s22]]   ;;  %s5038_s22 = smov 28  }
  0x22   :  { %5633 = sst [smem:[#allocation70_spill]] %s5178_s20 }
  0x23   :  { %s5198_s20 = sld [smem:[%s5610_s0 + %s5033_s15]]   ;;  %s5037_s15 = smov 27  }
  0x24   :  { %s5213_s3 = sld [smem:[%s5610_s0 + %s5036_s7]]   ;;  %s5040_s7 = smov 30  }
  0x25   :  { %s5223_s25 = sld [smem:[%s5610_s0 + %s5038_s22]]  }
  0x26   :  { %5634 = sst [smem:[#allocation71_spill]] %s5188_s4 }
  0x27   :  { %s5208_s4 = sld [smem:[%s5610_s0 + %s5035_s28]]   ;;  %s5039_s28 = smov 29  }
  0x28   :  { %s5233_s17 = sld [smem:[%s5610_s0 + %s5040_s7]]  }
  0x29   :  { %5635 = sst [smem:[#allocation72_spill]] %s5198_s20 }
  0x2a   :  { %s5218_s20 = sld [smem:[%s5610_s0 + %s5037_s15]]  }
  0x2d   :  { %5636 = sst [smem:[#allocation73_spill]] %s5208_s4 }
  0x2e   :  { %s5228_s4 = sld [smem:[%s5610_s0 + %s5039_s28]]  }
  0x2f   :  { %66 = vsyncpa [#allocation3], 0 }
  0x30   :  { %67 = vsyncpa [#allocation5], 0 }
  0x31   :  { %68 = vsyncpa [#allocation8], 0 }
  0x32   :  { %69 = vsyncpa [#allocation11], 0 }
  0x33   :  { %70 = vsyncpa [#allocation14], 0 }
  0x34   :  { %71 = vsyncpa [#allocation17], 0 }
  0x35   :  { %72 = vsyncpa [#allocation20], 0 }
  0x36   :  { %73 = vsyncpa [#allocation23], 0 }
  0x37   :  { %74 = vsyncpa [#allocation26], 0 }
  0x38   :  { %75 = vsyncpa [#allocation29], 0 }
  0x39   :  { %76 = vsyncpa [#allocation32], 0 }
  0x3a   :  { %77 = vsyncpa [#allocation35], 0 }
  0x3b   :  { %78 = vsyncpa [#allocation38], 0 }
  0x3c   :  { %79 = vsyncpa [#allocation41], 0 }
  0x3d   :  { %80 = vsyncpa [#allocation44], 0  ;;  %s5041_s0 = smov [#allocation4]   ;;  %s5042_s16 = smov [#allocation7]  }
  0x3e   :  { %s99_s15 = sshll.u32 %s5041_s0, 4  ;;  %s119_s18 = sshll.u32 %s5042_s16, 4  ;;  %s100_s15 = int_to_ptr.vmem [resolvable:$true] %s99_s15  ;;  %s120_s18 = int_to_ptr.vmem [resolvable:$true] %s119_s18 }
  0x3f   :  { %s4343_s22 = scalar_lea.hbm %s5093_s13, 128 }
  0x40   :  { %p4344_p0 = scmp.ne.s32.totalorder %s5093_s13, %s4343_s22  ;;  %p4347_p1 = scmp.lt.u32.totalorder %s4343_s22, %s5093_s13 }
  0x42   :  { %p4349_p2 = pnand %p4347_p1, %p4344_p0 }
  0x44   :  { %4352 = shalt.err (!%p4349_p2)
}
  0x45   :  { %s4353_s23 = scalar_lea.vmem %s100_s15, 128  ;;  %p4358_p4 = scmp.lt.s32.totalorder %s100_s15, %s100_s15 }
  0x46   :  { %p4354_p3 = scmp.ne.s32.totalorder %s100_s15, %s4353_s23  ;;  %p4359_p5 = scmp.lt.s32.totalorder %s4353_s23, %s4353_s23 }
  0x48   :  { %p4360_p6 = por %p4359_p5, %p4358_p4 }
  0x4a   :  { %p4361_p7 = pnand %p4360_p6, %p4354_p3 }
  0x4c   :  { %4364 = shalt.err (!%p4361_p7)
}
  0x4d   :  { %102 = dma.hbm_to_vmem [thread:$0]  %s5093_s13, 128, %s100_s15, [#allocation5]  }
  0x4e   :  { %s4365_s26 = scalar_lea.hbm %s5103_s21, 32 }
  0x4f   :  { %p4366_p8 = scmp.ne.s32.totalorder %s5103_s21, %s4365_s26  ;;  %p4369_p9 = scmp.lt.u32.totalorder %s4365_s26, %s5103_s21 }
  0x51   :  { %p4371_p10 = pnand %p4369_p9, %p4366_p8 }
  0x53   :  { %4374 = shalt.err (!%p4371_p10)
}
  0x54   :  { %s4375_s28 = scalar_lea.vmem %s120_s18, 32  ;;  %p4380_p12 = scmp.lt.s32.totalorder %s120_s18, %s120_s18 }
  0x55   :  { %p4376_p11 = scmp.ne.s32.totalorder %s120_s18, %s4375_s28  ;;  %p4381_p13 = scmp.lt.s32.totalorder %s4375_s28, %s4375_s28 }
  0x57   :  { %p4382_p0 = por %p4381_p13, %p4380_p12 }
  0x59   :  { %p4383_p1 = pnand %p4382_p0, %p4376_p11 }
  0x5b   :  { %4386 = shalt.err (!%p4383_p1)
}
  0x5c   :  { %122 = dma.hbm_to_vmem [thread:$0]  %s5103_s21, 32, %s120_s18, [#allocation8]  }
  0x5d   :  { %s5043_s1 = smov [#allocation10]   ;;  %s5044_s13 = smov [#allocation13]  }
  0x5e   :  { %s140_s2 = sshll.u32 %s5043_s1, 4  ;;  %s165_s7 = sshll.u32 %s5044_s13, 4  ;;  %s141_s2 = int_to_ptr.vmem [resolvable:$true] %s140_s2  ;;  %s5243_s7 = int_to_ptr.vmem [resolvable:$true] %s165_s7 }
  0x5f   :  { %s4387_s10 = scalar_lea.hbm %s5113_s29, 1024 }
  0x60   :  { %p4388_p2 = scmp.ne.s32.totalorder %s5113_s29, %s4387_s10  ;;  %p4391_p3 = scmp.lt.u32.totalorder %s4387_s10, %s5113_s29 }
  0x62   :  { %p4393_p4 = pnand %p4391_p3, %p4388_p2 }
  0x64   :  { %4396 = shalt.err (!%p4393_p4)
}
  0x65   :  { %s4397_s11 = scalar_lea.vmem %s141_s2, 1024  ;;  %p4402_p6 = scmp.lt.s32.totalorder %s141_s2, %s141_s2 }
  0x66   :  { %p4398_p5 = scmp.ne.s32.totalorder %s141_s2, %s4397_s11  ;;  %p4403_p7 = scmp.lt.s32.totalorder %s4397_s11, %s4397_s11 }
  0x68   :  { %p4404_p8 = por %p4403_p7, %p4402_p6 }
  0x6a   :  { %p4405_p9 = pnand %p4404_p8, %p4398_p5 }
  0x6c   :  { %4408 = shalt.err (!%p4405_p9)
}
  0x6d   :  { %s5045_s21 = smov 64   ;;  %s5046_s0 = smov 4  }
  0x6e   :  { %146 = dma.hbm_to_vmem [thread:$0]  %s5113_s29, 1024, %s141_s2, [#allocation11], %s5045_s21, %s5045_s21, %s5046_s0  }
  0x6f   :  { %s4409_s15 = scalar_lea.hbm %s5123_s8, 16 }
  0x70   :  { %p4410_p10 = scmp.ne.s32.totalorder %s5123_s8, %s4409_s15  ;;  %p4413_p11 = scmp.lt.u32.totalorder %s4409_s15, %s5123_s8 }
  0x72   :  { %p4415_p12 = pnand %p4413_p11, %p4410_p10 }
  0x74   :  { %4418 = shalt.err (!%p4415_p12)
}
  0x75   :  { %s4419_s16 = scalar_lea.vmem %s5243_s7, 16  ;;  %s4423_s18 = scalar_lea.vmem %s5243_s7, 32 }
  0x76   :  { %p4420_p13 = scmp.ne.s32.totalorder %s5243_s7, %s4419_s16  ;;  %p4424_p0 = scmp.lt.s32.totalorder %s5243_s7, %s5243_s7 }
  0x77   :  { %p4425_p1 = scmp.lt.s32.totalorder %s4423_s18, %s4419_s16 }
  0x79   :  { %p4426_p2 = por %p4425_p1, %p4424_p0 }
  0x7b   :  { %p4427_p3 = pnand %p4426_p2, %p4420_p13 }
  0x7d   :  { %4430 = shalt.err (!%p4427_p3)
}
  0x7e   :  { %168 = dma.hbm_to_vmem [thread:$0]  %s5123_s8, 16, %s5243_s7, [#allocation14]  }
  0x7f   :  { %s5047_s29 = smov [#allocation16]   ;;  %s5048_s23 = smov [#allocation19]  }
  0x80   :  { %s186_s22 = sshll.u32 %s5047_s29, 4  ;;  %s208_s26 = sshll.u32 %s5048_s23, 4  ;;  %s187_s22 = int_to_ptr.vmem [resolvable:$true] %s186_s22  ;;  %s5262_s26 = int_to_ptr.vmem [resolvable:$true] %s208_s26 }
  0x81   :  { %s4431_s28 = scalar_lea.hbm %s5133_s19, 2048 }
  0x82   :  { %p4432_p4 = scmp.ne.s32.totalorder %s5133_s19, %s4431_s28  ;;  %p4435_p5 = scmp.lt.u32.totalorder %s4431_s28, %s5133_s19 }
  0x84   :  { %p4437_p6 = pnand %p4435_p5, %p4432_p4 }
  0x86   :  { %4440 = shalt.err (!%p4437_p6)
}
  0x87   :  { %s4441_s1 = scalar_lea.vmem %s187_s22, 2048  ;;  %p4446_p8 = scmp.lt.s32.totalorder %s187_s22, %s187_s22 }
  0x88   :  { %p4442_p7 = scmp.ne.s32.totalorder %s187_s22, %s4441_s1  ;;  %p4447_p9 = scmp.lt.s32.totalorder %s4441_s1, %s4441_s1 }
  0x8a   :  { %p4448_p10 = por %p4447_p9, %p4446_p8 }
  0x8c   :  { %p4449_p11 = pnand %p4448_p10, %p4442_p7 }
  0x8e   :  { %4452 = shalt.err (!%p4449_p11)
}
  0x8f   :  { %s5049_s8 = smov 128   ;;  %s5050_s2 = smov 8  }
  0x90   :  { %192 = dma.hbm_to_vmem [thread:$0]  %s5133_s19, 2048, %s187_s22, [#allocation17], %s5049_s8, %s5049_s8, %s5050_s2  }
  0x91   :  { %s4453_s13 = scalar_lea.hbm %s5143_s30, 1024 }
  0x92   :  { %p4454_p12 = scmp.ne.s32.totalorder %s5143_s30, %s4453_s13  ;;  %p4457_p13 = scmp.lt.u32.totalorder %s4453_s13, %s5143_s30 }
  0x94   :  { %p4459_p0 = pnand %p4457_p13, %p4454_p12 }
  0x96   :  { %4462 = shalt.err (!%p4459_p0)
}
  0x97   :  { %s4463_s7 = scalar_lea.vmem %s5262_s26, 1024  ;;  %p4468_p2 = scmp.lt.s32.totalorder %s5262_s26, %s5262_s26 }
  0x98   :  { %p4464_p1 = scmp.ne.s32.totalorder %s5262_s26, %s4463_s7  ;;  %p4469_p3 = scmp.lt.s32.totalorder %s4463_s7, %s4463_s7 }
  0x9a   :  { %p4470_p4 = por %p4469_p3, %p4468_p2 }
  0x9c   :  { %p4471_p5 = pnand %p4470_p4, %p4464_p1 }
  0x9e   :  { %4474 = shalt.err (!%p4471_p5)
}
  0x9f   :  { %214 = dma.hbm_to_vmem [thread:$0]  %s5143_s30, 1024, %s5262_s26, [#allocation20], %s5045_s21, %s5045_s21, %s5046_s0  }
  0xa0   :  { %s5051_s19 = smov [#allocation22]   ;;  %s5052_s11 = smov [#allocation25]  }
  0xa1   :  { %s232_s10 = sshll.u32 %s5051_s19, 4  ;;  %s254_s15 = sshll.u32 %s5052_s11, 4  ;;  %s233_s10 = int_to_ptr.vmem [resolvable:$true] %s232_s10  ;;  %s5283_s15 = int_to_ptr.vmem [resolvable:$true] %s254_s15 }
  0xa2   :  { %s4475_s16 = scalar_lea.hbm %s5153_s12, 1024 }
  0xa3   :  { %p4476_p6 = scmp.ne.s32.totalorder %s5153_s12, %s4475_s16  ;;  %p4479_p7 = scmp.lt.u32.totalorder %s4475_s16, %s5153_s12 }
  0xa5   :  { %p4481_p8 = pnand %p4479_p7, %p4476_p6 }
  0xa7   :  { %4484 = shalt.err (!%p4481_p8)
}
  0xa8   :  { %s4485_s18 = scalar_lea.vmem %s233_s10, 1024  ;;  %p4490_p10 = scmp.lt.s32.totalorder %s233_s10, %s233_s10 }
  0xa9   :  { %p4486_p9 = scmp.ne.s32.totalorder %s233_s10, %s4485_s18  ;;  %p4491_p11 = scmp.lt.s32.totalorder %s4485_s18, %s4485_s18 }
  0xab   :  { %p4492_p12 = por %p4491_p11, %p4490_p10 }
  0xad   :  { %p4493_p13 = pnand %p4492_p12, %p4486_p9 }
  0xaf   :  { %4496 = shalt.err (!%p4493_p13)
}
  0xb0   :  { %238 = dma.hbm_to_vmem [thread:$0]  %s5153_s12, 1024, %s233_s10, [#allocation23], %s5045_s21, %s5045_s21, %s5046_s0  }
  0xb1   :  { %s4497_s30 = scalar_lea.hbm %s5163_s27, 2048 }
  0xb2   :  { %p4498_p0 = scmp.ne.s32.totalorder %s5163_s27, %s4497_s30  ;;  %p4501_p1 = scmp.lt.u32.totalorder %s4497_s30, %s5163_s27 }
  0xb4   :  { %p4503_p2 = pnand %p4501_p1, %p4498_p0 }
  0xb6   :  { %4506 = shalt.err (!%p4503_p2)
}
  0xb7   :  { %s4507_s29 = scalar_lea.vmem %s5283_s15, 2048  ;;  %p4512_p4 = scmp.lt.s32.totalorder %s5283_s15, %s5283_s15 }
  0xb8   :  { %p4508_p3 = scmp.ne.s32.totalorder %s5283_s15, %s4507_s29  ;;  %p4513_p5 = scmp.lt.s32.totalorder %s4507_s29, %s4507_s29 }
  0xba   :  { %p4514_p6 = por %p4513_p5, %p4512_p4 }
  0xbc   :  { %p4515_p7 = pnand %p4514_p6, %p4508_p3 }
  0xbe   :  { %4518 = shalt.err (!%p4515_p7)
}
  0xbf   :  { %260 = dma.hbm_to_vmem [thread:$0]  %s5163_s27, 2048, %s5283_s15, [#allocation26], %s5049_s8, %s5049_s8, %s5050_s2  }
  0xc0   :  { %s5053_s12 = smov [#allocation28]   ;;  %s5054_s23 = smov [#allocation31]  }
  0xc1   :  { %s279_s22 = sshll.u32 %s5053_s12, 4  ;;  %s300_s26 = sshll.u32 %s5054_s23, 4  ;;  %s280_s22 = int_to_ptr.vmem [resolvable:$true] %s279_s22  ;;  %s5304_s26 = int_to_ptr.vmem [resolvable:$true] %s300_s26 }
  0xc2   :  { %s4519_s28 = scalar_lea.hbm %s5173_s5, 32 }
  0xc3   :  { %p4520_p8 = scmp.ne.s32.totalorder %s5173_s5, %s4519_s28  ;;  %p4523_p9 = scmp.lt.u32.totalorder %s4519_s28, %s5173_s5 }
  0xc5   :  { %p4525_p10 = pnand %p4523_p9, %p4520_p8 }
  0xc7   :  { %4528 = shalt.err (!%p4525_p10)
}
  0xc8   :  { %s4529_s1 = scalar_lea.vmem %s280_s22, 32  ;;  %p4534_p12 = scmp.lt.s32.totalorder %s280_s22, %s280_s22 }
  0xc9   :  { %p4530_p11 = scmp.ne.s32.totalorder %s280_s22, %s4529_s1  ;;  %p4535_p13 = scmp.lt.s32.totalorder %s4529_s1, %s4529_s1 }
  0xcb   :  { %p4536_p0 = por %p4535_p13, %p4534_p12 }
  0xcd   :  { %p4537_p1 = pnand %p4536_p0, %p4530_p11 }
  0xcf   :  { %4540 = shalt.err (!%p4537_p1)
}
  0xd0   :  { %282 = dma.hbm_to_vmem [thread:$0]  %s5173_s5, 32, %s280_s22, [#allocation29]  }
  0xd1   :  { %s4541_s27 = scalar_lea.hbm %s5183_s6, 1024 }
  0xd2   :  { %p4542_p2 = scmp.ne.s32.totalorder %s5183_s6, %s4541_s27  ;;  %p4545_p3 = scmp.lt.u32.totalorder %s4541_s27, %s5183_s6 }
  0xd4   :  { %p4547_p4 = pnand %p4545_p3, %p4542_p2 }
  0xd6   :  { %4550 = shalt.err (!%p4547_p4)
}
  0xd7   :  { %s4551_s13 = scalar_lea.vmem %s5304_s26, 1024  ;;  %p4556_p6 = scmp.lt.s32.totalorder %s5304_s26, %s5304_s26 }
  0xd8   :  { %p4552_p5 = scmp.ne.s32.totalorder %s5304_s26, %s4551_s13  ;;  %p4557_p7 = scmp.lt.s32.totalorder %s4551_s13, %s4551_s13 }
  0xda   :  { %p4558_p8 = por %p4557_p7, %p4556_p6 }
  0xdc   :  { %p4559_p9 = pnand %p4558_p8, %p4552_p5 }
  0xde   :  { %4562 = shalt.err (!%p4559_p9)
}
  0xdf   :  { %306 = dma.hbm_to_vmem [thread:$0]  %s5183_s6, 1024, %s5304_s26, [#allocation32], %s5045_s21, %s5045_s21, %s5046_s0  }
  0xe0   :  { %s5055_s5 = smov [#allocation34]   ;;  %s5056_s19 = smov [#allocation37]  }
  0xe1   :  { %s325_s7 = sshll.u32 %s5055_s5, 4  ;;  %s346_s10 = sshll.u32 %s5056_s19, 4  ;;  %s326_s7 = int_to_ptr.vmem [resolvable:$true] %s325_s7  ;;  %s5322_s10 = int_to_ptr.vmem [resolvable:$true] %s346_s10 }
  0xe2   :  { %s4563_s11 = scalar_lea.hbm %s5193_s24, 16 }
  0xe3   :  { %p4564_p10 = scmp.ne.s32.totalorder %s5193_s24, %s4563_s11  ;;  %p4567_p11 = scmp.lt.u32.totalorder %s4563_s11, %s5193_s24 }
  0xe5   :  { %p4569_p12 = pnand %p4567_p11, %p4564_p10 }
  0xe7   :  { %4572 = shalt.err (!%p4569_p12)
}
  0xe8   :  { %s4573_s15 = scalar_lea.vmem %s326_s7, 16  ;;  %s4577_s16 = scalar_lea.vmem %s326_s7, 32 }
  0xe9   :  { %p4574_p13 = scmp.ne.s32.totalorder %s326_s7, %s4573_s15  ;;  %p4578_p0 = scmp.lt.s32.totalorder %s326_s7, %s326_s7 }
  0xea   :  { %p4579_p1 = scmp.lt.s32.totalorder %s4577_s16, %s4573_s15 }
  0xec   :  { %p4580_p2 = por %p4579_p1, %p4578_p0 }
  0xee   :  { %p4581_p3 = pnand %p4580_p2, %p4574_p13 }
  0xf0   :  { %4584 = shalt.err (!%p4581_p3)
}
  0xf1   :  { %328 = dma.hbm_to_vmem [thread:$0]  %s5193_s24, 16, %s326_s7, [#allocation35]  }
  0xf2   :  { %s4585_s6 = scalar_lea.hbm %s5203_s14, 2048 }
  0xf3   :  { %p4586_p4 = scmp.ne.s32.totalorder %s5203_s14, %s4585_s6  ;;  %p4589_p5 = scmp.lt.u32.totalorder %s4585_s6, %s5203_s14 }
  0xf5   :  { %p4591_p6 = pnand %p4589_p5, %p4586_p4 }
  0xf7   :  { %4594 = shalt.err (!%p4591_p6)
}
  0xf8   :  { %s4595_s18 = scalar_lea.vmem %s5322_s10, 2048  ;;  %p4600_p8 = scmp.lt.s32.totalorder %s5322_s10, %s5322_s10 }
  0xf9   :  { %p4596_p7 = scmp.ne.s32.totalorder %s5322_s10, %s4595_s18  ;;  %p4601_p9 = scmp.lt.s32.totalorder %s4595_s18, %s4595_s18 }
  0xfb   :  { %p4602_p10 = por %p4601_p9, %p4600_p8 }
  0xfd   :  { %p4603_p11 = pnand %p4602_p10, %p4596_p7 }
  0xff   :  { %4606 = shalt.err (!%p4603_p11)
}
 0x100   :  { %352 = dma.hbm_to_vmem [thread:$0]  %s5203_s14, 2048, %s5322_s10, [#allocation38], %s5049_s8, %s5049_s8, %s5050_s2  }
 0x101   :  { %s5057_s24 = smov [#allocation40]   ;;  %s5058_s29 = smov [#allocation43]  }
 0x102   :  { %s368_s30 = sshll.u32 %s5057_s24, 4  ;;  %s392_s12 = sshll.u32 %s5058_s29, 4  ;;  %s369_s30 = int_to_ptr.vmem [resolvable:$true] %s368_s30  ;;  %s5340_s12 = int_to_ptr.vmem [resolvable:$true] %s392_s12 }
 0x103   :  { %s4607_s22 = scalar_lea.hbm %s5213_s3, 1024 }
 0x104   :  { %p4608_p12 = scmp.ne.s32.totalorder %s5213_s3, %s4607_s22  ;;  %p4611_p13 = scmp.lt.u32.totalorder %s4607_s22, %s5213_s3 }
 0x106   :  { %p4613_p0 = pnand %p4611_p13, %p4608_p12 }
 0x108   :  { %4616 = shalt.err (!%p4613_p0)
}
 0x109   :  { %s4617_s23 = scalar_lea.vmem %s369_s30, 1024  ;;  %p4622_p2 = scmp.lt.s32.totalorder %s369_s30, %s369_s30 }
 0x10a   :  { %p4618_p1 = scmp.ne.s32.totalorder %s369_s30, %s4617_s23  ;;  %p4623_p3 = scmp.lt.s32.totalorder %s4617_s23, %s4617_s23 }
 0x10c   :  { %p4624_p4 = por %p4623_p3, %p4622_p2 }
 0x10e   :  { %p4625_p5 = pnand %p4624_p4, %p4618_p1 }
 0x110   :  { %4628 = shalt.err (!%p4625_p5)
}
 0x111   :  { %374 = dma.hbm_to_vmem [thread:$0]  %s5213_s3, 1024, %s369_s30, [#allocation41], %s5045_s21, %s5045_s21, %s5046_s0  }
 0x112   :  { %s4629_s14 = scalar_lea.hbm %s5223_s25, 1024 }
 0x113   :  { %p4630_p6 = scmp.ne.s32.totalorder %s5223_s25, %s4629_s14  ;;  %p4633_p7 = scmp.lt.u32.totalorder %s4629_s14, %s5223_s25 }
 0x115   :  { %p4635_p8 = pnand %p4633_p7, %p4630_p6 }
 0x117   :  { %4638 = shalt.err (!%p4635_p8)
}
 0x118   :  { %s4639_s26 = scalar_lea.vmem %s5340_s12, 1024  ;;  %p4644_p10 = scmp.lt.s32.totalorder %s5340_s12, %s5340_s12 }
 0x119   :  { %p4640_p9 = scmp.ne.s32.totalorder %s5340_s12, %s4639_s26  ;;  %p4645_p11 = scmp.lt.s32.totalorder %s4639_s26, %s4639_s26 }
 0x11b   :  { %p4646_p12 = por %p4645_p11, %p4644_p10 }
 0x11d   :  { %p4647_p13 = pnand %p4646_p12, %p4640_p9 }
 0x11f   :  { %4650 = shalt.err (!%p4647_p13)
}
 0x120   :  { %398 = dma.hbm_to_vmem [thread:$0]  %s5223_s25, 1024, %s5340_s12, [#allocation44], %s5045_s21, %s5045_s21, %s5046_s0  }
 0x121   :  { %s5059_s3 = smov [#allocation2]   ;;  %s5060_s1 = smov [#allocation6]  }
 0x122   :  { %s89_s28 = sshll.u32 %s5059_s3, 4  ;;  %s109_s27 = sshll.u32 %s5060_s1, 4  ;;  %s90_s28 = int_to_ptr.vmem [resolvable:$true] %s89_s28  ;;  %s110_s27 = int_to_ptr.vmem [resolvable:$true] %s109_s27 }
 0x123   :  { %s4651_s13 = scalar_lea.hbm %s5088_s9, 128 }
 0x124   :  { %p4652_p0 = scmp.ne.s32.totalorder %s5088_s9, %s4651_s13  ;;  %p4655_p1 = scmp.lt.u32.totalorder %s4651_s13, %s5088_s9 }
 0x126   :  { %p4657_p2 = pnand %p4655_p1, %p4652_p0 }
 0x128   :  { %4660 = shalt.err (!%p4657_p2)
}
 0x129   :  { %s4661_s5 = scalar_lea.vmem %s90_s28, 128  ;;  %p4666_p4 = scmp.lt.s32.totalorder %s90_s28, %s90_s28 }
 0x12a   :  { %p4662_p3 = scmp.ne.s32.totalorder %s90_s28, %s4661_s5  ;;  %p4667_p5 = scmp.lt.s32.totalorder %s4661_s5, %s4661_s5 }
 0x12c   :  { %p4668_p6 = por %p4667_p5, %p4666_p4 }
 0x12e   :  { %p4669_p7 = pnand %p4668_p6, %p4662_p3 }
 0x130   :  { %4672 = shalt.err (!%p4669_p7)
}
 0x131   :  { %s5637_s25 = sld [smem:[#allocation62_spill]] }
 0x132   :  { %92 = dma.hbm_to_vmem [thread:$0]  %s5088_s9, 128, %s90_s28, [#allocation3]  }
 0x137   :  { %s4673_s7 = scalar_lea.hbm %s5637_s25, 128 }
 0x138   :  { %p4674_p8 = scmp.ne.s32.totalorder %s5637_s25, %s4673_s7  ;;  %p4677_p9 = scmp.lt.u32.totalorder %s4673_s7, %s5637_s25 }
 0x13a   :  { %p4679_p10 = pnand %p4677_p9, %p4674_p8 }
 0x13c   :  { %4682 = shalt.err (!%p4679_p10)
}
 0x13d   :  { %s4683_s19 = scalar_lea.vmem %s110_s27, 128  ;;  %p4688_p12 = scmp.lt.s32.totalorder %s110_s27, %s110_s27 }
 0x13e   :  { %p4684_p11 = scmp.ne.s32.totalorder %s110_s27, %s4683_s19  ;;  %p4689_p13 = scmp.lt.s32.totalorder %s4683_s19, %s4683_s19 }
 0x140   :  { %p4690_p0 = por %p4689_p13, %p4688_p12 }
 0x142   :  { %p4691_p1 = pnand %p4690_p0, %p4684_p11 }
 0x144   :  { %4694 = shalt.err (!%p4691_p1)
}
 0x145   :  { %s5638_s10 = sld [smem:[#allocation63_spill]]  ;;  %s5061_s11 = smov [#allocation9]  }
 0x146   :  { %112 = dma.hbm_to_vmem [thread:$0]  %s5637_s25, 128, %s110_s27, [#allocation5]  }
 0x147   :  { %s128_s15 = sshll.u32 %s5061_s11, 4  ;;  %s5062_s9 = smov [#allocation12]   ;;  %s129_s15 = int_to_ptr.vmem [resolvable:$true] %s128_s15 }
 0x148   :  { %s152_s16 = sshll.u32 %s5062_s9, 4  ;;  %s5369_s16 = int_to_ptr.vmem [resolvable:$true] %s152_s16 }
 0x14b   :  { %s4695_s6 = scalar_lea.hbm %s5638_s10, 1024 }
 0x14c   :  { %p4696_p2 = scmp.ne.s32.totalorder %s5638_s10, %s4695_s6  ;;  %p4699_p3 = scmp.lt.u32.totalorder %s4695_s6, %s5638_s10 }
 0x14e   :  { %p4701_p4 = pnand %p4699_p3, %p4696_p2 }
 0x150   :  { %4704 = shalt.err (!%p4701_p4)
}
 0x151   :  { %s4705_s18 = scalar_lea.vmem %s129_s15, 1024  ;;  %p4710_p6 = scmp.lt.s32.totalorder %s129_s15, %s129_s15 }
 0x152   :  { %p4706_p5 = scmp.ne.s32.totalorder %s129_s15, %s4705_s18  ;;  %p4711_p7 = scmp.lt.s32.totalorder %s4705_s18, %s4705_s18 }
 0x154   :  { %p4712_p8 = por %p4711_p7, %p4710_p6 }
 0x156   :  { %p4713_p9 = pnand %p4712_p8, %p4706_p5 }
 0x158   :  { %4716 = shalt.err (!%p4713_p9)
}
 0x159   :  { %s5639_s24 = sld [smem:[#allocation64_spill]] }
 0x15a   :  { %134 = dma.hbm_to_vmem [thread:$0]  %s5638_s10, 1024, %s129_s15, [#allocation8], %s5045_s21, %s5045_s21, %s5046_s0  }
 0x15f   :  { %s4717_s30 = scalar_lea.hbm %s5639_s24, 1024 }
 0x160   :  { %p4718_p10 = scmp.ne.s32.totalorder %s5639_s24, %s4717_s30  ;;  %p4721_p11 = scmp.lt.u32.totalorder %s4717_s30, %s5639_s24 }
 0x162   :  { %p4723_p12 = pnand %p4721_p11, %p4718_p10 }
 0x164   :  { %4726 = shalt.err (!%p4723_p12)
}
 0x165   :  { %s4727_s29 = scalar_lea.vmem %s5369_s16, 1024  ;;  %p4732_p0 = scmp.lt.s32.totalorder %s5369_s16, %s5369_s16 }
 0x166   :  { %p4728_p13 = scmp.ne.s32.totalorder %s5369_s16, %s4727_s29  ;;  %p4733_p1 = scmp.lt.s32.totalorder %s4727_s29, %s4727_s29 }
 0x168   :  { %p4734_p2 = por %p4733_p1, %p4732_p0 }
 0x16a   :  { %p4735_p3 = pnand %p4734_p2, %p4728_p13 }
 0x16c   :  { %4738 = shalt.err (!%p4735_p3)
}
 0x16d   :  { %s5640_s12 = sld [smem:[#allocation65_spill]]  ;;  %s5063_s22 = smov [#allocation15]  }
 0x16e   :  { %158 = dma.hbm_to_vmem [thread:$0]  %s5639_s24, 1024, %s5369_s16, [#allocation11], %s5045_s21, %s5045_s21, %s5046_s0  }
 0x16f   :  { %s174_s23 = sshll.u32 %s5063_s22, 4  ;;  %s5064_s14 = smov [#allocation18]   ;;  %s175_s23 = int_to_ptr.vmem [resolvable:$true] %s174_s23 }
 0x170   :  { %s199_s26 = sshll.u32 %s5064_s14, 4  ;;  %s200_s26 = int_to_ptr.vmem [resolvable:$true] %s199_s26 }
 0x173   :  { %s4739_s3 = scalar_lea.hbm %s5640_s12, 2048 }
 0x174   :  { %p4740_p4 = scmp.ne.s32.totalorder %s5640_s12, %s4739_s3  ;;  %p4743_p5 = scmp.lt.u32.totalorder %s4739_s3, %s5640_s12 }
 0x176   :  { %p4745_p6 = pnand %p4743_p5, %p4740_p4 }
 0x178   :  { %4748 = shalt.err (!%p4745_p6)
}
 0x179   :  { %s4749_s28 = scalar_lea.vmem %s175_s23, 2048  ;;  %p4754_p8 = scmp.lt.s32.totalorder %s175_s23, %s175_s23 }
 0x17a   :  { %p4750_p7 = scmp.ne.s32.totalorder %s175_s23, %s4749_s28  ;;  %p4755_p9 = scmp.lt.s32.totalorder %s4749_s28, %s4749_s28 }
 0x17c   :  { %p4756_p10 = por %p4755_p9, %p4754_p8 }
 0x17e   :  { %p4757_p11 = pnand %p4756_p10, %p4750_p7 }
 0x180   :  { %4760 = shalt.err (!%p4757_p11)
}
 0x181   :  { %s5641_s1 = sld [smem:[#allocation66_spill]] }
 0x182   :  { %180 = dma.hbm_to_vmem [thread:$0]  %s5640_s12, 2048, %s175_s23, [#allocation14], %s5049_s8, %s5049_s8, %s5050_s2  }
 0x187   :  { %s4761_s27 = scalar_lea.hbm %s5641_s1, 32 }
 0x188   :  { %p4762_p12 = scmp.ne.s32.totalorder %s5641_s1, %s4761_s27  ;;  %p4765_p13 = scmp.lt.u32.totalorder %s4761_s27, %s5641_s1 }
 0x18a   :  { %p4767_p0 = pnand %p4765_p13, %p4762_p12 }
 0x18c   :  { %4770 = shalt.err (!%p4767_p0)
}
 0x18d   :  { %s4771_s13 = scalar_lea.vmem %s200_s26, 32  ;;  %p4776_p2 = scmp.lt.s32.totalorder %s200_s26, %s200_s26 }
 0x18e   :  { %p4772_p1 = scmp.ne.s32.totalorder %s200_s26, %s4771_s13  ;;  %p4777_p3 = scmp.lt.s32.totalorder %s4771_s13, %s4771_s13 }
 0x190   :  { %p4778_p4 = por %p4777_p3, %p4776_p2 }
 0x192   :  { %p4779_p5 = pnand %p4778_p4, %p4772_p1 }
 0x194   :  { %4782 = shalt.err (!%p4779_p5)
}
 0x195   :  { %s5642_s5 = sld [smem:[#allocation67_spill]]  ;;  %s5065_s25 = smov [#allocation21]  }
 0x196   :  { %202 = dma.hbm_to_vmem [thread:$0]  %s5641_s1, 32, %s200_s26, [#allocation17]  }
 0x197   :  { %s220_s7 = sshll.u32 %s5065_s25, 4  ;;  %s5066_s19 = smov [#allocation24]   ;;  %s221_s7 = int_to_ptr.vmem [resolvable:$true] %s220_s7 }
 0x198   :  { %s245_s10 = sshll.u32 %s5066_s19, 4  ;;  %s246_s10 = int_to_ptr.vmem [resolvable:$true] %s245_s10 }
 0x19b   :  { %s4783_s11 = scalar_lea.hbm %s5642_s5, 1024 }
 0x19c   :  { %p4784_p6 = scmp.ne.s32.totalorder %s5642_s5, %s4783_s11  ;;  %p4787_p7 = scmp.lt.u32.totalorder %s4783_s11, %s5642_s5 }
 0x19e   :  { %p4789_p8 = pnand %p4787_p7, %p4784_p6 }
 0x1a0   :  { %4792 = shalt.err (!%p4789_p8)
}
 0x1a1   :  { %s4793_s15 = scalar_lea.vmem %s221_s7, 1024  ;;  %p4798_p10 = scmp.lt.s32.totalorder %s221_s7, %s221_s7 }
 0x1a2   :  { %p4794_p9 = scmp.ne.s32.totalorder %s221_s7, %s4793_s15  ;;  %p4799_p11 = scmp.lt.s32.totalorder %s4793_s15, %s4793_s15 }
 0x1a4   :  { %p4800_p12 = por %p4799_p11, %p4798_p10 }
 0x1a6   :  { %p4801_p13 = pnand %p4800_p12, %p4794_p9 }
 0x1a8   :  { %4804 = shalt.err (!%p4801_p13)
}
 0x1a9   :  { %s5643_s9 = sld [smem:[#allocation68_spill]] }
 0x1aa   :  { %226 = dma.hbm_to_vmem [thread:$0]  %s5642_s5, 1024, %s221_s7, [#allocation20], %s5045_s21, %s5045_s21, %s5046_s0  }
 0x1af   :  { %s4805_s16 = scalar_lea.hbm %s5643_s9, 16 }
 0x1b0   :  { %p4806_p0 = scmp.ne.s32.totalorder %s5643_s9, %s4805_s16  ;;  %p4809_p1 = scmp.lt.u32.totalorder %s4805_s16, %s5643_s9 }
 0x1b2   :  { %p4811_p2 = pnand %p4809_p1, %p4806_p0 }
 0x1b4   :  { %4814 = shalt.err (!%p4811_p2)
}
 0x1b5   :  { %s4815_s6 = scalar_lea.vmem %s246_s10, 16  ;;  %s4819_s18 = scalar_lea.vmem %s246_s10, 32 }
 0x1b6   :  { %p4816_p3 = scmp.ne.s32.totalorder %s246_s10, %s4815_s6  ;;  %p4820_p4 = scmp.lt.s32.totalorder %s246_s10, %s246_s10 }
 0x1b7   :  { %p4821_p5 = scmp.lt.s32.totalorder %s4819_s18, %s4815_s6 }
 0x1b9   :  { %p4822_p6 = por %p4821_p5, %p4820_p4 }
 0x1bb   :  { %p4823_p7 = pnand %p4822_p6, %p4816_p3 }
 0x1bd   :  { %4826 = shalt.err (!%p4823_p7)
}
 0x1be   :  { %s5644_s24 = sld [smem:[#allocation69_spill]]  ;;  %s5067_s30 = smov [#allocation27]  }
 0x1bf   :  { %248 = dma.hbm_to_vmem [thread:$0]  %s5643_s9, 16, %s246_s10, [#allocation23]  }
 0x1c0   :  { %s266_s29 = sshll.u32 %s5067_s30, 4  ;;  %s5068_s12 = smov [#allocation30]   ;;  %s267_s29 = int_to_ptr.vmem [resolvable:$true] %s266_s29 }
 0x1c1   :  { %s288_s22 = sshll.u32 %s5068_s12, 4  ;;  %s5412_s22 = int_to_ptr.vmem [resolvable:$true] %s288_s22 }
 0x1c4   :  { %s4827_s23 = scalar_lea.hbm %s5644_s24, 2048 }
 0x1c5   :  { %p4828_p8 = scmp.ne.s32.totalorder %s5644_s24, %s4827_s23  ;;  %p4831_p9 = scmp.lt.u32.totalorder %s4827_s23, %s5644_s24 }
 0x1c7   :  { %p4833_p10 = pnand %p4831_p9, %p4828_p8 }
 0x1c9   :  { %4836 = shalt.err (!%p4833_p10)
}
 0x1ca   :  { %s4837_s14 = scalar_lea.vmem %s267_s29, 2048  ;;  %p4842_p12 = scmp.lt.s32.totalorder %s267_s29, %s267_s29 }
 0x1cb   :  { %p4838_p11 = scmp.ne.s32.totalorder %s267_s29, %s4837_s14  ;;  %p4843_p13 = scmp.lt.s32.totalorder %s4837_s14, %s4837_s14 }
 0x1cd   :  { %p4844_p0 = por %p4843_p13, %p4842_p12 }
 0x1cf   :  { %p4845_p1 = pnand %p4844_p0, %p4838_p11 }
 0x1d1   :  { %4848 = shalt.err (!%p4845_p1)
}
 0x1d2   :  { %s5645_s26 = sld [smem:[#allocation70_spill]] }
 0x1d3   :  { %272 = dma.hbm_to_vmem [thread:$0]  %s5644_s24, 2048, %s267_s29, [#allocation26], %s5049_s8, %s5049_s8, %s5050_s2  }
 0x1d8   :  { %s4849_s3 = scalar_lea.hbm %s5645_s26, 1024 }
 0x1d9   :  { %p4850_p2 = scmp.ne.s32.totalorder %s5645_s26, %s4849_s3  ;;  %p4853_p3 = scmp.lt.u32.totalorder %s4849_s3, %s5645_s26 }
 0x1db   :  { %p4855_p4 = pnand %p4853_p3, %p4850_p2 }
 0x1dd   :  { %4858 = shalt.err (!%p4855_p4)
}
 0x1de   :  { %s4859_s28 = scalar_lea.vmem %s5412_s22, 1024  ;;  %p4864_p6 = scmp.lt.s32.totalorder %s5412_s22, %s5412_s22 }
 0x1df   :  { %p4860_p5 = scmp.ne.s32.totalorder %s5412_s22, %s4859_s28  ;;  %p4865_p7 = scmp.lt.s32.totalorder %s4859_s28, %s4859_s28 }
 0x1e1   :  { %p4866_p8 = por %p4865_p7, %p4864_p6 }
 0x1e3   :  { %p4867_p9 = pnand %p4866_p8, %p4860_p5 }
 0x1e5   :  { %4870 = shalt.err (!%p4867_p9)
}
 0x1e6   :  { %s5646_s1 = sld [smem:[#allocation71_spill]]  ;;  %s5069_s27 = smov [#allocation33]  }
 0x1e7   :  { %294 = dma.hbm_to_vmem [thread:$0]  %s5645_s26, 1024, %s5412_s22, [#allocation29], %s5045_s21, %s5045_s21, %s5046_s0  }
 0x1e8   :  { %s312_s13 = sshll.u32 %s5069_s27, 4  ;;  %s5070_s5 = smov [#allocation36]   ;;  %s313_s13 = int_to_ptr.vmem [resolvable:$true] %s312_s13 }
 0x1e9   :  { %s334_s25 = sshll.u32 %s5070_s5, 4  ;;  %s5433_s25 = int_to_ptr.vmem [resolvable:$true] %s334_s25 }
 0x1ec   :  { %s4871_s7 = scalar_lea.hbm %s5646_s1, 1024 }
 0x1ed   :  { %p4872_p10 = scmp.ne.s32.totalorder %s5646_s1, %s4871_s7  ;;  %p4875_p11 = scmp.lt.u32.totalorder %s4871_s7, %s5646_s1 }
 0x1ef   :  { %p4877_p12 = pnand %p4875_p11, %p4872_p10 }
 0x1f1   :  { %4880 = shalt.err (!%p4877_p12)
}
 0x1f2   :  { %s4881_s19 = scalar_lea.vmem %s313_s13, 1024  ;;  %p4886_p0 = scmp.lt.s32.totalorder %s313_s13, %s313_s13 }
 0x1f3   :  { %p4882_p13 = scmp.ne.s32.totalorder %s313_s13, %s4881_s19  ;;  %p4887_p1 = scmp.lt.s32.totalorder %s4881_s19, %s4881_s19 }
 0x1f5   :  { %p4888_p2 = por %p4887_p1, %p4886_p0 }
 0x1f7   :  { %p4889_p3 = pnand %p4888_p2, %p4882_p13 }
 0x1f9   :  { %4892 = shalt.err (!%p4889_p3)
}
 0x1fa   :  { %s5647_s10 = sld [smem:[#allocation72_spill]] }
 0x1fb   :  { %318 = dma.hbm_to_vmem [thread:$0]  %s5646_s1, 1024, %s313_s13, [#allocation32], %s5045_s21, %s5045_s21, %s5046_s0  }
 0x200   :  { %s4893_s11 = scalar_lea.hbm %s5647_s10, 2048 }
 0x201   :  { %p4894_p4 = scmp.ne.s32.totalorder %s5647_s10, %s4893_s11  ;;  %p4897_p5 = scmp.lt.u32.totalorder %s4893_s11, %s5647_s10 }
 0x203   :  { %p4899_p6 = pnand %p4897_p5, %p4894_p4 }
 0x205   :  { %4902 = shalt.err (!%p4899_p6)
}
 0x206   :  { %s4903_s15 = scalar_lea.vmem %s5433_s25, 2048  ;;  %p4908_p8 = scmp.lt.s32.totalorder %s5433_s25, %s5433_s25 }
 0x207   :  { %p4904_p7 = scmp.ne.s32.totalorder %s5433_s25, %s4903_s15  ;;  %p4909_p9 = scmp.lt.s32.totalorder %s4903_s15, %s4903_s15 }
 0x209   :  { %p4910_p10 = por %p4909_p9, %p4908_p8 }
 0x20b   :  { %p4911_p11 = pnand %p4910_p10, %p4904_p7 }
 0x20d   :  { %4914 = shalt.err (!%p4911_p11)
}
 0x20e   :  { %s5648_s9 = sld [smem:[#allocation73_spill]]  ;;  %s5071_s16 = smov [#allocation39]  }
 0x20f   :  { %340 = dma.hbm_to_vmem [thread:$0]  %s5647_s10, 2048, %s5433_s25, [#allocation35], %s5049_s8, %s5049_s8, %s5050_s2  }
 0x210   :  { %s359_s6 = sshll.u32 %s5071_s16, 4  ;;  %s5072_s18 = smov [#allocation42]   ;;  %s360_s6 = int_to_ptr.vmem [resolvable:$true] %s359_s6 }
 0x211   :  { %s380_s24 = sshll.u32 %s5072_s18, 4  ;;  %s5454_s24 = int_to_ptr.vmem [resolvable:$true] %s380_s24 }
 0x214   :  { %s4915_s30 = scalar_lea.hbm %s5648_s9, 32 }
 0x215   :  { %p4916_p12 = scmp.ne.s32.totalorder %s5648_s9, %s4915_s30  ;;  %p4919_p13 = scmp.lt.u32.totalorder %s4915_s30, %s5648_s9 }
 0x217   :  { %p4921_p0 = pnand %p4919_p13, %p4916_p12 }
 0x219   :  { %4924 = shalt.err (!%p4921_p0)
}
 0x21a   :  { %s4925_s29 = scalar_lea.vmem %s360_s6, 32  ;;  %p4930_p2 = scmp.lt.s32.totalorder %s360_s6, %s360_s6 }
 0x21b   :  { %p4926_p1 = scmp.ne.s32.totalorder %s360_s6, %s4925_s29  ;;  %p4931_p3 = scmp.lt.s32.totalorder %s4925_s29, %s4925_s29 }
 0x21d   :  { %p4932_p4 = por %p4931_p3, %p4930_p2 }
 0x21f   :  { %p4933_p5 = pnand %p4932_p4, %p4926_p1 }
 0x221   :  { %4936 = shalt.err (!%p4933_p5)
}
 0x222   :  { %362 = dma.hbm_to_vmem [thread:$0]  %s5648_s9, 32, %s360_s6, [#allocation38]  }
 0x223   :  { %s4937_s8 = scalar_lea.hbm %s5218_s20, 1024 }
 0x224   :  { %p4938_p6 = scmp.ne.s32.totalorder %s5218_s20, %s4937_s8  ;;  %p4941_p7 = scmp.lt.u32.totalorder %s4937_s8, %s5218_s20 }
 0x226   :  { %p4943_p8 = pnand %p4941_p7, %p4938_p6 }
 0x228   :  { %4946 = shalt.err (!%p4943_p8)
}
 0x229   :  { %s4947_s2 = scalar_lea.vmem %s5454_s24, 1024  ;;  %p4952_p10 = scmp.lt.s32.totalorder %s5454_s24, %s5454_s24 }
 0x22a   :  { %p4948_p9 = scmp.ne.s32.totalorder %s5454_s24, %s4947_s2  ;;  %p4953_p11 = scmp.lt.s32.totalorder %s4947_s2, %s4947_s2 }
 0x22c   :  { %p4954_p12 = por %p4953_p11, %p4952_p10 }
 0x22e   :  { %p4955_p13 = pnand %p4954_p12, %p4948_p9 }
 0x230   :  { %4958 = shalt.err (!%p4955_p13)
}
 0x231   :  { %386 = dma.hbm_to_vmem [thread:$0]  %s5218_s20, 1024, %s5454_s24, [#allocation41], %s5045_s21, %s5045_s21, %s5046_s0  }
 0x232   :  { %s5073_s12 = smov [#allocation45]   ;;  %s4959_s23 = scalar_lea.hbm %s5228_s4, 16 }
 0x233   :  { %s405_s22 = sshll.u32 %s5073_s12, 4  ;;  %p4960_p0 = scmp.ne.s32.totalorder %s5228_s4, %s4959_s23  ;;  %s406_s22 = int_to_ptr.vmem [resolvable:$true] %s405_s22 }
 0x234   :  { %p4963_p1 = scmp.lt.u32.totalorder %s4959_s23, %s5228_s4 }
 0x236   :  { %p4965_p2 = pnand %p4963_p1, %p4960_p0 }
 0x238   :  { %4968 = shalt.err (!%p4965_p2)
}
 0x239   :  { %s4969_s14 = scalar_lea.vmem %s406_s22, 16  ;;  %s4973_s26 = scalar_lea.vmem %s406_s22, 32 }
 0x23a   :  { %p4970_p3 = scmp.ne.s32.totalorder %s406_s22, %s4969_s14  ;;  %p4974_p4 = scmp.lt.s32.totalorder %s406_s22, %s406_s22 }
 0x23b   :  { %p4975_p5 = scmp.lt.s32.totalorder %s4973_s26, %s4969_s14 }
 0x23d   :  { %p4976_p6 = por %p4975_p5, %p4974_p4 }
 0x23f   :  { %p4977_p7 = pnand %p4976_p6, %p4970_p3 }
 0x241   :  { %4980 = shalt.err (!%p4977_p7)
}
 0x242   :  { %408 = dma.hbm_to_vmem [thread:$0]  %s5228_s4, 16, %s406_s22, [#allocation44]  }
 0x243   :  { %4981 = dma.done.wait [#allocation3], 128  }
 0x244   :  { %4982 = vsyncadd [#allocation3], 4294967168 }
 0x245   :  { %4983 = dma.done.wait [#allocation5], 256  }
 0x246   :  { %4984 = vsyncadd [#allocation5], 4294967040 }
 0x247   :  { %4985 = dma.done.wait [#allocation8], 1056  }
 0x248   :  { %4986 = vsyncadd [#allocation8], 4294966240 }
 0x249   :  { %4987 = dma.done.wait [#allocation11], 2048  }
 0x24a   :  { %4988 = vsyncadd [#allocation11], 4294965248 }
 0x24b   :  { %4989 = dma.done.wait [#allocation14], 2064  }
 0x24c   :  { %4990 = vsyncadd [#allocation14], 4294965232 }
 0x24d   :  { %4991 = dma.done.wait [#allocation17], 2080  }
 0x24e   :  { %4992 = vsyncadd [#allocation17], 4294965216 }
 0x24f   :  { %4993 = dma.done.wait [#allocation20], 2048  }
 0x250   :  { %4994 = vsyncadd [#allocation20], 4294965248 }
 0x251   :  { %4995 = dma.done.wait [#allocation23], 1040  }
 0x252   :  { %4996 = vsyncadd [#allocation23], 4294966256 }
 0x253   :  { %4997 = dma.done.wait [#allocation26], 4096  }
 0x254   :  { %4998 = vsyncadd [#allocation26], 4294963200 }
 0x255   :  { %4999 = dma.done.wait [#allocation29], 1056  }
 0x256   :  { %5000 = vsyncadd [#allocation29], 4294966240 }
 0x257   :  { %5001 = dma.done.wait [#allocation32], 2048  }
 0x258   :  { %5002 = vsyncadd [#allocation32], 4294965248 }
 0x259   :  { %5003 = dma.done.wait [#allocation35], 2064  }
 0x25a   :  { %5004 = vsyncadd [#allocation35], 4294965232 }
 0x25b   :  { %5005 = dma.done.wait [#allocation38], 2080  }
 0x25c   :  { %5006 = vsyncadd [#allocation38], 4294965216 }
 0x25d   :  { %5007 = dma.done.wait [#allocation41], 2048  }
 0x25e   :  { %5008 = vsyncadd [#allocation41], 4294965248 }
 0x25f   :  { %5009 = dma.done.wait [#allocation44], 1040  }
 0x260   :  { %5010 = vsyncadd [#allocation44], 4294966256  ;;  %s5649_s20 = sld [smem:[#allocation61_spill]]  ;;  %v5074_v0 = vmov 0   ;;  %v514_v1 = vld [vmem:[#allocation4] sm:$0xff]  ;;  %vm526_vm0 = vcmask 1043456   ;;  %v743_v44 = vlaneseq }
 0x261   :  { %565 = vmatprep.mubr.bf16.mxu0 %v5074_v0  ;;  %v3354_v4 = vcombine.high %v514_v1, %v514_v1  ;;  %v3353_v5 = vcombine.low %v514_v1, %v514_v1  ;;  %v503_v7 = vld [vmem:[#allocation2] sm:$0xff]  ;;  %vm506_vm1 = vcmask 1041408   ;;  %v663_v12 = vld [vmem:[#allocation6] sm:$0xff]  ;;  %vm520_vm2 = vcmask 64512   ;;  %v741_v47 = vld [vmem:[#allocation7] sm:$0x3] }
 0x262   :  { %v3359_v10 = vcombine.high %v503_v7, %v503_v7  ;;  %v3358_v11 = vcombine.low %v503_v7, %v503_v7  ;;  %v4103_v15 = vld [vmem:[#allocation9] sm:$0xff]   ;;  %v3364_v19 = vcombine.high %v663_v12, %v663_v12  ;;  %v4105_v20 = vld [vmem:[#allocation9 + $0x8] sm:$0xff]   ;;  %v4107_v22 = vld [vmem:[#allocation9 + $0x10] sm:$0xff]   ;;  %v3363_v25 = vcombine.low %v663_v12, %v663_v12 }
 0x263   :  { %3355 = vmatprep.subr.msk.bf16.mxu0 %vm526_vm0, %v3354_v4  ;;  %v528_v13 = vsel %vm526_vm0, %v3353_v5, 0  ;;  %3741 = vmatprep.subr.bf16.mxu1 %v4103_v15  ;;  %v4109_v23 = vld [vmem:[#allocation9 + $0x18] sm:$0xff]   ;;  %v4104_v26 = vld [vmem:[#allocation10] sm:$0xff]   ;;  %vm656_vm3 = vcmask 1045504   ;;  %v4106_v31 = vld [vmem:[#allocation10 + $0x8] sm:$0xff]   ;;  %v744_v45 = vshrl.u32 %v743_v44, 7 }
 0x264   :  { %534 = vmatpush1.bf16.msra.mxu0 %v528_v13  ;;  %v598_v18 = vsel %vm526_vm0, %v3358_v11, 0  ;;  %3742 = vmatpush3.bf16.msra.mxu1 %v4103_v15  ;;  %v675_v27 = vsel %vm526_vm0, %v3363_v25, 0  ;;  %v4108_v33 = vld [vmem:[#allocation10 + $0x10] sm:$0xff]   ;;  %v4110_v34 = vld [vmem:[#allocation10 + $0x18] sm:$0xff]   ;;  %v4111_v35 = vld [vmem:[#allocation9 + $0x20] sm:$0xff]  }
 0x265   :  { %3360 = vmatprep.subr.msk.bf16.mxu0 %vm526_vm0, %v3359_v10  ;;  %3743 = vmatprep.subr.bf16.mxu1 %v4105_v20  ;;  %v4112_v36 = vld [vmem:[#allocation10 + $0x20] sm:$0xff]   ;;  %v4113_v37 = vld [vmem:[#allocation9 + $0x28] sm:$0xff]   ;;  %v4115_v39 = vld [vmem:[#allocation9 + $0x30] sm:$0xff]   ;;  %v5502_v46 = vsub.s32 0, %v744_v45  ;;  %v5504_v48 = vsub.s32 1, %v744_v45 }
 0x266   :  { %v497_v2 = vld [vmem:[%s5649_s20] sm:$0xff]  ;;  %v498_v3 = vld [vmem:[%s5649_s20 + $0x8] sm:$0xff]  ;;  %v499_v8 = vld [vmem:[%s5649_s20 + $0x10] sm:$0xff] }
 0x267   :  { %v501_v6 = vpack.c.bf16 %v498_v3, %v497_v2  ;;  %v500_v9 = vld [vmem:[%s5649_s20 + $0x18] sm:$0xff]  ;;  %v4114_v38 = vld [vmem:[#allocation10 + $0x28] sm:$0xff]   ;;  %v4116_v40 = vld [vmem:[#allocation10 + $0x30] sm:$0xff]   ;;  %v746_v49 = vrot.slane %v741_v47, %v5502_v46  ;;  %v750_v50 = vrot.slane %v741_v47, %v5504_v48 }
 0x268   :  { %v502_v16 = vpack.c.bf16 %v500_v9, %v499_v8  ;;  %3744 = vmatpush3.bf16.msra.mxu1 %v4105_v20  ;;  %v4117_v41 = vld [vmem:[#allocation9 + $0x38] sm:$0xff]   ;;  %v4119_v43 = vld [vmem:[#allocation12] sm:$0xff]   ;;  %vm5513_vm4 = vmneg %vm506_vm1 }
 0x269   :  { %v507_v14 = vrot.slane %v501_v6, 6  ;;  %3745 = vmatprep.subr.bf16.mxu1 %v4107_v22  ;;  %v657_v29 = vrot.slane %v501_v6, 2  ;;  %v4118_v42 = vld [vmem:[#allocation10 + $0x38] sm:$0xff]   ;;  %v4120_v12 = vld [vmem:[#allocation12 + $0x8] sm:$0xff]   ;;  %v4123_v20 = vld [vmem:[#allocation12 + $0x20] sm:$0xff]  }
 0x26a   :  { %v508_v21 = vrot.slane %v502_v16, 6  ;;  %v658_v28 = vrot.slane %v502_v16, 2  ;;  %v4129_v25 = vld [vmem:[#allocation16 + $0x4] ss:$8 sps:$4 sm:$0xff]   ;;  %v4178_v44 = vld [vmem:[#allocation21 + $0x18] sm:$0xff]  }
 0x26b   :  { %v513_v17 = vsel %vm506_vm1, 0, %v507_v14  ;;  %v4330_v63 = vld [vmem:[#allocation40 + $0x18] sm:$0xff]  }
 0x26c   :  { %3356 = vmatmul.mubr.msk.bf16.vlgmr.msra.gmra.mrb[0].mxu0 %vm520_vm2, %v513_v17  ;;  %v509_v24 = vsel %vm506_vm1, %v507_v14, %v508_v21  ;;  %3746 = vmatpush3.bf16.msra.mxu1 %v4107_v22  ;;  %v662_v30 = vsel %vm656_vm3, %v658_v28, 0  ;;  %v659_v32 = vsel %vm656_vm3, %v657_v29, %v658_v28  ;;  %v4124_v21 = vld [vmem:[#allocation12 + $0x28] sm:$0xff]   ;;  %v4125_v22 = vld [vmem:[#allocation12 + $0x30] sm:$0xff]  }
 0x26d   :  { %604 = vmatpush1.bf16.msra.mxu0 %v598_v18  ;;  %575 = vmatprep.mubr.bf16.mxu0 %v5074_v0  ;;  %v4121_v18 = vld [vmem:[#allocation12 + $0x10] sm:$0xff]   ;;  %v4133_v29 = vld [vmem:[#allocation16 + $0x20] ss:$8 sps:$4 sm:$0xff]  }
 0x26e   :  { %3365 = vmatprep.subr.msk.bf16.mxu0 %vm526_vm0, %v3364_v19  ;;  %3747 = vmatprep.subr.bf16.mxu1 %v4109_v23  ;;  %v4122_v19 = vld [vmem:[#allocation12 + $0x18] sm:$0xff]   ;;  %v4135_v28 = vld [vmem:[#allocation16 + $0x24] ss:$8 sps:$4 sm:$0xff]  }
 0x270   :  { %3748 = vmatpush3.bf16.msra.mxu1 %v4109_v23  ;;  %v4126_v23 = vld [vmem:[#allocation12 + $0x38] sm:$0xff]  }
 0x271   :  { %3749 = vmatprep.subr.bf16.mxu1 %v4111_v35 }
 0x274   :  { %3357 = vmatmul.mubr.msk.bf16.gmra.mrb[4].mxu0 %vm520_vm2, %v509_v24  ;;  %3750 = vmatpush3.bf16.msra.mxu1 %v4111_v35  ;;  %v4127_v24 = vld [vmem:[#allocation16] ss:$8 sps:$4 sm:$0xff]   ;;  %v4142_v35 = vld [vmem:[#allocation16 + $0x50] ss:$8 sps:$4 sm:$0xff]  }
 0x275   :  { %635 = vmatprep.mubr.bf16.mxu0 %v5074_v0  ;;  %3751 = vmatprep.subr.bf16.mxu1 %v4113_v37 }
 0x278   :  { %3752 = vmatpush3.bf16.msra.mxu1 %v4113_v37  ;;  %v4145_v37 = vld [vmem:[#allocation16 + $0x60] ss:$8 sps:$4 sm:$0xff]  }
 0x279   :  { %3753 = vmatprep.subr.bf16.mxu1 %v4115_v39 }
 0x27c   :  { %3361 = vmatmul.mubr.msk.bf16.vlgmr.msra.gmra.mrb[0].mxu0 %vm520_vm2, %v501_v6  ;;  %3754 = vmatpush3.bf16.msra.mxu1 %v4115_v39  ;;  %v4148_v39 = vld [vmem:[#allocation16 + $0x70] ss:$8 sps:$4 sm:$0xff]  }
 0x27d   :  { %681 = vmatpush1.bf16.msra.mxu0 %v675_v27  ;;  %645 = vmatprep.mubr.bf16.mxu0 %v5074_v0  ;;  %v4130_v27 = vld [vmem:[#allocation16 + $0x10] ss:$8 sps:$4 sm:$0xff]  }
 0x27e   :  { %3721 = vmatprep.subr.bf16.mxu0 %v4104_v26  ;;  %3755 = vmatprep.subr.bf16.mxu1 %v4117_v41 }
 0x280   :  { %3756 = vmatpush3.bf16.msra.mxu1 %v4117_v41  ;;  %v4175_v41 = vld [vmem:[#allocation21] sm:$0xff]  }
 0x281   :  { %3761 = vmatprep.subr.bf16.mxu1 %v4119_v43 }
 0x284   :  { %3362 = vmatmul.mubr.msk.bf16.gmra.mrb[4].mxu0 %vm520_vm2, %v502_v16 }
 0x285   :  { %712 = vmatprep.mubr.bf16.mxu0 %v5074_v0 }
 0x28c   :  { %3366 = vmatmul.mubr.msk.bf16.vlgmr.msra.gmra.mrb[0].mxu0 %vm520_vm2, %v659_v32  ;;  %v4141_v32 = vld [vmem:[#allocation16 + $0x44] ss:$8 sps:$4 sm:$0xff]  }
 0x28d   :  { %722 = vmatprep.mubr.bf16.mxu0 %v5074_v0  ;;  %3722 = vmatpush3.bf16.msra.mxu0 %v4104_v26  ;;  %v4132_v26 = vld [vmem:[#allocation16 + $0x14] ss:$8 sps:$4 sm:$0xff]  }
 0x28e   :  { %3723 = vmatprep.subr.bf16.mxu0 %v4106_v31 }
 0x291   :  { %3724 = vmatpush3.bf16.msra.mxu0 %v4106_v31  ;;  %v4136_v31 = vld [vmem:[#allocation16 + $0x30] ss:$8 sps:$4 sm:$0xff]  }
 0x292   :  { %3725 = vmatprep.subr.bf16.mxu0 %v4108_v33 }
 0x294   :  { %3367 = vmatmul.mubr.msk.bf16.gmra.mrb[4].mxu0 %vm520_vm2, %v662_v30  ;;  %v4138_v30 = vld [vmem:[#allocation16 + $0x34] ss:$8 sps:$4 sm:$0xff]  }
 0x295   :  { %3726 = vmatpush3.bf16.msra.mxu0 %v4108_v33  ;;  %v4139_v33 = vld [vmem:[#allocation16 + $0x40] ss:$8 sps:$4 sm:$0xff]  }
 0x296   :  { %3727 = vmatprep.subr.bf16.mxu0 %v4110_v34 }
 0x299   :  { %3728 = vmatpush3.bf16.msra.mxu0 %v4110_v34  ;;  %v4144_v34 = vld [vmem:[#allocation16 + $0x54] ss:$8 sps:$4 sm:$0xff]  }
 0x29a   :  { %3729 = vmatprep.subr.bf16.mxu0 %v4112_v36 }
 0x29d   :  { %3730 = vmatpush3.bf16.msra.mxu0 %v4112_v36  ;;  %v4147_v36 = vld [vmem:[#allocation16 + $0x64] ss:$8 sps:$4 sm:$0xff]  }
 0x29e   :  { %3731 = vmatprep.subr.bf16.mxu0 %v4114_v38 }
 0x2a1   :  { %3732 = vmatpush3.bf16.msra.mxu0 %v4114_v38  ;;  %v4150_v38 = vld [vmem:[#allocation16 + $0x74] ss:$8 sps:$4 sm:$0xff]  }
 0x2a2   :  { %3733 = vmatprep.subr.bf16.mxu0 %v4116_v40 }
 0x2a5   :  { %3734 = vmatpush3.bf16.msra.mxu0 %v4116_v40  ;;  %v4153_v40 = vld [vmem:[#allocation15 + $0x4] ss:$8 sps:$4 sm:$0xff]  }
 0x2a6   :  { %3735 = vmatprep.subr.bf16.mxu0 %v4118_v42 }
 0x2a9   :  { %3736 = vmatpush3.bf16.msra.mxu0 %v4118_v42  ;;  %v4176_v42 = vld [vmem:[#allocation21 + $0x8] sm:$0xff]  }
 0x2aa   :  { %1268 = vmatprep.subr.bf16.mxu0 %v4129_v25  ;;  %v4166_v25 = vld [vmem:[#allocation15 + $0x50] ss:$8 sps:$4 sm:$0xff]  }
 0x35f   :  { %v714_v51 = vpop.f32.mrb[0].mxu0 }
 0x360   :  { %v753_v52 = vadd.f32 %v746_v49, %v714_v51  ;;  %v716_v53 = vpop.f32.mrb[1].mxu0 }
 0x361   :  { %v5508_v54 = vadd.f32 %v750_v50, %v716_v53  ;;  %v718_v55 = vpop.f32.mrb[2].mxu0 }
 0x362   :  { %v755_v56 = vadd.f32 %v746_v49, %v718_v55  ;;  %v720_v57 = vpop.f32.mrb[3].mxu0  ;;  %v761_v59 = vmax.f32 %v753_v52, 0.0  ;;  %v3395_v52 = vld [vmem:[#allocation13] ss:$0 sm:$0xff] }
 0x363   :  { %v5510_v58 = vadd.f32 %v750_v50, %v720_v57 }
 0x364   :  { %v762_v60 = vmax.f32 %v755_v56, 0.0 }
 0x366   :  { %v765_v61 = vpack.c.bf16 %v762_v60, %v761_v59 }
 0x367   :  { %v724_v62 = vpop.f32.mrb[4].mxu0 }
 0x368   :  { %v757_v1 = vadd.f32 %v746_v49, %v724_v62  ;;  %v726_v2 = vpop.f32.mrb[5].mxu0  ;;  %3757 = vmatprep.mubr.bf16.mxu1 %v765_v61  ;;  %v785_v3 = vrot.slane %v765_v61, 6  ;;  %v1002_v14 = vrot.slane %v765_v61, 2 }
 0x369   :  { %v5517_v4 = vadd.f32 %v750_v50, %v726_v2  ;;  %v728_v5 = vpop.f32.mrb[6].mxu0 }
 0x36a   :  { %v759_v6 = vadd.f32 %v746_v49, %v728_v5  ;;  %v730_v7 = vpop.f32.mrb[7].mxu0  ;;  %3737 = vmatprep.mubr.msk.bf16.mxu0 %vm5513_vm4, %v785_v3  ;;  %v763_v9 = vmax.f32 %v757_v1, 0.0 }
 0x36b   :  { %v5521_v8 = vadd.f32 %v750_v50, %v730_v7 }
 0x36c   :  { %v764_v10 = vmax.f32 %v759_v6, 0.0 }
 0x36e   :  { %v766_v11 = vpack.c.bf16 %v764_v10, %v763_v9 }
 0x370   :  { %v786_v13 = vrot.slane %v766_v11, 6  ;;  %3758 = vmatmul.mubr.bf16.vlgmr.msra.gmra.mrb[0].mxu1 %v766_v11  ;;  %v1003_v15 = vrot.slane %v766_v11, 2 }
 0x371   :  { %3762 = vmatpush3.bf16.msra.mxu1 %v4119_v43  ;;  %v4177_v43 = vld [vmem:[#allocation21 + $0x10] sm:$0xff]  }
 0x372   :  { %v787_v16 = vsel %vm506_vm1, %v785_v3, %v786_v13  ;;  %3763 = vmatprep.subr.bf16.mxu1 %v4120_v12  ;;  %v1004_v17 = vsel %vm656_vm3, %v1002_v14, %v1003_v15 }
 0x373   :  { %3738 = vmatmul.mubr.bf16.vlgmr.msra.gmra.mrb[8].mxu0 %v787_v16  ;;  %3777 = vmatprep.mubr.bf16.mxu1 %v1004_v17  ;;  %v4151_v16 = vld [vmem:[#allocation15] ss:$8 sps:$4 sm:$0xff]  }
 0x374   :  { %1300 = vmatprep.mubr.bf16.mxu0 %v5074_v0  ;;  %1269 = vmatpush1.bf16.msra.mxu0 %v4127_v24  ;;  %v4168_v24 = vld [vmem:[#allocation15 + $0x54] ss:$8 sps:$4 sm:$0xff]  }
 0x375   :  { %3764 = vmatpush3.bf16.msra.mxu1 %v4120_v12  ;;  %1270 = vmatprep.subr.bf16.mxu0 %v4132_v26  ;;  %v4171_v26 = vld [vmem:[#allocation15 + $0x64] ss:$8 sps:$4 sm:$0xff]  }
 0x376   :  { %3765 = vmatprep.subr.bf16.mxu1 %v4121_v18 }
 0x378   :  { %1271 = vmatpush1.bf16.msra.mxu0 %v4130_v27  ;;  %v4169_v27 = vld [vmem:[#allocation15 + $0x60] ss:$8 sps:$4 sm:$0xff]  }
 0x379   :  { %3766 = vmatpush3.bf16.msra.mxu1 %v4121_v18  ;;  %1272 = vmatprep.subr.bf16.mxu0 %v4135_v28  ;;  %v4174_v28 = vld [vmem:[#allocation15 + $0x74] ss:$8 sps:$4 sm:$0xff]  }
 0x37a   :  { %3767 = vmatprep.subr.bf16.mxu1 %v4122_v19 }
 0x37c   :  { %1273 = vmatpush1.bf16.msra.mxu0 %v4133_v29  ;;  %v4172_v29 = vld [vmem:[#allocation15 + $0x70] ss:$8 sps:$4 sm:$0xff]  }
 0x37d   :  { %3768 = vmatpush3.bf16.msra.mxu1 %v4122_v19  ;;  %1274 = vmatprep.subr.bf16.mxu0 %v4138_v30  ;;  %v4156_v19 = vld [vmem:[#allocation15 + $0x14] ss:$8 sps:$4 sm:$0xff]   ;;  %v4179_v30 = vld [vmem:[#allocation21 + $0x20] sm:$0xff]  }
 0x37e   :  { %3769 = vmatprep.subr.bf16.mxu1 %v4123_v20 }
 0x380   :  { %1275 = vmatpush1.bf16.msra.mxu0 %v4136_v31  ;;  %v4180_v31 = vld [vmem:[#allocation21 + $0x28] sm:$0xff]  }
 0x381   :  { %3770 = vmatpush3.bf16.msra.mxu1 %v4123_v20  ;;  %1276 = vmatprep.subr.bf16.mxu0 %v4141_v32  ;;  %v4162_v20 = vld [vmem:[#allocation15 + $0x34] ss:$8 sps:$4 sm:$0xff]  }
 0x382   :  { %3771 = vmatprep.subr.bf16.mxu1 %v4124_v21  ;;  %v4181_v32 = vld [vmem:[#allocation21 + $0x30] sm:$0xff]  }
 0x384   :  { %1277 = vmatpush1.bf16.msra.mxu0 %v4139_v33  ;;  %v4182_v33 = vld [vmem:[#allocation21 + $0x38] sm:$0xff]  }
 0x385   :  { %3772 = vmatpush3.bf16.msra.mxu1 %v4124_v21  ;;  %1278 = vmatprep.subr.bf16.mxu0 %v4144_v34  ;;  %v4160_v21 = vld [vmem:[#allocation15 + $0x30] ss:$8 sps:$4 sm:$0xff]   ;;  %v4183_v34 = vld [vmem:[#allocation19] sm:$0xff]  }
 0x386   :  { %3773 = vmatprep.subr.bf16.mxu1 %v4125_v22 }
 0x388   :  { %1279 = vmatpush1.bf16.msra.mxu0 %v4142_v35  ;;  %v4199_v35 = vld [vmem:[#allocation27] ss:$8 sps:$4 sm:$0xff]  }
 0x389   :  { %3774 = vmatpush3.bf16.msra.mxu1 %v4125_v22  ;;  %1280 = vmatprep.subr.bf16.mxu0 %v4147_v36  ;;  %v4165_v22 = vld [vmem:[#allocation15 + $0x44] ss:$8 sps:$4 sm:$0xff]   ;;  %v4201_v36 = vld [vmem:[#allocation27 + $0x4] ss:$8 sps:$4 sm:$0xff]  }
 0x38a   :  { %3775 = vmatprep.subr.bf16.mxu1 %v4126_v23 }
 0x38c   :  { %1281 = vmatpush1.bf16.msra.mxu0 %v4145_v37  ;;  %v4204_v37 = vld [vmem:[#allocation27 + $0x14] ss:$8 sps:$4 sm:$0xff]  }
 0x38d   :  { %3776 = vmatpush3.bf16.msra.mxu1 %v4126_v23  ;;  %1282 = vmatprep.subr.bf16.mxu0 %v4150_v38  ;;  %v4163_v23 = vld [vmem:[#allocation15 + $0x40] ss:$8 sps:$4 sm:$0xff]   ;;  %v4202_v38 = vld [vmem:[#allocation27 + $0x10] ss:$8 sps:$4 sm:$0xff]  }
 0x38e   :  { %3781 = vmatprep.subr.bf16.mxu1 %v4175_v41 }
 0x390   :  { %3778 = vmatmul.mubr.msk.bf16.vlgmr.msra.gmra.mrb[0].mxu1 %vm656_vm3, %v1003_v15  ;;  %1283 = vmatpush1.bf16.msra.mxu0 %v4148_v39  ;;  %v4207_v39 = vld [vmem:[#allocation27 + $0x24] ss:$8 sps:$4 sm:$0xff]  }
 0x391   :  { %1401 = vmatprep.subr.bf16.mxu0 %v4153_v40  ;;  %3782 = vmatpush3.bf16.msra.mxu1 %v4175_v41  ;;  %v4205_v40 = vld [vmem:[#allocation27 + $0x20] ss:$8 sps:$4 sm:$0xff]   ;;  %v4210_v41 = vld [vmem:[#allocation27 + $0x34] ss:$8 sps:$4 sm:$0xff]  }
 0x392   :  { %3783 = vmatprep.subr.bf16.mxu1 %v4176_v42 }
 0x395   :  { %3784 = vmatpush3.bf16.msra.mxu1 %v4176_v42  ;;  %v4208_v42 = vld [vmem:[#allocation27 + $0x30] ss:$8 sps:$4 sm:$0xff]  }
 0x396   :  { %3785 = vmatprep.subr.bf16.mxu1 %v4177_v43 }
 0x399   :  { %3786 = vmatpush3.bf16.msra.mxu1 %v4177_v43  ;;  %v4213_v43 = vld [vmem:[#allocation27 + $0x44] ss:$8 sps:$4 sm:$0xff]  }
 0x39a   :  { %3787 = vmatprep.subr.bf16.mxu1 %v4178_v44 }
 0x39d   :  { %3788 = vmatpush3.bf16.msra.mxu1 %v4178_v44  ;;  %v4211_v44 = vld [vmem:[#allocation27 + $0x40] ss:$8 sps:$4 sm:$0xff]  }
 0x39e   :  { %3789 = vmatprep.subr.bf16.mxu1 %v4179_v30 }
 0x3a1   :  { %3790 = vmatpush3.bf16.msra.mxu1 %v4179_v30  ;;  %v4198_v30 = vld [vmem:[#allocation22 + $0x38] sm:$0xff]  }
 0x3a2   :  { %3791 = vmatprep.subr.bf16.mxu1 %v4180_v31 }
 0x3a5   :  { %3792 = vmatpush3.bf16.msra.mxu1 %v4180_v31  ;;  %v4216_v31 = vld [vmem:[#allocation27 + $0x54] ss:$8 sps:$4 sm:$0xff]  }
 0x3a6   :  { %3793 = vmatprep.subr.bf16.mxu1 %v4181_v32 }
 0x3a9   :  { %3794 = vmatpush3.bf16.msra.mxu1 %v4181_v32  ;;  %v4214_v32 = vld [vmem:[#allocation27 + $0x50] ss:$8 sps:$4 sm:$0xff]  }
 0x3aa   :  { %3795 = vmatprep.subr.bf16.mxu1 %v4182_v33 }
 0x3ad   :  { %3796 = vmatpush3.bf16.msra.mxu1 %v4182_v33  ;;  %v4219_v33 = vld [vmem:[#allocation27 + $0x64] ss:$8 sps:$4 sm:$0xff]  }
 0x3ae   :  { %3801 = vmatprep.subr.bf16.mxu1 %v4183_v34 }
 0x446   :  { %v3739_v45 = vpop.f32.mrb[8].mxu0 }
 0x447   :  { %v890_v47 = vpop.f32.mrb[9].mxu0 }
 0x448   :  { %v3740_v49 = vpop.f32.mrb[10].mxu0 }
 0x449   :  { %v893_v50 = vpop.f32.mrb[11].mxu0 }
 0x463   :  { %v3779_v51 = vpop.f32.mrb[0].mxu1 }
 0x464   :  { %v3961_v53 = vadd.f32 %v3779_v51, %v3739_v45  ;;  %v1107_v55 = vpop.f32.mrb[1].mxu1  ;;  %v1454_v45 = vld [vmem:[#allocation18] sm:$0x3] }
 0x465   :  { %v3962_v56 = vadd.f32 %v1107_v55, %v890_v47  ;;  %v3780_v57 = vpop.f32.mrb[2].mxu1  ;;  %v1459_v47 = vrot.slane %v1454_v45, %v5502_v46 }
 0x466   :  { %v1135_v59 = vadd.f32 %v3961_v53, %v3395_v52  ;;  %v3963_v60 = vadd.f32 %v3780_v57, %v3740_v49  ;;  %v1110_v61 = vpop.f32.mrb[3].mxu1  ;;  %v1463_v49 = vrot.slane %v1454_v45, %v5504_v48 }
 0x467   :  { %v1133_v62 = vadd.f32 %v3962_v56, %v3395_v52  ;;  %v3964_v1 = vadd.f32 %v1110_v61, %v893_v50 }
 0x468   :  { %v1139_v2 = vadd.f32 %v1135_v59, %v5517_v4  ;;  %v1136_v3 = vadd.f32 %v3963_v60, %v3395_v52  ;;  %v4154_v4 = vld [vmem:[#allocation15 + $0x10] ss:$8 sps:$4 sm:$0xff]  }
 0x469   :  { %v1137_v5 = vadd.f32 %v1133_v62, %v5508_v54  ;;  %v1134_v6 = vadd.f32 %v3964_v1, %v3395_v52 }
 0x46a   :  { %v1140_v7 = vadd.f32 %v1136_v3, %v5521_v8  ;;  %v1143_v10 = vmax.f32 %v1139_v2, 0.0  ;;  %v4157_v8 = vld [vmem:[#allocation15 + $0x20] ss:$8 sps:$4 sm:$0xff]  }
 0x46b   :  { %v1138_v9 = vadd.f32 %v1134_v6, %v5510_v58  ;;  %v1141_v12 = vmax.f32 %v1137_v5, 0.0  ;;  %v4159_v58 = vld [vmem:[#allocation15 + $0x24] ss:$8 sps:$4 sm:$0xff]  }
 0x46c   :  { %v1144_v11 = vmax.f32 %v1140_v7, 0.0 }
 0x46d   :  { %v1142_v13 = vmax.f32 %v1138_v9, 0.0 }
 0x46e   :  { %v1146_v14 = vpack.c.bf16 %v1144_v11, %v1143_v10 }
 0x46f   :  { %v1145_v15 = vpack.c.bf16 %v1142_v13, %v1141_v12 }
 0x470   :  { %v1166_v17 = vrot.slane %v1146_v14, 6 }
 0x471   :  { %v1165_v18 = vrot.slane %v1145_v15, 6 }
 0x473   :  { %3413 = vmatmul.mubr.msk.bf16.vlgmr.msra.gmra.mrb[12].mxu0 %vm5513_vm4, %v1165_v18  ;;  %v1167_v54 = vsel %vm506_vm1, %v1165_v18, %v1166_v17  ;;  %v4184_v18 = vld [vmem:[#allocation19 + $0x8] sm:$0xff]  }
 0x474   :  { %1402 = vmatpush1.bf16.msra.mxu0 %v4151_v16  ;;  %1310 = vmatprep.mubr.bf16.mxu0 %v5074_v0 }
 0x475   :  { %1403 = vmatprep.subr.bf16.mxu0 %v4156_v19 }
 0x478   :  { %1404 = vmatpush1.bf16.msra.mxu0 %v4154_v4  ;;  %v4185_v4 = vld [vmem:[#allocation19 + $0x10] sm:$0xff]  }
 0x479   :  { %1405 = vmatprep.subr.bf16.mxu0 %v4159_v58  ;;  %v4186_v58 = vld [vmem:[#allocation19 + $0x18] sm:$0xff]  }
 0x47b   :  { %1311 = vmatmul.mubr.bf16.gmra.mrb[16].mxu0 %v1167_v54 }
 0x47c   :  { %1406 = vmatpush1.bf16.msra.mxu0 %v4157_v8  ;;  %1433 = vmatprep.mubr.bf16.mxu0 %v5074_v0  ;;  %v4187_v8 = vld [vmem:[#allocation19 + $0x20] sm:$0xff]  }
 0x47d   :  { %1407 = vmatprep.subr.bf16.mxu0 %v4162_v20  ;;  %v4188_v20 = vld [vmem:[#allocation19 + $0x28] sm:$0xff]  }
 0x480   :  { %1408 = vmatpush1.bf16.msra.mxu0 %v4160_v21  ;;  %v4189_v21 = vld [vmem:[#allocation19 + $0x30] sm:$0xff]  }
 0x481   :  { %1409 = vmatprep.subr.bf16.mxu0 %v4165_v22  ;;  %v4190_v22 = vld [vmem:[#allocation19 + $0x38] sm:$0xff]  }
 0x484   :  { %1410 = vmatpush1.bf16.msra.mxu0 %v4163_v23  ;;  %v4191_v23 = vld [vmem:[#allocation22] sm:$0xff]  }
 0x485   :  { %1411 = vmatprep.subr.bf16.mxu0 %v4168_v24  ;;  %v4192_v24 = vld [vmem:[#allocation22 + $0x8] sm:$0xff]  }
 0x488   :  { %1412 = vmatpush1.bf16.msra.mxu0 %v4166_v25  ;;  %v4193_v25 = vld [vmem:[#allocation22 + $0x10] sm:$0xff]  }
 0x489   :  { %1413 = vmatprep.subr.bf16.mxu0 %v4171_v26  ;;  %v4194_v26 = vld [vmem:[#allocation22 + $0x18] sm:$0xff]  }
 0x48c   :  { %1414 = vmatpush1.bf16.msra.mxu0 %v4169_v27  ;;  %v4195_v27 = vld [vmem:[#allocation22 + $0x20] sm:$0xff]  }
 0x48d   :  { %1415 = vmatprep.subr.bf16.mxu0 %v4174_v28  ;;  %v4196_v28 = vld [vmem:[#allocation22 + $0x28] sm:$0xff]  }
 0x490   :  { %1416 = vmatpush1.bf16.msra.mxu0 %v4172_v29  ;;  %v4197_v29 = vld [vmem:[#allocation22 + $0x30] sm:$0xff]  }
 0x491   :  { %1981 = vmatprep.subr.bf16.mxu0 %v4201_v36  ;;  %v4220_v36 = vld [vmem:[#allocation27 + $0x70] ss:$8 sps:$4 sm:$0xff]  }
 0x493   :  { %1434 = vmatmul.mubr.bf16.vlgmr.msra.gmra.mrb[12].mxu0 %v1145_v15 }
 0x494   :  { %1443 = vmatprep.mubr.bf16.mxu0 %v5074_v0  ;;  %1982 = vmatpush1.bf16.msra.mxu0 %v4199_v35  ;;  %v4222_v35 = vld [vmem:[#allocation27 + $0x74] ss:$8 sps:$4 sm:$0xff]  }
 0x495   :  { %1983 = vmatprep.subr.bf16.mxu0 %v4204_v37  ;;  %v4225_v37 = vld [vmem:[#allocation25 + $0x4] ss:$8 sps:$4 sm:$0xff]  }
 0x498   :  { %1984 = vmatpush1.bf16.msra.mxu0 %v4202_v38  ;;  %v3457_v38 = vld [vmem:[#allocation24] ss:$0 sm:$0xff] }
 0x499   :  { %1985 = vmatprep.subr.bf16.mxu0 %v4207_v39 }
 0x49b   :  { %1444 = vmatmul.mubr.bf16.gmra.mrb[16].mxu0 %v1146_v14 }
 0x49c   :  { %2013 = vmatprep.mubr.bf16.mxu0 %v5074_v0  ;;  %1986 = vmatpush1.bf16.msra.mxu0 %v4205_v40 }
 0x49d   :  { %1987 = vmatprep.subr.bf16.mxu0 %v4210_v41 }
 0x4a0   :  { %1988 = vmatpush1.bf16.msra.mxu0 %v4208_v42 }
 0x4a1   :  { %1989 = vmatprep.subr.bf16.mxu0 %v4213_v43 }
 0x4a4   :  { %1990 = vmatpush1.bf16.msra.mxu0 %v4211_v44 }
 0x4a5   :  { %1991 = vmatprep.subr.bf16.mxu0 %v4216_v31  ;;  %v4280_v31 = vld [vmem:[#allocation37 + $0x30] ss:$8 sps:$4 sm:$0xff]  }
 0x4a8   :  { %1992 = vmatpush1.bf16.msra.mxu0 %v4214_v32  ;;  %v4285_v32 = vld [vmem:[#allocation37 + $0x44] ss:$8 sps:$4 sm:$0xff]  }
 0x4a9   :  { %1993 = vmatprep.subr.bf16.mxu0 %v4219_v33  ;;  %v4283_v33 = vld [vmem:[#allocation37 + $0x40] ss:$8 sps:$4 sm:$0xff]  }
 0x566   :  { %v1435_v50 = vpop.f32.mrb[12].mxu0 }
 0x567   :  { %v1466_v51 = vadd.f32 %v1459_v47, %v1435_v50  ;;  %v1437_v52 = vpop.f32.mrb[13].mxu0 }
 0x568   :  { %v5540_v53 = vadd.f32 %v1463_v49, %v1437_v52  ;;  %v1439_v55 = vpop.f32.mrb[14].mxu0 }
 0x569   :  { %v1468_v56 = vadd.f32 %v1459_v47, %v1439_v55  ;;  %v1441_v57 = vpop.f32.mrb[15].mxu0  ;;  %v1474_v60 = vmax.f32 %v1466_v51, 0.0 }
 0x56a   :  { %v5542_v59 = vadd.f32 %v1463_v49, %v1441_v57 }
 0x56b   :  { %v1475_v61 = vmax.f32 %v1468_v56, 0.0 }
 0x56d   :  { %v1478_v62 = vpack.c.bf16 %v1475_v61, %v1474_v60 }
 0x56e   :  { %v1445_v1 = vpop.f32.mrb[16].mxu0 }
 0x56f   :  { %v1470_v2 = vadd.f32 %v1459_v47, %v1445_v1  ;;  %v1447_v3 = vpop.f32.mrb[17].mxu0  ;;  %v1498_v5 = vrot.slane %v1478_v62, 6  ;;  %v1715_v16 = vrot.slane %v1478_v62, 2  ;;  %v4223_v1 = vld [vmem:[#allocation25] ss:$8 sps:$4 sm:$0xff]  }
 0x570   :  { %v5544_v6 = vadd.f32 %v1463_v49, %v1447_v3  ;;  %v1449_v7 = vpop.f32.mrb[18].mxu0 }
 0x571   :  { %v1472_v9 = vadd.f32 %v1459_v47, %v1449_v7  ;;  %v1451_v10 = vpop.f32.mrb[19].mxu0  ;;  %3797 = vmatprep.mubr.msk.bf16.mxu1 %vm5513_vm4, %v1498_v5  ;;  %v1476_v12 = vmax.f32 %v1470_v2, 0.0  ;;  %v4229_v7 = vld [vmem:[#allocation25 + $0x20] ss:$8 sps:$4 sm:$0xff]  }
 0x572   :  { %v5548_v11 = vadd.f32 %v1463_v49, %v1451_v10  ;;  %v4232_v10 = vld [vmem:[#allocation25 + $0x30] ss:$8 sps:$4 sm:$0xff]  }
 0x573   :  { %v1477_v13 = vmax.f32 %v1472_v9, 0.0  ;;  %v4234_v9 = vld [vmem:[#allocation25 + $0x34] ss:$8 sps:$4 sm:$0xff]  }
 0x575   :  { %v1479_v14 = vpack.c.bf16 %v1477_v13, %v1476_v12  ;;  %v4235_v12 = vld [vmem:[#allocation25 + $0x40] ss:$8 sps:$4 sm:$0xff]   ;;  %v4240_v13 = vld [vmem:[#allocation25 + $0x54] ss:$8 sps:$4 sm:$0xff]  }
 0x577   :  { %v1499_v15 = vrot.slane %v1479_v14, 6  ;;  %v1716_v17 = vrot.slane %v1479_v14, 2 }
 0x579   :  { %v1500_v19 = vsel %vm506_vm1, %v1498_v5, %v1499_v15  ;;  %v1717_v54 = vsel %vm656_vm3, %v1715_v16, %v1716_v17  ;;  %v4228_v5 = vld [vmem:[#allocation25 + $0x14] ss:$8 sps:$4 sm:$0xff]   ;;  %v4243_v15 = vld [vmem:[#allocation25 + $0x64] ss:$8 sps:$4 sm:$0xff]   ;;  %v4241_v16 = vld [vmem:[#allocation25 + $0x60] ss:$8 sps:$4 sm:$0xff]  }
 0x57a   :  { %3798 = vmatmul.mubr.bf16.vlgmr.msra.gmra.mrb[4].mxu1 %v1500_v19  ;;  %v4247_v19 = vld [vmem:[#allocation31] sm:$0xff]  }
 0x57b   :  { %3802 = vmatpush3.bf16.msra.mxu1 %v4183_v34  ;;  %3817 = vmatprep.mubr.bf16.mxu1 %v1478_v62  ;;  %v4217_v34 = vld [vmem:[#allocation27 + $0x60] ss:$8 sps:$4 sm:$0xff]  }
 0x57c   :  { %3803 = vmatprep.subr.bf16.mxu1 %v4184_v18  ;;  %1994 = vmatpush1.bf16.msra.mxu0 %v4217_v34  ;;  %v2167_v34 = vld [vmem:[#allocation28] sm:$0x3] }
 0x57d   :  { %1995 = vmatprep.subr.bf16.mxu0 %v4222_v35  ;;  %v2172_v35 = vrot.slane %v2167_v34, %v5502_v46 }
 0x57f   :  { %3804 = vmatpush3.bf16.msra.mxu1 %v4184_v18  ;;  %v4244_v18 = vld [vmem:[#allocation25 + $0x70] ss:$8 sps:$4 sm:$0xff]  }
 0x580   :  { %3805 = vmatprep.subr.bf16.mxu1 %v4185_v4  ;;  %1996 = vmatpush1.bf16.msra.mxu0 %v4220_v36  ;;  %v2176_v36 = vrot.slane %v2167_v34, %v5504_v48 }
 0x581   :  { %2114 = vmatprep.subr.bf16.mxu0 %v4225_v37 }
 0x583   :  { %3806 = vmatpush3.bf16.msra.mxu1 %v4185_v4  ;;  %v4249_v4 = vld [vmem:[#allocation31 + $0x10] sm:$0xff]  }
 0x584   :  { %3807 = vmatprep.subr.bf16.mxu1 %v4186_v58 }
 0x587   :  { %3808 = vmatpush3.bf16.msra.mxu1 %v4186_v58  ;;  %v4250_v58 = vld [vmem:[#allocation31 + $0x18] sm:$0xff]  }
 0x588   :  { %3809 = vmatprep.subr.bf16.mxu1 %v4187_v8 }
 0x58b   :  { %3810 = vmatpush3.bf16.msra.mxu1 %v4187_v8  ;;  %v4251_v8 = vld [vmem:[#allocation31 + $0x20] sm:$0xff]  }
 0x58c   :  { %3811 = vmatprep.subr.bf16.mxu1 %v4188_v20 }
 0x58f   :  { %3812 = vmatpush3.bf16.msra.mxu1 %v4188_v20  ;;  %v4252_v20 = vld [vmem:[#allocation31 + $0x28] sm:$0xff]  }
 0x590   :  { %3813 = vmatprep.subr.bf16.mxu1 %v4189_v21 }
 0x593   :  { %3814 = vmatpush3.bf16.msra.mxu1 %v4189_v21  ;;  %v4253_v21 = vld [vmem:[#allocation31 + $0x30] sm:$0xff]  }
 0x594   :  { %3815 = vmatprep.subr.bf16.mxu1 %v4190_v22 }
 0x597   :  { %3816 = vmatpush3.bf16.msra.mxu1 %v4190_v22  ;;  %v4254_v22 = vld [vmem:[#allocation31 + $0x38] sm:$0xff]  }
 0x598   :  { %3821 = vmatprep.subr.bf16.mxu1 %v4191_v23 }
 0x59a   :  { %3818 = vmatmul.mubr.bf16.vlgmr.msra.gmra.mrb[4].mxu1 %v1479_v14  ;;  %v4238_v14 = vld [vmem:[#allocation25 + $0x50] ss:$8 sps:$4 sm:$0xff]  }
 0x59b   :  { %3822 = vmatpush3.bf16.msra.mxu1 %v4191_v23  ;;  %3837 = vmatprep.mubr.bf16.mxu1 %v1717_v54  ;;  %v4248_v54 = vld [vmem:[#allocation31 + $0x8] sm:$0xff]   ;;  %v4255_v23 = vld [vmem:[#allocation30] sm:$0xff]  }
 0x59c   :  { %3823 = vmatprep.subr.bf16.mxu1 %v4192_v24 }
 0x59f   :  { %3824 = vmatpush3.bf16.msra.mxu1 %v4192_v24  ;;  %v4271_v24 = vld [vmem:[#allocation37] ss:$8 sps:$4 sm:$0xff]  }
 0x5a0   :  { %3825 = vmatprep.subr.bf16.mxu1 %v4193_v25 }
 0x5a3   :  { %3826 = vmatpush3.bf16.msra.mxu1 %v4193_v25  ;;  %v4273_v25 = vld [vmem:[#allocation37 + $0x4] ss:$8 sps:$4 sm:$0xff]  }
 0x5a4   :  { %3827 = vmatprep.subr.bf16.mxu1 %v4194_v26 }
 0x5a7   :  { %3828 = vmatpush3.bf16.msra.mxu1 %v4194_v26  ;;  %v4276_v26 = vld [vmem:[#allocation37 + $0x14] ss:$8 sps:$4 sm:$0xff]  }
 0x5a8   :  { %3829 = vmatprep.subr.bf16.mxu1 %v4195_v27 }
 0x5ab   :  { %3830 = vmatpush3.bf16.msra.mxu1 %v4195_v27  ;;  %v4274_v27 = vld [vmem:[#allocation37 + $0x10] ss:$8 sps:$4 sm:$0xff]  }
 0x5ac   :  { %3831 = vmatprep.subr.bf16.mxu1 %v4196_v28 }
 0x5af   :  { %3832 = vmatpush3.bf16.msra.mxu1 %v4196_v28  ;;  %v4279_v28 = vld [vmem:[#allocation37 + $0x24] ss:$8 sps:$4 sm:$0xff]  }
 0x5b0   :  { %3833 = vmatprep.subr.bf16.mxu1 %v4197_v29 }
 0x5b3   :  { %3834 = vmatpush3.bf16.msra.mxu1 %v4197_v29  ;;  %v4277_v29 = vld [vmem:[#allocation37 + $0x20] ss:$8 sps:$4 sm:$0xff]  }
 0x5b4   :  { %3835 = vmatprep.subr.bf16.mxu1 %v4198_v30 }
 0x5b7   :  { %3836 = vmatpush3.bf16.msra.mxu1 %v4198_v30  ;;  %v4282_v30 = vld [vmem:[#allocation37 + $0x34] ss:$8 sps:$4 sm:$0xff]  }
 0x5b8   :  { %2694 = vmatprep.subr.bf16.mxu1 %v4273_v25  ;;  %v4292_v25 = vld [vmem:[#allocation37 + $0x70] ss:$8 sps:$4 sm:$0xff]  }
 0x5ba   :  { %3838 = vmatmul.mubr.msk.bf16.vlgmr.msra.gmra.mrb[4].mxu1 %vm656_vm3, %v1716_v17  ;;  %v4246_v17 = vld [vmem:[#allocation25 + $0x74] ss:$8 sps:$4 sm:$0xff]  }
 0x5bb   :  { %2726 = vmatprep.mubr.bf16.mxu1 %v5074_v0  ;;  %2695 = vmatpush1.bf16.msra.mxu1 %v4271_v24  ;;  %v4294_v24 = vld [vmem:[#allocation37 + $0x74] ss:$8 sps:$4 sm:$0xff]  }
 0x5bc   :  { %2696 = vmatprep.subr.bf16.mxu1 %v4276_v26  ;;  %v4297_v26 = vld [vmem:[#allocation36 + $0x4] ss:$8 sps:$4 sm:$0xff]  }
 0x5bf   :  { %2697 = vmatpush1.bf16.msra.mxu1 %v4274_v27  ;;  %v3519_v27 = vld [vmem:[#allocation34] ss:$0 sm:$0xff] }
 0x5c0   :  { %2698 = vmatprep.subr.bf16.mxu1 %v4279_v28 }
 0x5c3   :  { %2699 = vmatpush1.bf16.msra.mxu1 %v4277_v29 }
 0x5c4   :  { %2700 = vmatprep.subr.bf16.mxu1 %v4282_v30 }
 0x5c7   :  { %2701 = vmatpush1.bf16.msra.mxu1 %v4280_v31 }
 0x5c8   :  { %2702 = vmatprep.subr.bf16.mxu1 %v4285_v32 }
 0x5cb   :  { %2703 = vmatpush1.bf16.msra.mxu1 %v4283_v33 }
 0x68d   :  { %v3839_v39 = vpop.f32.mrb[4].mxu1 }
 0x68e   :  { %v1848_v40 = vadd.f32 %v3839_v39, %v3457_v38  ;;  %v1820_v41 = vpop.f32.mrb[5].mxu1 }
 0x68f   :  { %v1846_v42 = vadd.f32 %v3457_v38, %v1820_v41  ;;  %v3840_v43 = vpop.f32.mrb[6].mxu1 }
 0x690   :  { %v1852_v44 = vadd.f32 %v1848_v40, %v5544_v6  ;;  %v1849_v45 = vadd.f32 %v3840_v43, %v3457_v38  ;;  %v1823_v47 = vpop.f32.mrb[7].mxu1  ;;  %v4226_v6 = vld [vmem:[#allocation25 + $0x10] ss:$8 sps:$4 sm:$0xff]  }
 0x691   :  { %v1850_v49 = vadd.f32 %v1846_v42, %v5540_v53  ;;  %v1847_v50 = vadd.f32 %v3457_v38, %v1823_v47 }
 0x692   :  { %v1853_v51 = vadd.f32 %v1849_v45, %v5548_v11  ;;  %v1856_v55 = vmax.f32 %v1852_v44, 0.0  ;;  %v4237_v11 = vld [vmem:[#allocation25 + $0x44] ss:$8 sps:$4 sm:$0xff]  }
 0x693   :  { %v1851_v52 = vadd.f32 %v1847_v50, %v5542_v59  ;;  %v1854_v57 = vmax.f32 %v1850_v49, 0.0  ;;  %v4231_v59 = vld [vmem:[#allocation25 + $0x24] ss:$8 sps:$4 sm:$0xff]  }
 0x694   :  { %v1857_v56 = vmax.f32 %v1853_v51, 0.0 }
 0x695   :  { %v1855_v60 = vmax.f32 %v1851_v52, 0.0 }
 0x696   :  { %v1859_v61 = vpack.c.bf16 %v1857_v56, %v1856_v55 }
 0x697   :  { %v1858_v62 = vpack.c.bf16 %v1855_v60, %v1854_v57 }
 0x698   :  { %v1879_v2 = vrot.slane %v1859_v61, 6 }
 0x699   :  { %v1878_v3 = vrot.slane %v1858_v62, 6 }
 0x69b   :  { %3475 = vmatmul.mubr.msk.bf16.vlgmr.msra.gmra.mrb[20].mxu0 %vm5513_vm4, %v1878_v3  ;;  %v1880_v53 = vsel %vm506_vm1, %v1878_v3, %v1879_v2 }
 0x69c   :  { %2115 = vmatpush1.bf16.msra.mxu0 %v4223_v1  ;;  %2023 = vmatprep.mubr.bf16.mxu0 %v5074_v0 }
 0x69d   :  { %2116 = vmatprep.subr.bf16.mxu0 %v4228_v5 }
 0x6a0   :  { %2117 = vmatpush1.bf16.msra.mxu0 %v4226_v6 }
 0x6a1   :  { %2118 = vmatprep.subr.bf16.mxu0 %v4231_v59  ;;  %v4256_v59 = vld [vmem:[#allocation30 + $0x8] sm:$0xff]  }
 0x6a3   :  { %2024 = vmatmul.mubr.bf16.gmra.mrb[24].mxu0 %v1880_v53 }
 0x6a4   :  { %2119 = vmatpush1.bf16.msra.mxu0 %v4229_v7  ;;  %2146 = vmatprep.mubr.bf16.mxu0 %v5074_v0 }
 0x6a5   :  { %2120 = vmatprep.subr.bf16.mxu0 %v4234_v9 }
 0x6a8   :  { %2121 = vmatpush1.bf16.msra.mxu0 %v4232_v10  ;;  %v4257_v10 = vld [vmem:[#allocation30 + $0x10] sm:$0xff]  }
 0x6a9   :  { %2122 = vmatprep.subr.bf16.mxu0 %v4237_v11  ;;  %v4258_v11 = vld [vmem:[#allocation30 + $0x18] sm:$0xff]  }
 0x6ac   :  { %2123 = vmatpush1.bf16.msra.mxu0 %v4235_v12  ;;  %v4259_v12 = vld [vmem:[#allocation30 + $0x20] sm:$0xff]  }
 0x6ad   :  { %2124 = vmatprep.subr.bf16.mxu0 %v4240_v13  ;;  %v4260_v13 = vld [vmem:[#allocation30 + $0x28] sm:$0xff]  }
 0x6b0   :  { %2125 = vmatpush1.bf16.msra.mxu0 %v4238_v14  ;;  %v4261_v14 = vld [vmem:[#allocation30 + $0x30] sm:$0xff]  }
 0x6b1   :  { %2126 = vmatprep.subr.bf16.mxu0 %v4243_v15  ;;  %v4262_v15 = vld [vmem:[#allocation30 + $0x38] sm:$0xff]  }
 0x6b4   :  { %2127 = vmatpush1.bf16.msra.mxu0 %v4241_v16  ;;  %v4263_v16 = vld [vmem:[#allocation33] sm:$0xff]  }
 0x6b5   :  { %2128 = vmatprep.subr.bf16.mxu0 %v4246_v17  ;;  %v4264_v17 = vld [vmem:[#allocation33 + $0x8] sm:$0xff]  }
 0x6b8   :  { %2129 = vmatpush1.bf16.msra.mxu0 %v4244_v18  ;;  %v4265_v18 = vld [vmem:[#allocation33 + $0x10] sm:$0xff]  }
 0x6b9   :  { %3841 = vmatprep.subr.bf16.mxu0 %v4247_v19 }
 0x6bb   :  { %2147 = vmatmul.mubr.bf16.vlgmr.msra.gmra.mrb[20].mxu0 %v1858_v62 }
 0x6bc   :  { %2156 = vmatprep.mubr.bf16.mxu0 %v5074_v0  ;;  %3842 = vmatpush3.bf16.msra.mxu0 %v4247_v19  ;;  %v4266_v19 = vld [vmem:[#allocation33 + $0x18] sm:$0xff]  }
 0x6bd   :  { %3843 = vmatprep.subr.bf16.mxu0 %v4248_v54 }
 0x6c0   :  { %3844 = vmatpush3.bf16.msra.mxu0 %v4248_v54  ;;  %v4267_v54 = vld [vmem:[#allocation33 + $0x20] sm:$0xff]  }
 0x6c1   :  { %3845 = vmatprep.subr.bf16.mxu0 %v4249_v4 }
 0x6c3   :  { %2157 = vmatmul.mubr.bf16.gmra.mrb[24].mxu0 %v1859_v61 }
 0x6c4   :  { %3846 = vmatpush3.bf16.msra.mxu0 %v4249_v4  ;;  %v4268_v4 = vld [vmem:[#allocation33 + $0x28] sm:$0xff]  }
 0x6c5   :  { %3847 = vmatprep.subr.bf16.mxu0 %v4250_v58 }
 0x6c8   :  { %3848 = vmatpush3.bf16.msra.mxu0 %v4250_v58  ;;  %v4269_v58 = vld [vmem:[#allocation33 + $0x30] sm:$0xff]  }
 0x6c9   :  { %3849 = vmatprep.subr.bf16.mxu0 %v4251_v8 }
 0x6cc   :  { %3850 = vmatpush3.bf16.msra.mxu0 %v4251_v8  ;;  %v4270_v8 = vld [vmem:[#allocation33 + $0x38] sm:$0xff]  }
 0x6cd   :  { %3851 = vmatprep.subr.bf16.mxu0 %v4252_v20 }
 0x6d0   :  { %3852 = vmatpush3.bf16.msra.mxu0 %v4252_v20  ;;  %v4288_v20 = vld [vmem:[#allocation37 + $0x54] ss:$8 sps:$4 sm:$0xff]  }
 0x6d1   :  { %3853 = vmatprep.subr.bf16.mxu0 %v4253_v21  ;;  %2704 = vmatprep.subr.bf16.mxu1 %v4288_v20 }
 0x6d4   :  { %3854 = vmatpush3.bf16.msra.mxu0 %v4253_v21  ;;  %v4286_v21 = vld [vmem:[#allocation37 + $0x50] ss:$8 sps:$4 sm:$0xff]  }
 0x6d5   :  { %3855 = vmatprep.subr.bf16.mxu0 %v4254_v22  ;;  %2705 = vmatpush1.bf16.msra.mxu1 %v4286_v21 }
 0x6d8   :  { %3856 = vmatpush3.bf16.msra.mxu0 %v4254_v22  ;;  %v4291_v22 = vld [vmem:[#allocation37 + $0x64] ss:$8 sps:$4 sm:$0xff]  }
 0x6d9   :  { %3861 = vmatprep.subr.bf16.mxu0 %v4255_v23  ;;  %2706 = vmatprep.subr.bf16.mxu1 %v4291_v22 }
 0x78e   :  { %v2148_v37 = vpop.f32.mrb[20].mxu0 }
 0x78f   :  { %v2179_v38 = vadd.f32 %v2172_v35, %v2148_v37  ;;  %v2150_v39 = vpop.f32.mrb[21].mxu0 }
 0x790   :  { %v5566_v40 = vadd.f32 %v2176_v36, %v2150_v39  ;;  %v2152_v41 = vpop.f32.mrb[22].mxu0 }
 0x791   :  { %v2181_v42 = vadd.f32 %v2172_v35, %v2152_v41  ;;  %v2154_v43 = vpop.f32.mrb[23].mxu0  ;;  %v2187_v45 = vmax.f32 %v2179_v38, 0.0 }
 0x792   :  { %v5568_v44 = vadd.f32 %v2176_v36, %v2154_v43 }
 0x793   :  { %v2188_v47 = vmax.f32 %v2181_v42, 0.0 }
 0x795   :  { %v2191_v49 = vpack.c.bf16 %v2188_v47, %v2187_v45 }
 0x796   :  { %v2158_v50 = vpop.f32.mrb[24].mxu0 }
 0x797   :  { %v2183_v51 = vadd.f32 %v2172_v35, %v2158_v50  ;;  %v2160_v52 = vpop.f32.mrb[25].mxu0  ;;  %v2211_v55 = vrot.slane %v2191_v49, 6  ;;  %v2428_v53 = vrot.slane %v2191_v49, 2  ;;  %v4295_v50 = vld [vmem:[#allocation36] ss:$8 sps:$4 sm:$0xff]  }
 0x798   :  { %v5570_v56 = vadd.f32 %v2176_v36, %v2160_v52  ;;  %v2162_v57 = vpop.f32.mrb[26].mxu0 }
 0x799   :  { %v2185_v60 = vadd.f32 %v2172_v35, %v2162_v57  ;;  %v2164_v61 = vpop.f32.mrb[27].mxu0  ;;  %3857 = vmatprep.mubr.msk.bf16.mxu0 %vm5513_vm4, %v2211_v55  ;;  %v2189_v1 = vmax.f32 %v2183_v51, 0.0  ;;  %v4301_v57 = vld [vmem:[#allocation36 + $0x20] ss:$8 sps:$4 sm:$0xff]  }
 0x79a   :  { %v5574_v62 = vadd.f32 %v2176_v36, %v2164_v61  ;;  %v4304_v61 = vld [vmem:[#allocation36 + $0x30] ss:$8 sps:$4 sm:$0xff]  }
 0x79b   :  { %v2190_v2 = vmax.f32 %v2185_v60, 0.0  ;;  %v4306_v60 = vld [vmem:[#allocation36 + $0x34] ss:$8 sps:$4 sm:$0xff]  }
 0x79d   :  { %v2192_v3 = vpack.c.bf16 %v2190_v2, %v2189_v1  ;;  %v4307_v1 = vld [vmem:[#allocation36 + $0x40] ss:$8 sps:$4 sm:$0xff]   ;;  %v4312_v2 = vld [vmem:[#allocation36 + $0x54] ss:$8 sps:$4 sm:$0xff]  }
 0x79f   :  { %v2212_v5 = vrot.slane %v2192_v3, 6  ;;  %v2429_v6 = vrot.slane %v2192_v3, 2 }
 0x7a1   :  { %v2213_v7 = vsel %vm506_vm1, %v2211_v55, %v2212_v5  ;;  %v2430_v9 = vsel %vm656_vm3, %v2428_v53, %v2429_v6  ;;  %v4300_v55 = vld [vmem:[#allocation36 + $0x14] ss:$8 sps:$4 sm:$0xff]   ;;  %v4315_v5 = vld [vmem:[#allocation36 + $0x64] ss:$8 sps:$4 sm:$0xff]   ;;  %v4313_v53 = vld [vmem:[#allocation36 + $0x60] ss:$8 sps:$4 sm:$0xff]  }
 0x7a2   :  { %3858 = vmatmul.mubr.bf16.vlgmr.msra.gmra.mrb[28].mxu0 %v2213_v7  ;;  %v4319_v7 = vld [vmem:[#allocation42] sm:$0xff]  }
 0x7a3   :  { %3862 = vmatpush3.bf16.msra.mxu0 %v4255_v23  ;;  %3877 = vmatprep.mubr.bf16.mxu0 %v2191_v49  ;;  %v4289_v23 = vld [vmem:[#allocation37 + $0x60] ss:$8 sps:$4 sm:$0xff]  }
 0x7a4   :  { %3863 = vmatprep.subr.bf16.mxu0 %v4256_v59  ;;  %2707 = vmatpush1.bf16.msra.mxu1 %v4289_v23 }
 0x7a5   :  { %2708 = vmatprep.subr.bf16.mxu1 %v4294_v24 }
 0x7a7   :  { %3864 = vmatpush3.bf16.msra.mxu0 %v4256_v59  ;;  %v4316_v59 = vld [vmem:[#allocation36 + $0x70] ss:$8 sps:$4 sm:$0xff]  }
 0x7a8   :  { %3865 = vmatprep.subr.bf16.mxu0 %v4257_v10  ;;  %2709 = vmatpush1.bf16.msra.mxu1 %v4292_v25 }
 0x7a9   :  { %2827 = vmatprep.subr.bf16.mxu1 %v4297_v26 }
 0x7ab   :  { %3866 = vmatpush3.bf16.msra.mxu0 %v4257_v10  ;;  %v4321_v10 = vld [vmem:[#allocation42 + $0x10] sm:$0xff]  }
 0x7ac   :  { %3867 = vmatprep.subr.bf16.mxu0 %v4258_v11 }
 0x7af   :  { %3868 = vmatpush3.bf16.msra.mxu0 %v4258_v11  ;;  %v4322_v11 = vld [vmem:[#allocation42 + $0x18] sm:$0xff]  }
 0x7b0   :  { %3869 = vmatprep.subr.bf16.mxu0 %v4259_v12 }
 0x7b3   :  { %3870 = vmatpush3.bf16.msra.mxu0 %v4259_v12  ;;  %v4323_v12 = vld [vmem:[#allocation42 + $0x20] sm:$0xff]  }
 0x7b4   :  { %3871 = vmatprep.subr.bf16.mxu0 %v4260_v13 }
 0x7b7   :  { %3872 = vmatpush3.bf16.msra.mxu0 %v4260_v13  ;;  %v4324_v13 = vld [vmem:[#allocation42 + $0x28] sm:$0xff]  }
 0x7b8   :  { %3873 = vmatprep.subr.bf16.mxu0 %v4261_v14 }
 0x7bb   :  { %3874 = vmatpush3.bf16.msra.mxu0 %v4261_v14  ;;  %v4325_v14 = vld [vmem:[#allocation42 + $0x30] sm:$0xff]  }
 0x7bc   :  { %3875 = vmatprep.subr.bf16.mxu0 %v4262_v15 }
 0x7bf   :  { %3876 = vmatpush3.bf16.msra.mxu0 %v4262_v15  ;;  %v4327_v15 = vld [vmem:[#allocation40] sm:$0xff]  }
 0x7c0   :  { %3881 = vmatprep.subr.bf16.mxu0 %v4263_v16 }
 0x7c2   :  { %3878 = vmatmul.mubr.bf16.vlgmr.msra.gmra.mrb[28].mxu0 %v2192_v3  ;;  %v4310_v3 = vld [vmem:[#allocation36 + $0x50] ss:$8 sps:$4 sm:$0xff]  }
 0x7c3   :  { %3882 = vmatpush3.bf16.msra.mxu0 %v4263_v16  ;;  %3897 = vmatprep.mubr.bf16.mxu0 %v2430_v9  ;;  %v4320_v9 = vld [vmem:[#allocation42 + $0x8] sm:$0xff]   ;;  %v2880_v16 = vld [vmem:[#allocation39] sm:$0x3] }
 0x7c4   :  { %3883 = vmatprep.subr.bf16.mxu0 %v4264_v17 }
 0x7c7   :  { %3884 = vmatpush3.bf16.msra.mxu0 %v4264_v17  ;;  %v2885_v17 = vrot.slane %v2880_v16, %v5502_v46 }
 0x7c8   :  { %3885 = vmatprep.subr.bf16.mxu0 %v4265_v18 }
 0x7cb   :  { %3886 = vmatpush3.bf16.msra.mxu0 %v4265_v18  ;;  %v2889_v18 = vrot.slane %v2880_v16, %v5504_v48 }
 0x7cc   :  { %3887 = vmatprep.subr.bf16.mxu0 %v4266_v19 }
 0x7cf   :  { %3888 = vmatpush3.bf16.msra.mxu0 %v4266_v19 }
 0x7d0   :  { %3889 = vmatprep.subr.bf16.mxu0 %v4267_v54 }
 0x7d3   :  { %3890 = vmatpush3.bf16.msra.mxu0 %v4267_v54 }
 0x7d4   :  { %3891 = vmatprep.subr.bf16.mxu0 %v4268_v4 }
 0x7d7   :  { %3892 = vmatpush3.bf16.msra.mxu0 %v4268_v4 }
 0x7d8   :  { %3893 = vmatprep.subr.bf16.mxu0 %v4269_v58 }
 0x7db   :  { %3894 = vmatpush3.bf16.msra.mxu0 %v4269_v58 }
 0x7dc   :  { %3895 = vmatprep.subr.bf16.mxu0 %v4270_v8 }
 0x7df   :  { %3896 = vmatpush3.bf16.msra.mxu0 %v4270_v8 }
 0x7e2   :  { %3898 = vmatmul.mubr.msk.bf16.vlgmr.msra.gmra.mrb[28].mxu0 %vm656_vm3, %v2429_v6  ;;  %v4318_v6 = vld [vmem:[#allocation36 + $0x74] ss:$8 sps:$4 sm:$0xff]  }
 0x8b5   :  { %v3899_v28 = vpop.f32.mrb[28].mxu0 }
 0x8b6   :  { %v2561_v29 = vadd.f32 %v3899_v28, %v3519_v27  ;;  %v2533_v30 = vpop.f32.mrb[29].mxu0 }
 0x8b7   :  { %v2559_v31 = vadd.f32 %v3519_v27, %v2533_v30  ;;  %v3900_v32 = vpop.f32.mrb[30].mxu0 }
 0x8b8   :  { %v2565_v33 = vadd.f32 %v2561_v29, %v5570_v56  ;;  %v2562_v34 = vadd.f32 %v3900_v32, %v3519_v27  ;;  %v2536_v35 = vpop.f32.mrb[31].mxu0  ;;  %v4298_v56 = vld [vmem:[#allocation36 + $0x10] ss:$8 sps:$4 sm:$0xff]  }
 0x8b9   :  { %v2563_v36 = vadd.f32 %v2559_v31, %v5566_v40  ;;  %v2560_v37 = vadd.f32 %v3519_v27, %v2536_v35 }
 0x8ba   :  { %v2566_v38 = vadd.f32 %v2562_v34, %v5574_v62  ;;  %v2569_v41 = vmax.f32 %v2565_v33, 0.0  ;;  %v4309_v62 = vld [vmem:[#allocation36 + $0x44] ss:$8 sps:$4 sm:$0xff]  }
 0x8bb   :  { %v2564_v39 = vadd.f32 %v2560_v37, %v5568_v44  ;;  %v2567_v43 = vmax.f32 %v2563_v36, 0.0  ;;  %v4303_v44 = vld [vmem:[#allocation36 + $0x24] ss:$8 sps:$4 sm:$0xff]  }
 0x8bc   :  { %v2570_v42 = vmax.f32 %v2566_v38, 0.0 }
 0x8bd   :  { %v2568_v45 = vmax.f32 %v2564_v39, 0.0  ;;  %v4328_v39 = vld [vmem:[#allocation40 + $0x8] sm:$0xff]  }
 0x8be   :  { %v2572_v47 = vpack.c.bf16 %v2570_v42, %v2569_v41 }
 0x8bf   :  { %v2571_v49 = vpack.c.bf16 %v2568_v45, %v2567_v43  ;;  %v4329_v43 = vld [vmem:[#allocation40 + $0x10] sm:$0xff]   ;;  %v4331_v45 = vld [vmem:[#allocation40 + $0x20] sm:$0xff]  }
 0x8c0   :  { %v2592_v51 = vrot.slane %v2572_v47, 6 }
 0x8c1   :  { %v2591_v52 = vrot.slane %v2571_v49, 6 }
 0x8c3   :  { %3537 = vmatmul.mubr.msk.bf16.vlgmr.msra.gmra.mrb[8].mxu1 %vm5513_vm4, %v2591_v52  ;;  %v2593_v40 = vsel %vm506_vm1, %v2591_v52, %v2592_v51  ;;  %v4335_v51 = vld [vmem:[#allocation43] sm:$0xff]   ;;  %v4336_v52 = vld [vmem:[#allocation43 + $0x8] sm:$0xff]  }
 0x8c4   :  { %2828 = vmatpush1.bf16.msra.mxu1 %v4295_v50  ;;  %2736 = vmatprep.mubr.bf16.mxu1 %v5074_v0  ;;  %v4334_v50 = vld [vmem:[#allocation40 + $0x38] sm:$0xff]  }
 0x8c5   :  { %2829 = vmatprep.subr.bf16.mxu1 %v4300_v55  ;;  %v4337_v55 = vld [vmem:[#allocation43 + $0x10] sm:$0xff]  }
 0x8c8   :  { %2830 = vmatpush1.bf16.msra.mxu1 %v4298_v56  ;;  %v4339_v56 = vld [vmem:[#allocation43 + $0x20] sm:$0xff]  }
 0x8c9   :  { %2831 = vmatprep.subr.bf16.mxu1 %v4303_v44  ;;  %v4340_v44 = vld [vmem:[#allocation43 + $0x28] sm:$0xff]  }
 0x8cb   :  { %2737 = vmatmul.mubr.bf16.gmra.mrb[12].mxu1 %v2593_v40  ;;  %v4338_v40 = vld [vmem:[#allocation43 + $0x18] sm:$0xff]  }
 0x8cc   :  { %2832 = vmatpush1.bf16.msra.mxu1 %v4301_v57  ;;  %2859 = vmatprep.mubr.bf16.mxu1 %v5074_v0  ;;  %v4341_v57 = vld [vmem:[#allocation43 + $0x30] sm:$0xff]  }
 0x8cd   :  { %2833 = vmatprep.subr.bf16.mxu1 %v4306_v60  ;;  %v4342_v60 = vld [vmem:[#allocation43 + $0x38] sm:$0xff]  }
 0x8d0   :  { %2834 = vmatpush1.bf16.msra.mxu1 %v4304_v61  ;;  %v3581_v61 = vld [vmem:[#allocation45] ss:$0 sm:$0xff] }
 0x8d1   :  { %2835 = vmatprep.subr.bf16.mxu1 %v4309_v62 }
 0x8d4   :  { %2836 = vmatpush1.bf16.msra.mxu1 %v4307_v1 }
 0x8d5   :  { %2837 = vmatprep.subr.bf16.mxu1 %v4312_v2 }
 0x8d8   :  { %2838 = vmatpush1.bf16.msra.mxu1 %v4310_v3 }
 0x8d9   :  { %2839 = vmatprep.subr.bf16.mxu1 %v4315_v5 }
 0x8dc   :  { %2840 = vmatpush1.bf16.msra.mxu1 %v4313_v53 }
 0x8dd   :  { %2841 = vmatprep.subr.bf16.mxu1 %v4318_v6 }
 0x8e0   :  { %2842 = vmatpush1.bf16.msra.mxu1 %v4316_v59 }
 0x8e1   :  { %3901 = vmatprep.subr.bf16.mxu1 %v4319_v7 }
 0x8e3   :  { %2860 = vmatmul.mubr.bf16.vlgmr.msra.gmra.mrb[8].mxu1 %v2571_v49  ;;  %v4333_v49 = vld [vmem:[#allocation40 + $0x30] sm:$0xff]  }
 0x8e4   :  { %2869 = vmatprep.mubr.bf16.mxu1 %v5074_v0  ;;  %3902 = vmatpush3.bf16.msra.mxu1 %v4319_v7  ;;  %v4326_v0 = vld [vmem:[#allocation42 + $0x38] sm:$0xff]  }
 0x8e5   :  { %3903 = vmatprep.subr.bf16.mxu1 %v4320_v9 }
 0x8e8   :  { %3904 = vmatpush3.bf16.msra.mxu1 %v4320_v9 }
 0x8e9   :  { %3905 = vmatprep.subr.bf16.mxu1 %v4321_v10 }
 0x8eb   :  { %2870 = vmatmul.mubr.bf16.gmra.mrb[12].mxu1 %v2572_v47  ;;  %v4332_v47 = vld [vmem:[#allocation40 + $0x28] sm:$0xff]  }
 0x8ec   :  { %3906 = vmatpush3.bf16.msra.mxu1 %v4321_v10 }
 0x8ed   :  { %3907 = vmatprep.subr.bf16.mxu1 %v4322_v11 }
 0x8f0   :  { %3908 = vmatpush3.bf16.msra.mxu1 %v4322_v11 }
 0x8f1   :  { %3909 = vmatprep.subr.bf16.mxu1 %v4323_v12 }
 0x8f4   :  { %3910 = vmatpush3.bf16.msra.mxu1 %v4323_v12 }
 0x8f5   :  { %3911 = vmatprep.subr.bf16.mxu1 %v4324_v13 }
 0x8f8   :  { %3912 = vmatpush3.bf16.msra.mxu1 %v4324_v13 }
 0x8f9   :  { %3913 = vmatprep.subr.bf16.mxu1 %v4325_v14 }
 0x8fc   :  { %3914 = vmatpush3.bf16.msra.mxu1 %v4325_v14 }
 0x8fd   :  { %3915 = vmatprep.subr.bf16.mxu1 %v4326_v0 }
 0x900   :  { %3916 = vmatpush3.bf16.msra.mxu1 %v4326_v0 }
 0x901   :  { %3921 = vmatprep.subr.bf16.mxu1 %v4327_v15 }
 0x9b6   :  { %v2861_v19 = vpop.f32.mrb[8].mxu1 }
 0x9b7   :  { %v2892_v54 = vadd.f32 %v2885_v17, %v2861_v19  ;;  %v2863_v4 = vpop.f32.mrb[9].mxu1 }
 0x9b8   :  { %v5591_v58 = vadd.f32 %v2889_v18, %v2863_v4  ;;  %v2865_v8 = vpop.f32.mrb[10].mxu1 }
 0x9b9   :  { %v2894_v20 = vadd.f32 %v2885_v17, %v2865_v8  ;;  %v2867_v21 = vpop.f32.mrb[11].mxu1  ;;  %v2900_v23 = vmax.f32 %v2892_v54, 0.0 }
 0x9ba   :  { %v5593_v22 = vadd.f32 %v2889_v18, %v2867_v21 }
 0x9bb   :  { %v2901_v24 = vmax.f32 %v2894_v20, 0.0 }
 0x9bd   :  { %v2904_v25 = vpack.c.bf16 %v2901_v24, %v2900_v23 }
 0x9be   :  { %v2871_v26 = vpop.f32.mrb[12].mxu1 }
 0x9bf   :  { %v2896_v27 = vadd.f32 %v2885_v17, %v2871_v26  ;;  %v2873_v28 = vpop.f32.mrb[13].mxu1  ;;  %v2924_v29 = vrot.slane %v2904_v25, 6  ;;  %v3141_v37 = vrot.slane %v2904_v25, 2 }
 0x9c0   :  { %v5595_v46 = vadd.f32 %v2889_v18, %v2873_v28  ;;  %v2875_v48 = vpop.f32.mrb[14].mxu1 }
 0x9c1   :  { %v2898_v30 = vadd.f32 %v2885_v17, %v2875_v48  ;;  %v2877_v31 = vpop.f32.mrb[15].mxu1  ;;  %3917 = vmatprep.mubr.msk.bf16.mxu1 %vm5513_vm4, %v2924_v29  ;;  %v2902_v33 = vmax.f32 %v2896_v27, 0.0 }
 0x9c2   :  { %v5599_v32 = vadd.f32 %v2889_v18, %v2877_v31 }
 0x9c3   :  { %v2903_v34 = vmax.f32 %v2898_v30, 0.0 }
 0x9c5   :  { %v2905_v35 = vpack.c.bf16 %v2903_v34, %v2902_v33 }
 0x9c7   :  { %v2925_v36 = vrot.slane %v2905_v35, 6  ;;  %v3142_v38 = vrot.slane %v2905_v35, 2 }
 0x9c9   :  { %v2926_v41 = vsel %vm506_vm1, %v2924_v29, %v2925_v36  ;;  %v3143_v42 = vsel %vm656_vm3, %v3141_v37, %v3142_v38 }
 0x9ca   :  { %3918 = vmatmul.mubr.bf16.vlgmr.msra.gmra.mrb[16].mxu1 %v2926_v41 }
 0x9cb   :  { %3922 = vmatpush3.bf16.msra.mxu1 %v4327_v15  ;;  %3937 = vmatprep.mubr.bf16.mxu1 %v2904_v25 }
 0x9cc   :  { %3923 = vmatprep.subr.bf16.mxu1 %v4328_v39 }
 0x9cf   :  { %3924 = vmatpush3.bf16.msra.mxu1 %v4328_v39 }
 0x9d0   :  { %3925 = vmatprep.subr.bf16.mxu1 %v4329_v43 }
 0x9d3   :  { %3926 = vmatpush3.bf16.msra.mxu1 %v4329_v43 }
 0x9d4   :  { %3927 = vmatprep.subr.bf16.mxu1 %v4330_v63 }
 0x9d7   :  { %3928 = vmatpush3.bf16.msra.mxu1 %v4330_v63 }
 0x9d8   :  { %3929 = vmatprep.subr.bf16.mxu1 %v4331_v45 }
 0x9db   :  { %3930 = vmatpush3.bf16.msra.mxu1 %v4331_v45 }
 0x9dc   :  { %3931 = vmatprep.subr.bf16.mxu1 %v4332_v47 }
 0x9df   :  { %3932 = vmatpush3.bf16.msra.mxu1 %v4332_v47 }
 0x9e0   :  { %3933 = vmatprep.subr.bf16.mxu1 %v4333_v49 }
 0x9e3   :  { %3934 = vmatpush3.bf16.msra.mxu1 %v4333_v49 }
 0x9e4   :  { %3935 = vmatprep.subr.bf16.mxu1 %v4334_v50 }
 0x9e7   :  { %3936 = vmatpush3.bf16.msra.mxu1 %v4334_v50 }
 0x9e8   :  { %3941 = vmatprep.subr.bf16.mxu1 %v4335_v51 }
 0x9ea   :  { %3938 = vmatmul.mubr.bf16.vlgmr.msra.gmra.mrb[16].mxu1 %v2905_v35 }
 0x9eb   :  { %3942 = vmatpush3.bf16.msra.mxu1 %v4335_v51  ;;  %3957 = vmatprep.mubr.bf16.mxu1 %v3143_v42 }
 0x9ec   :  { %3943 = vmatprep.subr.bf16.mxu1 %v4336_v52 }
 0x9ef   :  { %3944 = vmatpush3.bf16.msra.mxu1 %v4336_v52 }
 0x9f0   :  { %3945 = vmatprep.subr.bf16.mxu1 %v4337_v55 }
 0x9f3   :  { %3946 = vmatpush3.bf16.msra.mxu1 %v4337_v55 }
 0x9f4   :  { %3947 = vmatprep.subr.bf16.mxu1 %v4338_v40 }
 0x9f7   :  { %3948 = vmatpush3.bf16.msra.mxu1 %v4338_v40 }
 0x9f8   :  { %3949 = vmatprep.subr.bf16.mxu1 %v4339_v56 }
 0x9fb   :  { %3950 = vmatpush3.bf16.msra.mxu1 %v4339_v56 }
 0x9fc   :  { %3951 = vmatprep.subr.bf16.mxu1 %v4340_v44 }
 0x9ff   :  { %3952 = vmatpush3.bf16.msra.mxu1 %v4340_v44 }
 0xa00   :  { %3953 = vmatprep.subr.bf16.mxu1 %v4341_v57 }
 0xa03   :  { %3954 = vmatpush3.bf16.msra.mxu1 %v4341_v57 }
 0xa04   :  { %3955 = vmatprep.subr.bf16.mxu1 %v4342_v60 }
 0xa07   :  { %3956 = vmatpush3.bf16.msra.mxu1 %v4342_v60 }
 0xa0a   :  { %3958 = vmatmul.mubr.msk.bf16.vlgmr.msra.gmra.mrb[16].mxu1 %vm656_vm3, %v3142_v38 }
 0xadd   :  { %v3959_v62 = vpop.f32.mrb[16].mxu1 }
 0xade   :  { %v3274_v1 = vadd.f32 %v3959_v62, %v3581_v61  ;;  %v3246_v2 = vpop.f32.mrb[17].mxu1 }
 0xadf   :  { %v3272_v3 = vadd.f32 %v3581_v61, %v3246_v2  ;;  %v3960_v5 = vpop.f32.mrb[18].mxu1 }
 0xae0   :  { %v3278_v53 = vadd.f32 %v3274_v1, %v5595_v46  ;;  %v3275_v6 = vadd.f32 %v3960_v5, %v3581_v61  ;;  %v3249_v59 = vpop.f32.mrb[19].mxu1 }
 0xae1   :  { %v3276_v7 = vadd.f32 %v3272_v3, %v5591_v58  ;;  %v3273_v9 = vadd.f32 %v3581_v61, %v3249_v59 }
 0xae2   :  { %v3279_v10 = vadd.f32 %v3275_v6, %v5599_v32  ;;  %v3282_v12 = vmax.f32 %v3278_v53, 0.0 }
 0xae3   :  { %v3277_v11 = vadd.f32 %v3273_v9, %v5593_v22  ;;  %v3280_v14 = vmax.f32 %v3276_v7, 0.0 }
 0xae4   :  { %v3283_v13 = vmax.f32 %v3279_v10, 0.0 }
 0xae5   :  { %v3281_v0 = vmax.f32 %v3277_v11, 0.0 }
 0xae6   :  { %v3598_v15 = vpack.c.bf16 %v3283_v13, %v3282_v12 }
 0xae7   :  { %v3593_v16 = vpack.c.bf16 %v3281_v0, %v3280_v14 }
 0xae8   :  { %3600 = vst [vmem:[%s5233_s17 + $0x8] sm:$0xff] %v3598_v15  }
 0xae9   :  { %3594 = vst [vmem:[%s5233_s17] sm:$0xff] %v3593_v16  }
 0xaea   :  { %3308 = vsyncpa [#allocation3], 1 }
 0xaeb   :  { %3309 = vsyncpa [#allocation5], 1 }
 0xaec   :  { %3310 = vsyncpa [#allocation8], 1 }
 0xaed   :  { %3311 = vsyncpa [#allocation11], 1 }
 0xaee   :  { %3312 = vsyncpa [#allocation14], 1 }
 0xaef   :  { %3313 = vsyncpa [#allocation17], 1 }
 0xaf0   :  { %3314 = vsyncpa [#allocation20], 1 }
 0xaf1   :  { %3315 = vsyncpa [#allocation23], 1 }
 0xaf2   :  { %3316 = vsyncpa [#allocation26], 1 }
 0xaf3   :  { %3317 = vsyncpa [#allocation29], 1 }
 0xaf4   :  { %3318 = vsyncpa [#allocation32], 1 }
 0xaf5   :  { %3319 = vsyncpa [#allocation35], 1 }
 0xaf6   :  { %3320 = vsyncpa [#allocation38], 1 }
 0xaf7   :  { %3321 = vsyncpa [#allocation41], 1 }
 0xaf8   :  { %3322 = vsyncpa [#allocation44], 1 }

</bundles_post_ra>
